<compile_context>
chip_gen: v7x
topology: tpu7x:2x2x1
jax: 0.10.0
libtpu: 0.0.40
codegen_flags: <defaults>
</compile_context>

<pallas_src>
import math
from functools import partial

import jax
import jax.numpy as jnp
from jax import lax
from jax.experimental import pallas as pl
from jax.experimental.pallas import tpu as pltpu


_CHUNK = 16   # timesteps per scan chunk (seq is padded to a multiple of this)
_PAD = 8      # sublane-aligned left pad for the causal-conv buffer (d_conv-1 <= 8)


def _sigmoid(x):
    return 1.0 / (1.0 + jnp.exp(-x))


def _softplus(x):
    return jnp.where(x > 20.0, x, jnp.log(1.0 + jnp.exp(jnp.minimum(x, 20.0))))


# ----------------------------------------------------------------------------
# Fused Block kernel: add + LayerNorm + Mamba mixer (one batch element per step)
# ----------------------------------------------------------------------------
def _vim_block_kernel(eps, d_inner, d_state, d_conv, dt_rank, has_residual, *refs):
    f32 = jnp.float32
    bf16 = jnp.bfloat16

    if has_residual:
        (h_ref, r_ref, nw_ref, nb_ref, in_w_ref, conv_w_ref, conv_b_ref,
         xp_w_ref, dt_w_ref, dt_b_ref, arep_ref, rsel_ref, smask_ref, bones_ref,
         tsel_ref, cmask_ref, d_ref, out_w_ref,
         o_ref, res_ref,
         xpad_s, xc_s, dt_s, b_s, c_s, z_s, y_s, da_s, dbx_s, hall_s) = refs
    else:
        (h_ref, nw_ref, nb_ref, in_w_ref, conv_w_ref, conv_b_ref,
         xp_w_ref, dt_w_ref, dt_b_ref, arep_ref, rsel_ref, smask_ref, bones_ref,
         tsel_ref, cmask_ref, d_ref, out_w_ref,
         o_ref, res_ref,
         xpad_s, xc_s, dt_s, b_s, c_s, z_s, y_s, da_s, dbx_s, hall_s) = refs
        r_ref = None

    Lp = h_ref.shape[1]
    CH = _CHUNK
    rows = CH * d_state
    nchunks = Lp // CH

    # ---- fused residual add + LayerNorm (residual_in_fp32 = True) ----
    if has_residual:
        res = r_ref[0].astype(f32) + h_ref[0].astype(f32)          # (Lp, D)
    else:
        res = h_ref[0].astype(f32)                                  # residual = hidden
    res_ref[...] = res[None]
    mean = jnp.mean(res, axis=-1, keepdims=True)
    cen = res - mean
    var = jnp.mean(cen * cen, axis=-1, keepdims=True)
    normed = cen * lax.rsqrt(var + eps) * nw_ref[...] + nb_ref[...]

    # ---- in_proj (bf16 MXU, f32 accumulate); SiLU gate parked in bf16 scratch ----
    xz = jnp.dot(normed.astype(bf16), in_w_ref[...], preferred_element_type=f32)
    x = xz[:, :d_inner]
    z = xz[:, d_inner:]
    z_s[...] = (z * _sigmoid(z)).astype(bf16)

    # ---- causal depthwise conv1d: aligned store into left-padded buffer, shifted reads ----
    xpad_s[pl.ds(0, _PAD), :] = jnp.zeros((_PAD, d_inner), f32)
    xpad_s[pl.ds(_PAD, Lp), :] = x                                   # sublane-aligned store
    acc = jnp.zeros((Lp, d_inner), f32) + conv_b_ref[...]
    for k in range(d_conv):                                          # static unroll (VPU MACs)
        acc = acc + (xpad_s[pl.ds(_PAD - (d_conv - 1) + k, Lp), :]
                     * conv_w_ref[pl.ds(k, 1), :])
    xc = acc * _sigmoid(acc)                                         # SiLU
    xc_s[...] = xc

    # ---- fused x_proj ([dt | B | C]) + dt_proj + softplus (kept f32 for dt numerics) ----
    xproj = jnp.dot(xc, xp_w_ref[...], preferred_element_type=f32)
    dt_lin = jnp.dot(xproj[:, :dt_rank], dt_w_ref[...],
                     preferred_element_type=f32) + dt_b_ref[...]
    dt_s[...] = _softplus(dt_lin)                                    # (Lp, d_inner)
    b_s[...] = xproj[:, dt_rank:dt_rank + d_state]                   # (Lp, d_state)
    c_s[...] = xproj[:, dt_rank + d_state:dt_rank + 2 * d_state]     # (Lp, d_state)

    # ---- phase 1: precompute dA / dBx for the whole sequence (off the serial path) ----
    #   dA [t*ds+s, :] = exp(dt[t, :] * A[s, :])
    #   dBx[t*ds+s, :] = B[t, s] * dt[t, :] * x[t, :]
    @pl.loop(0, nchunks)
    def _(ci):
        base = pl.multiple_of(ci * CH, CH)
        rbase = pl.multiple_of(ci * rows, rows)
        dt_c = dt_s[pl.ds(base, CH), :]                              # (CH, di)
        u_c = dt_c * xc_s[pl.ds(base, CH), :]                        # (CH, di)
        b_c = b_s[pl.ds(base, CH), :]                                # (CH, ds)
        dt_rep = jnp.dot(rsel_ref[...], dt_c, preferred_element_type=f32)   # (CH*ds, di)
        da_s[pl.ds(rbase, rows), :] = jnp.exp(dt_rep * arep_ref[...])
        # (CH*ds, ds) with one nonzero per row -> broadcast along CH cols -> mask to own t
        bm = jnp.dot(rsel_ref[...], b_c, preferred_element_type=f32) * smask_ref[...]
        bsel = jnp.dot(bm, bones_ref[...], preferred_element_type=f32) * rsel_ref[...]
        dbx_s[pl.ds(rbase, rows), :] = jnp.dot(bsel, u_c, preferred_element_type=f32)

    # ---- phase 2: serial scan -- only h = dA*h + dBx on the critical path ----
    def scan_chunk(ci, h):
        rbase = pl.multiple_of(ci * rows, rows)
        for t in range(CH):                                          # static unroll
            r = pl.multiple_of(rbase + t * d_state, d_state)
            h = da_s[pl.ds(r, d_state), :] * h + dbx_s[pl.ds(r, d_state), :]
            hall_s[pl.ds(r, d_state), :] = h.astype(bf16)            # aligned bf16 stash
        return h

    lax.fori_loop(0, nchunks, scan_chunk, jnp.zeros((d_state, d_inner), jnp.float32))

    # ---- phase 3: per-chunk y = C.h + D*x, gated with SiLU(z), stored bf16 ----
    @pl.loop(0, nchunks)
    def _(ci):
        base = pl.multiple_of(ci * CH, CH)
        rbase = pl.multiple_of(ci * rows, rows)
        c_c = c_s[pl.ds(base, CH), :]                                # (CH, ds)
        c_blk = (jnp.dot(c_c, tsel_ref[...], preferred_element_type=f32)
                 * cmask_ref[...])                                   # (CH, CH*ds) block-diag
        y_c = jnp.dot(c_blk.astype(bf16), hall_s[pl.ds(rbase, rows), :],
                      preferred_element_type=f32)                    # (CH, di)
        y_c = y_c + xc_s[pl.ds(base, CH), :] * d_ref[...]
        y_c = y_c * z_s[pl.ds(base, CH), :].astype(f32)
        y_s[pl.ds(base, CH), :] = y_c.astype(bf16)

    # ---- out_proj (bf16 MXU, f32 accumulate) ----
    out = jnp.dot(y_s[...], out_w_ref[...], preferred_element_type=jnp.float32)
    o_ref[...] = out[None].astype(o_ref.dtype)


# ----------------------------------------------------------------------------
# Block wrapper (parameters + pallas_call plumbing)
# ----------------------------------------------------------------------------
class VimBlock:
    def __init__(self, dim, d_state=16, d_conv=4, expand=2, eps=1e-5,
                 key=jax.random.PRNGKey(0)):
        self.dim = dim
        self.d_state = d_state
        self.d_conv = d_conv
        self.d_inner = expand * dim
        self.dt_rank = math.ceil(dim / 16)
        self.eps = eps

        ks = jax.random.split(key, 8)
        s = 0.1
        f32 = jnp.float32
        di, ds, dr, CH = self.d_inner, d_state, self.dt_rank, _CHUNK

        # LayerNorm
        self.norm_w = jnp.ones((1, dim), f32)
        self.norm_b = jnp.zeros((1, dim), f32)
        # Mamba mixer weights (pre-transposed). Big projections stored bf16 (MXU-native).
        self.in_w = (s * jax.random.normal(ks[0], (dim, 2 * di))).astype(jnp.bfloat16)
        self.out_w = (s * jax.random.normal(ks[1], (di, dim))).astype(jnp.bfloat16)
        self.conv_w = (s * jax.random.normal(ks[2], (d_conv, di))).astype(f32)
        self.conv_b = jnp.zeros((1, di), f32)
        # fused x_proj: columns = [dt(dr) | B(ds) | C(ds)] (kept f32: feeds dt/softplus/exp)
        self.xp_w = (s * jax.random.normal(ks[3], (di, dr + 2 * ds))).astype(f32)
        self.dt_w = (s * jax.random.normal(ks[4], (dr, di))).astype(f32)
        # NOTE: constant bias init (reference Mamba uses an inverse-softplus dt_init)
        self.dt_b = jnp.full((1, di), 0.1, f32)
        # A = -exp(A_log) with A_log = log(arange(1, d_state+1)), stored transposed
        self.A_T = -jnp.tile(jnp.arange(1, ds + 1, dtype=f32)[:, None], (1, di))  # (ds, di)
        self.Dp = jnp.ones((1, di), f32)
        # host-precomputed constants for the chunked precompute / output matmuls
        self.arep = jnp.tile(self.A_T, (CH, 1))                        # (CH*ds, di)
        self.rsel = jnp.repeat(jnp.eye(CH, dtype=f32), ds, axis=0)     # (CH*ds, CH)
        self.smask = jnp.tile(jnp.eye(ds, dtype=f32), (CH, 1))         # (CH*ds, ds)
        self.bones = jnp.ones((ds, CH), f32)                           # (ds, CH)
        self.tsel = jnp.tile(jnp.eye(ds, dtype=f32), (1, CH))          # (ds, CH*ds)
        self.cmask = jnp.repeat(jnp.eye(CH, dtype=f32), ds, axis=1)    # (CH, CH*ds)

    def _run(self, hidden, residual):
        B, Lp, D = hidden.shape
        di, ds, dc, dr = self.d_inner, self.d_state, self.d_conv, self.dt_rank
        has_res = residual is not None
        kernel = partial(_vim_block_kernel, float(self.eps), di, ds, dc, dr, has_res)

        weights = (self.norm_w, self.norm_b, self.in_w, self.conv_w, self.conv_b,
                   self.xp_w, self.dt_w, self.dt_b, self.arep, self.rsel, self.smask,
                   self.bones, self.tsel, self.cmask, self.Dp, self.out_w)

        io_spec = pl.BlockSpec((1, Lp, D), lambda b: (b, 0, 0))
        w_specs = [pl.BlockSpec(w.shape, lambda b: (0, 0)) for w in weights]
        in_specs = [io_spec] + ([io_spec] if has_res else []) + w_specs
        inputs = (hidden,) + ((residual,) if has_res else ()) + weights

        # explicit VMEM budget (v7x: 64 MiB physical; v5e/v6e: 128 MiB)
        w_bytes = sum(int(a.size) * a.dtype.itemsize for a in weights)
        io_bytes = Lp * D * 4 * (3 if has_res else 2)
        scratch_bytes = (4 * ((Lp + _PAD) * di + 2 * Lp * di + 2 * Lp * ds
                              + 2 * Lp * ds * di)
                         + 2 * (2 * Lp * di + Lp * ds * di))
        est = 2 * (w_bytes + io_bytes) + scratch_bytes + (4 << 20)
        try:
            cap = int(pltpu.get_tpu_info().vmem_capacity_bytes)
        except Exception:
            cap = 64 << 20
        vmem_limit = int(max(32 << 20, min(int(cap * 0.9), 2 * est)))

        return pl.pallas_call(
            kernel,
            out_shape=(jax.ShapeDtypeStruct((B, Lp, D), hidden.dtype),
                       jax.ShapeDtypeStruct((B, Lp, D), jnp.float32)),
            grid=(B,),
            in_specs=in_specs,
            out_specs=(pl.BlockSpec((1, Lp, D), lambda b: (b, 0, 0)),
                       pl.BlockSpec((1, Lp, D), lambda b: (b, 0, 0))),
            scratch_shapes=[pltpu.VMEM((Lp + _PAD, di), jnp.float32),   # padded conv input
                            pltpu.VMEM((Lp, di), jnp.float32),          # xc (post-conv SiLU)
                            pltpu.VMEM((Lp, di), jnp.float32),          # dt (post-softplus)
                            pltpu.VMEM((Lp, ds), jnp.float32),          # B
                            pltpu.VMEM((Lp, ds), jnp.float32),          # C
                            pltpu.VMEM((Lp, di), jnp.bfloat16),         # SiLU(z) gate
                            pltpu.VMEM((Lp, di), jnp.bfloat16),         # gated y (out_proj in)
                            pltpu.VMEM((Lp * ds, di), jnp.float32),     # dA, whole sequence
                            pltpu.VMEM((Lp * ds, di), jnp.float32),     # dBx, whole sequence
                            pltpu.VMEM((Lp * ds, di), jnp.bfloat16)],   # h stash, whole seq
            compiler_params=pltpu.CompilerParams(
                dimension_semantics=("parallel",),
                vmem_limit_bytes=vmem_limit),
        )(*inputs)

    def __call__(self, hidden_states, residual=None):
        # torch semantics: residual = hidden if residual is None else residual + hidden
        B, L, D = hidden_states.shape
        Lp = ((L + _CHUNK - 1) // _CHUNK) * _CHUNK
        h, r = hidden_states, residual
        if Lp != L:  # pad sequence (causal scan -> padded rows never affect real rows)
            pad = ((0, 0), (0, Lp - L), (0, 0))
            h = jnp.pad(h, pad)
            if r is not None:
                r = jnp.pad(r, pad)
        out, res = self._run(h, r)
        if Lp != L:
            out, res = out[:, :L, :], res[:, :L, :]
        return out, res


# ----------------------------------------------------------------------------
# pure-JAX reference (mirrors the kernel's bf16 quantization points for a tight check)
# ----------------------------------------------------------------------------
def _reference_block(blk, hidden, residual):
    f32, bf16 = jnp.float32, jnp.bfloat16
    res = hidden.astype(f32) if residual is None else residual.astype(f32) + hidden.astype(f32)
    mean = jnp.mean(res, axis=-1, keepdims=True)
    var = jnp.mean((res - mean) ** 2, axis=-1, keepdims=True)
    normed = (res - mean) * lax.rsqrt(var + blk.eps) * blk.norm_w[0] + blk.norm_b[0]
    xz = normed.astype(bf16).astype(f32) @ blk.in_w.astype(f32)
    x, z = xz[..., :blk.d_inner], xz[..., blk.d_inner:]
    L = x.shape[1]
    xp = jnp.pad(x, ((0, 0), (blk.d_conv - 1, 0), (0, 0)))
    conv = blk.conv_b[0] + sum(xp[:, k:k + L, :] * blk.conv_w[k] for k in range(blk.d_conv))
    xc = conv * jax.nn.sigmoid(conv)
    xproj = xc @ blk.xp_w
    dt = jax.nn.softplus(xproj[..., :blk.dt_rank] @ blk.dt_w + blk.dt_b[0])
    Bm = xproj[..., blk.dt_rank:blk.dt_rank + blk.d_state]
    Cm = xproj[..., blk.dt_rank + blk.d_state:]

    def scan_one(xc_b, dt_b, B_b, C_b):
        h = jnp.zeros((blk.d_state, blk.d_inner), f32)
        ys = []
        for t in range(L):
            dA = jnp.exp(dt_b[t][None, :] * blk.A_T)
            h = dA * h + B_b[t][:, None] * (dt_b[t] * xc_b[t])[None, :]
            ys.append(C_b[t] @ h + blk.Dp[0] * xc_b[t])
        return jnp.stack(ys)

    y = jax.vmap(scan_one)(xc, dt, Bm, Cm)
    y_g = (y * (z * jax.nn.sigmoid(z))).astype(bf16).astype(f32)
    out = y_g @ blk.out_w.astype(f32)
    return out.astype(hidden.dtype), res


def _relerr(a, b):
    a = a.astype(jnp.float32)
    b = b.astype(jnp.float32)
    return float(jnp.max(jnp.abs(a - b)) / (float(jnp.max(jnp.abs(b))) + 1e-30))


# ----------------------------------------------------------------------------
if __name__ == "__main__":
    B, L, dim = 2, 16, 32
    key = jax.random.PRNGKey(0)
    kx, kp = jax.random.split(key, 2)
    x = jax.random.normal(kx, (B, L, dim), jnp.float32)

    block = VimBlock(dim, key=kp)

    # first block: residual is None (specialized path); second block: residual provided
    h1, r1 = block(x, residual=None)
    h2, r2 = block(h1, residual=r1)
    jax.block_until_ready((h1, r1, h2, r2))

    assert h2.shape == (B, L, dim) and r2.shape == (B, L, dim)
    assert r2.dtype == jnp.float32
    assert bool(jnp.all(jnp.isfinite(h2))) and bool(jnp.all(jnp.isfinite(r2)))

    # correctness vs. pure-JAX reference (reference mirrors the kernel's bf16 points,
    # so the comparison is scale-aware and tight)
    ref_h1, ref_r1 = _reference_block(block, x, None)
    ref_h2, ref_r2 = _reference_block(block, h1, r1)
    assert bool(jnp.allclose(r1, ref_r1, atol=1e-6, rtol=1e-6))
    assert bool(jnp.allclose(r2, ref_r2, atol=1e-6, rtol=1e-6))
    assert _relerr(h1, ref_h1) < 2e-2
    assert _relerr(h2, ref_h2) < 2e-2

    print("KERNEL_OK")
</pallas_src>

<mosaic_0001>
module attributes {stable_mosaic.version = 11 : i64} {
  func.func @_vim_block_kernel(%arg0: i32, %arg1: memref<1x16x32xf32, #tpu.memory_space<vmem>>, %arg2: memref<1x32xf32, #tpu.memory_space<vmem>>, %arg3: memref<1x32xf32, #tpu.memory_space<vmem>>, %arg4: memref<32x128xbf16, #tpu.memory_space<vmem>>, %arg5: memref<4x64xf32, #tpu.memory_space<vmem>>, %arg6: memref<1x64xf32, #tpu.memory_space<vmem>>, %arg7: memref<64x34xf32, #tpu.memory_space<vmem>>, %arg8: memref<2x64xf32, #tpu.memory_space<vmem>>, %arg9: memref<1x64xf32, #tpu.memory_space<vmem>>, %arg10: memref<256x64xf32, #tpu.memory_space<vmem>>, %arg11: memref<256x16xf32, #tpu.memory_space<vmem>>, %arg12: memref<256x16xf32, #tpu.memory_space<vmem>>, %arg13: memref<16x16xf32, #tpu.memory_space<vmem>>, %arg14: memref<16x256xf32, #tpu.memory_space<vmem>>, %arg15: memref<16x256xf32, #tpu.memory_space<vmem>>, %arg16: memref<1x64xf32, #tpu.memory_space<vmem>>, %arg17: memref<64x32xbf16, #tpu.memory_space<vmem>>, %arg18: memref<1x16x32xf32, #tpu.memory_space<vmem>>, %arg19: memref<1x16x32xf32, #tpu.memory_space<vmem>>, %arg20: memref<24x64xf32, #tpu.memory_space<vmem>>, %arg21: memref<16x64xf32, #tpu.memory_space<vmem>>, %arg22: memref<16x64xf32, #tpu.memory_space<vmem>>, %arg23: memref<16x16xf32, #tpu.memory_space<vmem>>, %arg24: memref<16x16xf32, #tpu.memory_space<vmem>>, %arg25: memref<16x64xbf16, #tpu.memory_space<vmem>>, %arg26: memref<16x64xbf16, #tpu.memory_space<vmem>>, %arg27: memref<256x64xf32, #tpu.memory_space<vmem>>, %arg28: memref<256x64xf32, #tpu.memory_space<vmem>>, %arg29: memref<256x64xbf16, #tpu.memory_space<vmem>>) attributes {dimension_semantics = [#tpu.dimension_semantics<parallel>], iteration_bounds = array<i64: 2>, scalar_prefetch = 0 : i64, scratch_operands = 10 : i64, tpu.core_type = #tpu.core_type<tc>, window_params = [{transform_indices = @transform_0, window_bounds = array<i64: 1, 16, 32>}, {pipeline_mode = #tpu.pipeline_mode<synchronous>, transform_indices = @transform_1, window_bounds = array<i64: 1, 32>}, {pipeline_mode = #tpu.pipeline_mode<synchronous>, transform_indices = @transform_2, window_bounds = array<i64: 1, 32>}, {pipeline_mode = #tpu.pipeline_mode<synchronous>, transform_indices = @transform_3, window_bounds = array<i64: 32, 128>}, {pipeline_mode = #tpu.pipeline_mode<synchronous>, transform_indices = @transform_4, window_bounds = array<i64: 4, 64>}, {pipeline_mode = #tpu.pipeline_mode<synchronous>, transform_indices = @transform_5, window_bounds = array<i64: 1, 64>}, {pipeline_mode = #tpu.pipeline_mode<synchronous>, transform_indices = @transform_6, window_bounds = array<i64: 64, 34>}, {pipeline_mode = #tpu.pipeline_mode<synchronous>, transform_indices = @transform_7, window_bounds = array<i64: 2, 64>}, {pipeline_mode = #tpu.pipeline_mode<synchronous>, transform_indices = @transform_8, window_bounds = array<i64: 1, 64>}, {pipeline_mode = #tpu.pipeline_mode<synchronous>, transform_indices = @transform_9, window_bounds = array<i64: 256, 64>}, {pipeline_mode = #tpu.pipeline_mode<synchronous>, transform_indices = @transform_10, window_bounds = array<i64: 256, 16>}, {pipeline_mode = #tpu.pipeline_mode<synchronous>, transform_indices = @transform_11, window_bounds = array<i64: 256, 16>}, {pipeline_mode = #tpu.pipeline_mode<synchronous>, transform_indices = @transform_12, window_bounds = array<i64: 16, 16>}, {pipeline_mode = #tpu.pipeline_mode<synchronous>, transform_indices = @transform_13, window_bounds = array<i64: 16, 256>}, {pipeline_mode = #tpu.pipeline_mode<synchronous>, transform_indices = @transform_14, window_bounds = array<i64: 16, 256>}, {pipeline_mode = #tpu.pipeline_mode<synchronous>, transform_indices = @transform_15, window_bounds = array<i64: 1, 64>}, {pipeline_mode = #tpu.pipeline_mode<synchronous>, transform_indices = @transform_16, window_bounds = array<i64: 64, 32>}, {transform_indices = @transform_17, window_bounds = array<i64: 1, 16, 32>}, {transform_indices = @transform_18, window_bounds = array<i64: 1, 16, 32>}]} {
    %c0 = arith.constant 0 : index
    %c0_0 = arith.constant 0 : index
    %c0_1 = arith.constant 0 : index
    %0 = vector.load %arg1[%c0, %c0_0, %c0_1] : memref<1x16x32xf32, #tpu.memory_space<vmem>>, vector<1x16x32xf32>
    %1 = vector.shape_cast %0 : vector<1x16x32xf32> to vector<16x32xf32>
    %2 = vector.shape_cast %1 : vector<16x32xf32> to vector<1x16x32xf32>
    %c0_2 = arith.constant 0 : index
    %c0_3 = arith.constant 0 : index
    %c0_4 = arith.constant 0 : index
    %3 = vector.load %arg19[%c0_2, %c0_3, %c0_4] : memref<1x16x32xf32, #tpu.memory_space<vmem>>, vector<1x16x32xf32>
    tpu.vector_store %arg19[%c0_2, %c0_3, %c0_4], %2 {strides = array<i32>} : memref<1x16x32xf32, #tpu.memory_space<vmem>>, vector<1x16x32xf32>,
    %cst = arith.constant dense<0.000000e+00> : vector<16xf32>
    %4 = vector.multi_reduction <add>, %1, %cst [1] : vector<16x32xf32> to vector<16xf32>
    %5 = vector.shape_cast %4 : vector<16xf32> to vector<16x1xf32>
    %cst_5 = arith.constant 3.200000e+01 : f32
    %6 = vector.broadcast %cst_5 : f32 to vector<16x1xf32>
    %7 = arith.divf %5, %6 : vector<16x1xf32>
    %8 = vector.broadcast %7 : vector<16x1xf32> to vector<16x32xf32>
    %9 = arith.subf %1, %8 : vector<16x32xf32>
    %10 = arith.mulf %9, %9 : vector<16x32xf32>
    %cst_6 = arith.constant dense<0.000000e+00> : vector<16xf32>
    %11 = vector.multi_reduction <add>, %10, %cst_6 [1] : vector<16x32xf32> to vector<16xf32>
    %12 = vector.shape_cast %11 : vector<16xf32> to vector<16x1xf32>
    %cst_7 = arith.constant 3.200000e+01 : f32
    %13 = vector.broadcast %cst_7 : f32 to vector<16x1xf32>
    %14 = arith.divf %12, %13 : vector<16x1xf32>
    %cst_8 = arith.constant 9.99999974E-6 : f32
    %15 = vector.broadcast %cst_8 : f32 to vector<16x1xf32>
    %16 = arith.addf %14, %15 : vector<16x1xf32>
    %17 = math.rsqrt %16 : vector<16x1xf32>
    %18 = vector.broadcast %17 : vector<16x1xf32> to vector<16x32xf32>
    %19 = arith.mulf %9, %18 : vector<16x32xf32>
    %c0_9 = arith.constant 0 : index
    %c0_10 = arith.constant 0 : index
    %20 = vector.load %arg2[%c0_9, %c0_10] : memref<1x32xf32, #tpu.memory_space<vmem>>, vector<1x32xf32>
    %21 = vector.broadcast %20 : vector<1x32xf32> to vector<16x32xf32>
    %22 = arith.mulf %19, %21 : vector<16x32xf32>
    %c0_11 = arith.constant 0 : index
    %c0_12 = arith.constant 0 : index
    %23 = vector.load %arg3[%c0_11, %c0_12] : memref<1x32xf32, #tpu.memory_space<vmem>>, vector<1x32xf32>
    %24 = vector.broadcast %23 : vector<1x32xf32> to vector<16x32xf32>
    %25 = arith.addf %22, %24 : vector<16x32xf32>
    %26 = arith.truncf %25 : vector<16x32xf32> to vector<16x32xbf16>
    %c0_13 = arith.constant 0 : index
    %c0_14 = arith.constant 0 : index
    %27 = vector.load %arg4[%c0_13, %c0_14] : memref<32x128xbf16, #tpu.memory_space<vmem>>, vector<32x128xbf16>
    %cst_15 = arith.constant dense<0.000000e+00> : vector<16x128xf32>
    %28 = tpu.matmul %26, %27, %cst_15 {dimension_numbers = #tpu.dot_dimension_numbers<[1], [0], [0], [1], [0, 0, 1, 1], [], []>} : vector<16x32xbf16>, vector<32x128xbf16>, vector<16x128xf32> -> vector<16x128xf32>
    %29 = vector.extract_strided_slice %28 {offsets = [0, 0], sizes = [16, 64], strides = [1, 1]} : vector<16x128xf32> to vector<16x64xf32>
    %30 = vector.extract_strided_slice %28 {offsets = [0, 64], sizes = [16, 64], strides = [1, 1]} : vector<16x128xf32> to vector<16x64xf32>
    %cst_16 = arith.constant 0.000000e+00 : f32
    %31 = vector.broadcast %cst_16 : f32 to vector<16x64xf32>
    %32 = arith.subf %31, %30 : vector<16x64xf32>
    %33 = math.exp %32 : vector<16x64xf32>
    %cst_17 = arith.constant 1.000000e+00 : f32
    %34 = vector.broadcast %cst_17 : f32 to vector<16x64xf32>
    %35 = arith.addf %34, %33 : vector<16x64xf32>
    %cst_18 = arith.constant 1.000000e+00 : f32
    %36 = vector.broadcast %cst_18 : f32 to vector<16x64xf32>
    %37 = arith.divf %36, %35 : vector<16x64xf32>
    %38 = arith.mulf %30, %37 : vector<16x64xf32>
    %39 = arith.truncf %38 : vector<16x64xf32> to vector<16x64xbf16>
    %c0_19 = arith.constant 0 : index
    %c0_20 = arith.constant 0 : index
    %40 = vector.load %arg25[%c0_19, %c0_20] : memref<16x64xbf16, #tpu.memory_space<vmem>>, vector<16x64xbf16>
    tpu.vector_store %arg25[%c0_19, %c0_20], %39 {strides = array<i32>} : memref<16x64xbf16, #tpu.memory_space<vmem>>, vector<16x64xbf16>,
    %cst_21 = arith.constant 0.000000e+00 : f32
    %41 = vector.broadcast %cst_21 : f32 to vector<8x64xf32>
    %c0_22 = arith.constant 0 : index
    %c0_23 = arith.constant 0 : index
    %42 = vector.load %arg20[%c0_22, %c0_23] : memref<24x64xf32, #tpu.memory_space<vmem>>, vector<8x64xf32>
    tpu.vector_store %arg20[%c0_22, %c0_23], %41 {strides = array<i32>} : memref<24x64xf32, #tpu.memory_space<vmem>>, vector<8x64xf32>,
    %c8 = arith.constant 8 : index
    %c0_24 = arith.constant 0 : index
    %43 = vector.load %arg20[%c8, %c0_24] : memref<24x64xf32, #tpu.memory_space<vmem>>, vector<16x64xf32>
    tpu.vector_store %arg20[%c8, %c0_24], %29 {strides = array<i32>} : memref<24x64xf32, #tpu.memory_space<vmem>>, vector<16x64xf32>,
    %cst_25 = arith.constant 0.000000e+00 : f32
    %44 = vector.broadcast %cst_25 : f32 to vector<16x64xf32>
    %c0_26 = arith.constant 0 : index
    %c0_27 = arith.constant 0 : index
    %45 = vector.load %arg6[%c0_26, %c0_27] : memref<1x64xf32, #tpu.memory_space<vmem>>, vector<1x64xf32>
    %46 = vector.broadcast %45 : vector<1x64xf32> to vector<16x64xf32>
    %47 = arith.addf %44, %46 : vector<16x64xf32>
    %c5 = arith.constant 5 : index
    %c0_28 = arith.constant 0 : index
    %48 = vector.load %arg20[%c5, %c0_28] : memref<24x64xf32, #tpu.memory_space<vmem>>, vector<16x64xf32>
    %c0_29 = arith.constant 0 : index
    %c0_30 = arith.constant 0 : index
    %49 = vector.load %arg5[%c0_29, %c0_30] : memref<4x64xf32, #tpu.memory_space<vmem>>, vector<1x64xf32>
    %50 = vector.broadcast %49 : vector<1x64xf32> to vector<16x64xf32>
    %51 = arith.mulf %48, %50 : vector<16x64xf32>
    %52 = arith.addf %47, %51 : vector<16x64xf32>
    %c6 = arith.constant 6 : index
    %c0_31 = arith.constant 0 : index
    %53 = vector.load %arg20[%c6, %c0_31] : memref<24x64xf32, #tpu.memory_space<vmem>>, vector<16x64xf32>
    %c1 = arith.constant 1 : index
    %c0_32 = arith.constant 0 : index
    %54 = vector.load %arg5[%c1, %c0_32] : memref<4x64xf32, #tpu.memory_space<vmem>>, vector<1x64xf32>
    %55 = vector.broadcast %54 : vector<1x64xf32> to vector<16x64xf32>
    %56 = arith.mulf %53, %55 : vector<16x64xf32>
    %57 = arith.addf %52, %56 : vector<16x64xf32>
    %c7 = arith.constant 7 : index
    %c0_33 = arith.constant 0 : index
    %58 = vector.load %arg20[%c7, %c0_33] : memref<24x64xf32, #tpu.memory_space<vmem>>, vector<16x64xf32>
    %c2 = arith.constant 2 : index
    %c0_34 = arith.constant 0 : index
    %59 = vector.load %arg5[%c2, %c0_34] : memref<4x64xf32, #tpu.memory_space<vmem>>, vector<1x64xf32>
    %60 = vector.broadcast %59 : vector<1x64xf32> to vector<16x64xf32>
    %61 = arith.mulf %58, %60 : vector<16x64xf32>
    %62 = arith.addf %57, %61 : vector<16x64xf32>
    %c8_35 = arith.constant 8 : index
    %c0_36 = arith.constant 0 : index
    %63 = vector.load %arg20[%c8_35, %c0_36] : memref<24x64xf32, #tpu.memory_space<vmem>>, vector<16x64xf32>
    %c3 = arith.constant 3 : index
    %c0_37 = arith.constant 0 : index
    %64 = vector.load %arg5[%c3, %c0_37] : memref<4x64xf32, #tpu.memory_space<vmem>>, vector<1x64xf32>
    %65 = vector.broadcast %64 : vector<1x64xf32> to vector<16x64xf32>
    %66 = arith.mulf %63, %65 : vector<16x64xf32>
    %67 = arith.addf %62, %66 : vector<16x64xf32>
    %cst_38 = arith.constant 0.000000e+00 : f32
    %68 = vector.broadcast %cst_38 : f32 to vector<16x64xf32>
    %69 = arith.subf %68, %67 : vector<16x64xf32>
    %70 = math.exp %69 : vector<16x64xf32>
    %cst_39 = arith.constant 1.000000e+00 : f32
    %71 = vector.broadcast %cst_39 : f32 to vector<16x64xf32>
    %72 = arith.addf %71, %70 : vector<16x64xf32>
    %cst_40 = arith.constant 1.000000e+00 : f32
    %73 = vector.broadcast %cst_40 : f32 to vector<16x64xf32>
    %74 = arith.divf %73, %72 : vector<16x64xf32>
    %75 = arith.mulf %67, %74 : vector<16x64xf32>
    %c0_41 = arith.constant 0 : index
    %c0_42 = arith.constant 0 : index
    %76 = vector.load %arg21[%c0_41, %c0_42] : memref<16x64xf32, #tpu.memory_space<vmem>>, vector<16x64xf32>
    tpu.vector_store %arg21[%c0_41, %c0_42], %75 {strides = array<i32>} : memref<16x64xf32, #tpu.memory_space<vmem>>, vector<16x64xf32>,
    %c0_43 = arith.constant 0 : index
    %c0_44 = arith.constant 0 : index
    %77 = vector.load %arg7[%c0_43, %c0_44] : memref<64x34xf32, #tpu.memory_space<vmem>>, vector<64x34xf32>
    %cst_45 = arith.constant dense<0.000000e+00> : vector<16x34xf32>
    %78 = tpu.matmul %75, %77, %cst_45 {dimension_numbers = #tpu.dot_dimension_numbers<[1], [0], [0], [1], [0, 0, 1, 1], [], []>} : vector<16x64xf32>, vector<64x34xf32>, vector<16x34xf32> -> vector<16x34xf32>
    %79 = vector.extract_strided_slice %78 {offsets = [0, 0], sizes = [16, 2], strides = [1, 1]} : vector<16x34xf32> to vector<16x2xf32>
    %c0_46 = arith.constant 0 : index
    %c0_47 = arith.constant 0 : index
    %80 = vector.load %arg8[%c0_46, %c0_47] : memref<2x64xf32, #tpu.memory_space<vmem>>, vector<2x64xf32>
    %cst_48 = arith.constant dense<0.000000e+00> : vector<16x64xf32>
    %81 = tpu.matmul %79, %80, %cst_48 {dimension_numbers = #tpu.dot_dimension_numbers<[1], [0], [0], [1], [0, 0, 1, 1], [], []>} : vector<16x2xf32>, vector<2x64xf32>, vector<16x64xf32> -> vector<16x64xf32>
    %c0_49 = arith.constant 0 : index
    %c0_50 = arith.constant 0 : index
    %82 = vector.load %arg9[%c0_49, %c0_50] : memref<1x64xf32, #tpu.memory_space<vmem>>, vector<1x64xf32>
    %83 = vector.broadcast %82 : vector<1x64xf32> to vector<16x64xf32>
    %84 = arith.addf %81, %83 : vector<16x64xf32>
    %cst_51 = arith.constant 2.000000e+01 : f32
    %85 = vector.broadcast %cst_51 : f32 to vector<16x64xf32>
    %86 = arith.cmpf ogt, %84, %85 : vector<16x64xf32>
    %cst_52 = arith.constant 2.000000e+01 : f32
    %87 = vector.broadcast %cst_52 : f32 to vector<16x64xf32>
    %88 = arith.minimumf %84, %87 : vector<16x64xf32>
    %89 = math.exp %88 : vector<16x64xf32>
    %cst_53 = arith.constant 1.000000e+00 : f32
    %90 = vector.broadcast %cst_53 : f32 to vector<16x64xf32>
    %91 = arith.addf %90, %89 : vector<16x64xf32>
    %92 = math.log %91 : vector<16x64xf32>
    %93 = arith.select %86, %84, %92 : vector<16x64xi1>, vector<16x64xf32>
    %c0_54 = arith.constant 0 : index
    %c0_55 = arith.constant 0 : index
    %94 = vector.load %arg22[%c0_54, %c0_55] : memref<16x64xf32, #tpu.memory_space<vmem>>, vector<16x64xf32>
    tpu.vector_store %arg22[%c0_54, %c0_55], %93 {strides = array<i32>} : memref<16x64xf32, #tpu.memory_space<vmem>>, vector<16x64xf32>,
    %95 = vector.extract_strided_slice %78 {offsets = [0, 2], sizes = [16, 16], strides = [1, 1]} : vector<16x34xf32> to vector<16x16xf32>
    %c0_56 = arith.constant 0 : index
    %c0_57 = arith.constant 0 : index
    %96 = vector.load %arg23[%c0_56, %c0_57] : memref<16x16xf32, #tpu.memory_space<vmem>>, vector<16x16xf32>
    tpu.vector_store %arg23[%c0_56, %c0_57], %95 {strides = array<i32>} : memref<16x16xf32, #tpu.memory_space<vmem>>, vector<16x16xf32>,
    %97 = vector.extract_strided_slice %78 {offsets = [0, 18], sizes = [16, 16], strides = [1, 1]} : vector<16x34xf32> to vector<16x16xf32>
    %c0_58 = arith.constant 0 : index
    %c0_59 = arith.constant 0 : index
    %98 = vector.load %arg24[%c0_58, %c0_59] : memref<16x16xf32, #tpu.memory_space<vmem>>, vector<16x16xf32>
    tpu.vector_store %arg24[%c0_58, %c0_59], %97 {strides = array<i32>} : memref<16x16xf32, #tpu.memory_space<vmem>>, vector<16x16xf32>,
    %c0_i32 = arith.constant 0 : i32
    %c1_i32 = arith.constant 1 : i32
    %99 = arith.muli %c0_i32, %c1_i32 : i32
    %c0_i32_60 = arith.constant 0 : i32
    %100 = arith.addi %c0_i32_60, %99 : i32
    %c16_i32 = arith.constant 16 : i32
    %101 = arith.muli %100, %c16_i32 : i32
    %102 = tpu.assume_multiple %101, 16 : i32
    %c256_i32 = arith.constant 256 : i32
    %103 = arith.muli %100, %c256_i32 : i32
    %104 = tpu.assume_multiple %103, 256 : i32
    %105 = arith.index_cast %102 : i32 to index
    %c0_61 = arith.constant 0 : index
    %106 = vector.load %arg22[%105, %c0_61] : memref<16x64xf32, #tpu.memory_space<vmem>>, vector<16x64xf32>
    %107 = arith.index_cast %102 : i32 to index
    %c0_62 = arith.constant 0 : index
    %108 = vector.load %arg21[%107, %c0_62] : memref<16x64xf32, #tpu.memory_space<vmem>>, vector<16x64xf32>
    %109 = arith.mulf %106, %108 : vector<16x64xf32>
    %110 = arith.index_cast %102 : i32 to index
    %c0_63 = arith.constant 0 : index
    %111 = vector.load %arg23[%110, %c0_63] : memref<16x16xf32, #tpu.memory_space<vmem>>, vector<16x16xf32>
    %c0_64 = arith.constant 0 : index
    %c0_65 = arith.constant 0 : index
    %112 = vector.load %arg11[%c0_64, %c0_65] : memref<256x16xf32, #tpu.memory_space<vmem>>, vector<256x16xf32>
    %cst_66 = arith.constant dense<0.000000e+00> : vector<256x64xf32>
    %113 = tpu.matmul %112, %106, %cst_66 {dimension_numbers = #tpu.dot_dimension_numbers<[1], [0], [0], [1], [0, 0, 1, 1], [], []>} : vector<256x16xf32>, vector<16x64xf32>, vector<256x64xf32> -> vector<256x64xf32>
    %c0_67 = arith.constant 0 : index
    %c0_68 = arith.constant 0 : index
    %114 = vector.load %arg10[%c0_67, %c0_68] : memref<256x64xf32, #tpu.memory_space<vmem>>, vector<256x64xf32>
    %115 = arith.mulf %113, %114 : vector<256x64xf32>
    %116 = math.exp %115 : vector<256x64xf32>
    %117 = arith.index_cast %104 : i32 to index
    %c0_69 = arith.constant 0 : index
    %118 = vector.load %arg27[%117, %c0_69] : memref<256x64xf32, #tpu.memory_space<vmem>>, vector<256x64xf32>
    tpu.vector_store %arg27[%117, %c0_69], %116 {strides = array<i32>} : memref<256x64xf32, #tpu.memory_space<vmem>>, vector<256x64xf32>,
    %c0_70 = arith.constant 0 : index
    %c0_71 = arith.constant 0 : index
    %119 = vector.load %arg11[%c0_70, %c0_71] : memref<256x16xf32, #tpu.memory_space<vmem>>, vector<256x16xf32>
    %cst_72 = arith.constant dense<0.000000e+00> : vector<256x16xf32>
    %120 = tpu.matmul %119, %111, %cst_72 {dimension_numbers = #tpu.dot_dimension_numbers<[1], [0], [0], [1], [0, 0, 1, 1], [], []>} : vector<256x16xf32>, vector<16x16xf32>, vector<256x16xf32> -> vector<256x16xf32>
    %c0_73 = arith.constant 0 : index
    %c0_74 = arith.constant 0 : index
    %121 = vector.load %arg12[%c0_73, %c0_74] : memref<256x16xf32, #tpu.memory_space<vmem>>, vector<256x16xf32>
    %122 = arith.mulf %120, %121 : vector<256x16xf32>
    %c0_75 = arith.constant 0 : index
    %c0_76 = arith.constant 0 : index
    %123 = vector.load %arg13[%c0_75, %c0_76] : memref<16x16xf32, #tpu.memory_space<vmem>>, vector<16x16xf32>
    %cst_77 = arith.constant dense<0.000000e+00> : vector<256x16xf32>
    %124 = tpu.matmul %122, %123, %cst_77 {dimension_numbers = #tpu.dot_dimension_numbers<[1], [0], [0], [1], [0, 0, 1, 1], [], []>} : vector<256x16xf32>, vector<16x16xf32>, vector<256x16xf32> -> vector<256x16xf32>
    %c0_78 = arith.constant 0 : index
    %c0_79 = arith.constant 0 : index
    %125 = vector.load %arg11[%c0_78, %c0_79] : memref<256x16xf32, #tpu.memory_space<vmem>>, vector<256x16xf32>
    %126 = arith.mulf %124, %125 : vector<256x16xf32>
    %cst_80 = arith.constant dense<0.000000e+00> : vector<256x64xf32>
    %127 = tpu.matmul %126, %109, %cst_80 {dimension_numbers = #tpu.dot_dimension_numbers<[1], [0], [0], [1], [0, 0, 1, 1], [], []>} : vector<256x16xf32>, vector<16x64xf32>, vector<256x64xf32> -> vector<256x64xf32>
    %128 = arith.index_cast %104 : i32 to index
    %c0_81 = arith.constant 0 : index
    %129 = vector.load %arg28[%128, %c0_81] : memref<256x64xf32, #tpu.memory_space<vmem>>, vector<256x64xf32>
    tpu.vector_store %arg28[%128, %c0_81], %127 {strides = array<i32>} : memref<256x64xf32, #tpu.memory_space<vmem>>, vector<256x64xf32>,
    %c1_i32_82 = arith.constant 1 : i32
    %cst_83 = arith.constant 0.000000e+00 : f32
    %130 = vector.broadcast %cst_83 : f32 to vector<16x64xf32>
    %c0_i32_84 = arith.constant 0 : i32
    %c256_i32_85 = arith.constant 256 : i32
    %131 = arith.muli %c0_i32_84, %c256_i32_85 : i32
    %132 = tpu.assume_multiple %131, 256 : i32
    %c0_i32_86 = arith.constant 0 : i32
    %133 = arith.addi %132, %c0_i32_86 : i32
    %134 = tpu.assume_multiple %133, 16 : i32
    %135 = arith.index_cast %134 : i32 to index
    %c0_87 = arith.constant 0 : index
    %136 = vector.load %arg27[%135, %c0_87] : memref<256x64xf32, #tpu.memory_space<vmem>>, vector<16x64xf32>
    %137 = arith.mulf %136, %130 : vector<16x64xf32>
    %138 = arith.index_cast %134 : i32 to index
    %c0_88 = arith.constant 0 : index
    %139 = vector.load %arg28[%138, %c0_88] : memref<256x64xf32, #tpu.memory_space<vmem>>, vector<16x64xf32>
    %140 = arith.addf %137, %139 : vector<16x64xf32>
    %141 = arith.truncf %140 : vector<16x64xf32> to vector<16x64xbf16>
    %142 = arith.index_cast %134 : i32 to index
    %c0_89 = arith.constant 0 : index
    %143 = vector.load %arg29[%142, %c0_89] : memref<256x64xbf16, #tpu.memory_space<vmem>>, vector<16x64xbf16>
    tpu.vector_store %arg29[%142, %c0_89], %141 {strides = array<i32>} : memref<256x64xbf16, #tpu.memory_space<vmem>>, vector<16x64xbf16>,
    %c16_i32_90 = arith.constant 16 : i32
    %144 = arith.addi %132, %c16_i32_90 : i32
    %145 = tpu.assume_multiple %144, 16 : i32
    %146 = arith.index_cast %145 : i32 to index
    %c0_91 = arith.constant 0 : index
    %147 = vector.load %arg27[%146, %c0_91] : memref<256x64xf32, #tpu.memory_space<vmem>>, vector<16x64xf32>
    %148 = arith.mulf %147, %140 : vector<16x64xf32>
    %149 = arith.index_cast %145 : i32 to index
    %c0_92 = arith.constant 0 : index
    %150 = vector.load %arg28[%149, %c0_92] : memref<256x64xf32, #tpu.memory_space<vmem>>, vector<16x64xf32>
    %151 = arith.addf %148, %150 : vector<16x64xf32>
    %152 = arith.truncf %151 : vector<16x64xf32> to vector<16x64xbf16>
    %153 = arith.index_cast %145 : i32 to index
    %c0_93 = arith.constant 0 : index
    %154 = vector.load %arg29[%153, %c0_93] : memref<256x64xbf16, #tpu.memory_space<vmem>>, vector<16x64xbf16>
    tpu.vector_store %arg29[%153, %c0_93], %152 {strides = array<i32>} : memref<256x64xbf16, #tpu.memory_space<vmem>>, vector<16x64xbf16>,
    %c32_i32 = arith.constant 32 : i32
    %155 = arith.addi %132, %c32_i32 : i32
    %156 = tpu.assume_multiple %155, 16 : i32
    %157 = arith.index_cast %156 : i32 to index
    %c0_94 = arith.constant 0 : index
    %158 = vector.load %arg27[%157, %c0_94] : memref<256x64xf32, #tpu.memory_space<vmem>>, vector<16x64xf32>
    %159 = arith.mulf %158, %151 : vector<16x64xf32>
    %160 = arith.index_cast %156 : i32 to index
    %c0_95 = arith.constant 0 : index
    %161 = vector.load %arg28[%160, %c0_95] : memref<256x64xf32, #tpu.memory_space<vmem>>, vector<16x64xf32>
    %162 = arith.addf %159, %161 : vector<16x64xf32>
    %163 = arith.truncf %162 : vector<16x64xf32> to vector<16x64xbf16>
    %164 = arith.index_cast %156 : i32 to index
    %c0_96 = arith.constant 0 : index
    %165 = vector.load %arg29[%164, %c0_96] : memref<256x64xbf16, #tpu.memory_space<vmem>>, vector<16x64xbf16>
    tpu.vector_store %arg29[%164, %c0_96], %163 {strides = array<i32>} : memref<256x64xbf16, #tpu.memory_space<vmem>>, vector<16x64xbf16>,
    %c48_i32 = arith.constant 48 : i32
    %166 = arith.addi %132, %c48_i32 : i32
    %167 = tpu.assume_multiple %166, 16 : i32
    %168 = arith.index_cast %167 : i32 to index
    %c0_97 = arith.constant 0 : index
    %169 = vector.load %arg27[%168, %c0_97] : memref<256x64xf32, #tpu.memory_space<vmem>>, vector<16x64xf32>
    %170 = arith.mulf %169, %162 : vector<16x64xf32>
    %171 = arith.index_cast %167 : i32 to index
    %c0_98 = arith.constant 0 : index
    %172 = vector.load %arg28[%171, %c0_98] : memref<256x64xf32, #tpu.memory_space<vmem>>, vector<16x64xf32>
    %173 = arith.addf %170, %172 : vector<16x64xf32>
    %174 = arith.truncf %173 : vector<16x64xf32> to vector<16x64xbf16>
    %175 = arith.index_cast %167 : i32 to index
    %c0_99 = arith.constant 0 : index
    %176 = vector.load %arg29[%175, %c0_99] : memref<256x64xbf16, #tpu.memory_space<vmem>>, vector<16x64xbf16>
    tpu.vector_store %arg29[%175, %c0_99], %174 {strides = array<i32>} : memref<256x64xbf16, #tpu.memory_space<vmem>>, vector<16x64xbf16>,
    %c64_i32 = arith.constant 64 : i32
    %177 = arith.addi %132, %c64_i32 : i32
    %178 = tpu.assume_multiple %177, 16 : i32
    %179 = arith.index_cast %178 : i32 to index
    %c0_100 = arith.constant 0 : index
    %180 = vector.load %arg27[%179, %c0_100] : memref<256x64xf32, #tpu.memory_space<vmem>>, vector<16x64xf32>
    %181 = arith.mulf %180, %173 : vector<16x64xf32>
    %182 = arith.index_cast %178 : i32 to index
    %c0_101 = arith.constant 0 : index
    %183 = vector.load %arg28[%182, %c0_101] : memref<256x64xf32, #tpu.memory_space<vmem>>, vector<16x64xf32>
    %184 = arith.addf %181, %183 : vector<16x64xf32>
    %185 = arith.truncf %184 : vector<16x64xf32> to vector<16x64xbf16>
    %186 = arith.index_cast %178 : i32 to index
    %c0_102 = arith.constant 0 : index
    %187 = vector.load %arg29[%186, %c0_102] : memref<256x64xbf16, #tpu.memory_space<vmem>>, vector<16x64xbf16>
    tpu.vector_store %arg29[%186, %c0_102], %185 {strides = array<i32>} : memref<256x64xbf16, #tpu.memory_space<vmem>>, vector<16x64xbf16>,
    %c80_i32 = arith.constant 80 : i32
    %188 = arith.addi %132, %c80_i32 : i32
    %189 = tpu.assume_multiple %188, 16 : i32
    %190 = arith.index_cast %189 : i32 to index
    %c0_103 = arith.constant 0 : index
    %191 = vector.load %arg27[%190, %c0_103] : memref<256x64xf32, #tpu.memory_space<vmem>>, vector<16x64xf32>
    %192 = arith.mulf %191, %184 : vector<16x64xf32>
    %193 = arith.index_cast %189 : i32 to index
    %c0_104 = arith.constant 0 : index
    %194 = vector.load %arg28[%193, %c0_104] : memref<256x64xf32, #tpu.memory_space<vmem>>, vector<16x64xf32>
    %195 = arith.addf %192, %194 : vector<16x64xf32>
    %196 = arith.truncf %195 : vector<16x64xf32> to vector<16x64xbf16>
    %197 = arith.index_cast %189 : i32 to index
    %c0_105 = arith.constant 0 : index
    %198 = vector.load %arg29[%197, %c0_105] : memref<256x64xbf16, #tpu.memory_space<vmem>>, vector<16x64xbf16>
    tpu.vector_store %arg29[%197, %c0_105], %196 {strides = array<i32>} : memref<256x64xbf16, #tpu.memory_space<vmem>>, vector<16x64xbf16>,
    %c96_i32 = arith.constant 96 : i32
    %199 = arith.addi %132, %c96_i32 : i32
    %200 = tpu.assume_multiple %199, 16 : i32
    %201 = arith.index_cast %200 : i32 to index
    %c0_106 = arith.constant 0 : index
    %202 = vector.load %arg27[%201, %c0_106] : memref<256x64xf32, #tpu.memory_space<vmem>>, vector<16x64xf32>
    %203 = arith.mulf %202, %195 : vector<16x64xf32>
    %204 = arith.index_cast %200 : i32 to index
    %c0_107 = arith.constant 0 : index
    %205 = vector.load %arg28[%204, %c0_107] : memref<256x64xf32, #tpu.memory_space<vmem>>, vector<16x64xf32>
    %206 = arith.addf %203, %205 : vector<16x64xf32>
    %207 = arith.truncf %206 : vector<16x64xf32> to vector<16x64xbf16>
    %208 = arith.index_cast %200 : i32 to index
    %c0_108 = arith.constant 0 : index
    %209 = vector.load %arg29[%208, %c0_108] : memref<256x64xbf16, #tpu.memory_space<vmem>>, vector<16x64xbf16>
    tpu.vector_store %arg29[%208, %c0_108], %207 {strides = array<i32>} : memref<256x64xbf16, #tpu.memory_space<vmem>>, vector<16x64xbf16>,
    %c112_i32 = arith.constant 112 : i32
    %210 = arith.addi %132, %c112_i32 : i32
    %211 = tpu.assume_multiple %210, 16 : i32
    %212 = arith.index_cast %211 : i32 to index
    %c0_109 = arith.constant 0 : index
    %213 = vector.load %arg27[%212, %c0_109] : memref<256x64xf32, #tpu.memory_space<vmem>>, vector<16x64xf32>
    %214 = arith.mulf %213, %206 : vector<16x64xf32>
    %215 = arith.index_cast %211 : i32 to index
    %c0_110 = arith.constant 0 : index
    %216 = vector.load %arg28[%215, %c0_110] : memref<256x64xf32, #tpu.memory_space<vmem>>, vector<16x64xf32>
    %217 = arith.addf %214, %216 : vector<16x64xf32>
    %218 = arith.truncf %217 : vector<16x64xf32> to vector<16x64xbf16>
    %219 = arith.index_cast %211 : i32 to index
    %c0_111 = arith.constant 0 : index
    %220 = vector.load %arg29[%219, %c0_111] : memref<256x64xbf16, #tpu.memory_space<vmem>>, vector<16x64xbf16>
    tpu.vector_store %arg29[%219, %c0_111], %218 {strides = array<i32>} : memref<256x64xbf16, #tpu.memory_space<vmem>>, vector<16x64xbf16>,
    %c128_i32 = arith.constant 128 : i32
    %221 = arith.addi %132, %c128_i32 : i32
    %222 = tpu.assume_multiple %221, 16 : i32
    %223 = arith.index_cast %222 : i32 to index
    %c0_112 = arith.constant 0 : index
    %224 = vector.load %arg27[%223, %c0_112] : memref<256x64xf32, #tpu.memory_space<vmem>>, vector<16x64xf32>
    %225 = arith.mulf %224, %217 : vector<16x64xf32>
    %226 = arith.index_cast %222 : i32 to index
    %c0_113 = arith.constant 0 : index
    %227 = vector.load %arg28[%226, %c0_113] : memref<256x64xf32, #tpu.memory_space<vmem>>, vector<16x64xf32>
    %228 = arith.addf %225, %227 : vector<16x64xf32>
    %229 = arith.truncf %228 : vector<16x64xf32> to vector<16x64xbf16>
    %230 = arith.index_cast %222 : i32 to index
    %c0_114 = arith.constant 0 : index
    %231 = vector.load %arg29[%230, %c0_114] : memref<256x64xbf16, #tpu.memory_space<vmem>>, vector<16x64xbf16>
    tpu.vector_store %arg29[%230, %c0_114], %229 {strides = array<i32>} : memref<256x64xbf16, #tpu.memory_space<vmem>>, vector<16x64xbf16>,
    %c144_i32 = arith.constant 144 : i32
    %232 = arith.addi %132, %c144_i32 : i32
    %233 = tpu.assume_multiple %232, 16 : i32
    %234 = arith.index_cast %233 : i32 to index
    %c0_115 = arith.constant 0 : index
    %235 = vector.load %arg27[%234, %c0_115] : memref<256x64xf32, #tpu.memory_space<vmem>>, vector<16x64xf32>
    %236 = arith.mulf %235, %228 : vector<16x64xf32>
    %237 = arith.index_cast %233 : i32 to index
    %c0_116 = arith.constant 0 : index
    %238 = vector.load %arg28[%237, %c0_116] : memref<256x64xf32, #tpu.memory_space<vmem>>, vector<16x64xf32>
    %239 = arith.addf %236, %238 : vector<16x64xf32>
    %240 = arith.truncf %239 : vector<16x64xf32> to vector<16x64xbf16>
    %241 = arith.index_cast %233 : i32 to index
    %c0_117 = arith.constant 0 : index
    %242 = vector.load %arg29[%241, %c0_117] : memref<256x64xbf16, #tpu.memory_space<vmem>>, vector<16x64xbf16>
    tpu.vector_store %arg29[%241, %c0_117], %240 {strides = array<i32>} : memref<256x64xbf16, #tpu.memory_space<vmem>>, vector<16x64xbf16>,
    %c160_i32 = arith.constant 160 : i32
    %243 = arith.addi %132, %c160_i32 : i32
    %244 = tpu.assume_multiple %243, 16 : i32
    %245 = arith.index_cast %244 : i32 to index
    %c0_118 = arith.constant 0 : index
    %246 = vector.load %arg27[%245, %c0_118] : memref<256x64xf32, #tpu.memory_space<vmem>>, vector<16x64xf32>
    %247 = arith.mulf %246, %239 : vector<16x64xf32>
    %248 = arith.index_cast %244 : i32 to index
    %c0_119 = arith.constant 0 : index
    %249 = vector.load %arg28[%248, %c0_119] : memref<256x64xf32, #tpu.memory_space<vmem>>, vector<16x64xf32>
    %250 = arith.addf %247, %249 : vector<16x64xf32>
    %251 = arith.truncf %250 : vector<16x64xf32> to vector<16x64xbf16>
    %252 = arith.index_cast %244 : i32 to index
    %c0_120 = arith.constant 0 : index
    %253 = vector.load %arg29[%252, %c0_120] : memref<256x64xbf16, #tpu.memory_space<vmem>>, vector<16x64xbf16>
    tpu.vector_store %arg29[%252, %c0_120], %251 {strides = array<i32>} : memref<256x64xbf16, #tpu.memory_space<vmem>>, vector<16x64xbf16>,
    %c176_i32 = arith.constant 176 : i32
    %254 = arith.addi %132, %c176_i32 : i32
    %255 = tpu.assume_multiple %254, 16 : i32
    %256 = arith.index_cast %255 : i32 to index
    %c0_121 = arith.constant 0 : index
    %257 = vector.load %arg27[%256, %c0_121] : memref<256x64xf32, #tpu.memory_space<vmem>>, vector<16x64xf32>
    %258 = arith.mulf %257, %250 : vector<16x64xf32>
    %259 = arith.index_cast %255 : i32 to index
    %c0_122 = arith.constant 0 : index
    %260 = vector.load %arg28[%259, %c0_122] : memref<256x64xf32, #tpu.memory_space<vmem>>, vector<16x64xf32>
    %261 = arith.addf %258, %260 : vector<16x64xf32>
    %262 = arith.truncf %261 : vector<16x64xf32> to vector<16x64xbf16>
    %263 = arith.index_cast %255 : i32 to index
    %c0_123 = arith.constant 0 : index
    %264 = vector.load %arg29[%263, %c0_123] : memref<256x64xbf16, #tpu.memory_space<vmem>>, vector<16x64xbf16>
    tpu.vector_store %arg29[%263, %c0_123], %262 {strides = array<i32>} : memref<256x64xbf16, #tpu.memory_space<vmem>>, vector<16x64xbf16>,
    %c192_i32 = arith.constant 192 : i32
    %265 = arith.addi %132, %c192_i32 : i32
    %266 = tpu.assume_multiple %265, 16 : i32
    %267 = arith.index_cast %266 : i32 to index
    %c0_124 = arith.constant 0 : index
    %268 = vector.load %arg27[%267, %c0_124] : memref<256x64xf32, #tpu.memory_space<vmem>>, vector<16x64xf32>
    %269 = arith.mulf %268, %261 : vector<16x64xf32>
    %270 = arith.index_cast %266 : i32 to index
    %c0_125 = arith.constant 0 : index
    %271 = vector.load %arg28[%270, %c0_125] : memref<256x64xf32, #tpu.memory_space<vmem>>, vector<16x64xf32>
    %272 = arith.addf %269, %271 : vector<16x64xf32>
    %273 = arith.truncf %272 : vector<16x64xf32> to vector<16x64xbf16>
    %274 = arith.index_cast %266 : i32 to index
    %c0_126 = arith.constant 0 : index
    %275 = vector.load %arg29[%274, %c0_126] : memref<256x64xbf16, #tpu.memory_space<vmem>>, vector<16x64xbf16>
    tpu.vector_store %arg29[%274, %c0_126], %273 {strides = array<i32>} : memref<256x64xbf16, #tpu.memory_space<vmem>>, vector<16x64xbf16>,
    %c208_i32 = arith.constant 208 : i32
    %276 = arith.addi %132, %c208_i32 : i32
    %277 = tpu.assume_multiple %276, 16 : i32
    %278 = arith.index_cast %277 : i32 to index
    %c0_127 = arith.constant 0 : index
    %279 = vector.load %arg27[%278, %c0_127] : memref<256x64xf32, #tpu.memory_space<vmem>>, vector<16x64xf32>
    %280 = arith.mulf %279, %272 : vector<16x64xf32>
    %281 = arith.index_cast %277 : i32 to index
    %c0_128 = arith.constant 0 : index
    %282 = vector.load %arg28[%281, %c0_128] : memref<256x64xf32, #tpu.memory_space<vmem>>, vector<16x64xf32>
    %283 = arith.addf %280, %282 : vector<16x64xf32>
    %284 = arith.truncf %283 : vector<16x64xf32> to vector<16x64xbf16>
    %285 = arith.index_cast %277 : i32 to index
    %c0_129 = arith.constant 0 : index
    %286 = vector.load %arg29[%285, %c0_129] : memref<256x64xbf16, #tpu.memory_space<vmem>>, vector<16x64xbf16>
    tpu.vector_store %arg29[%285, %c0_129], %284 {strides = array<i32>} : memref<256x64xbf16, #tpu.memory_space<vmem>>, vector<16x64xbf16>,
    %c224_i32 = arith.constant 224 : i32
    %287 = arith.addi %132, %c224_i32 : i32
    %288 = tpu.assume_multiple %287, 16 : i32
    %289 = arith.index_cast %288 : i32 to index
    %c0_130 = arith.constant 0 : index
    %290 = vector.load %arg27[%289, %c0_130] : memref<256x64xf32, #tpu.memory_space<vmem>>, vector<16x64xf32>
    %291 = arith.mulf %290, %283 : vector<16x64xf32>
    %292 = arith.index_cast %288 : i32 to index
    %c0_131 = arith.constant 0 : index
    %293 = vector.load %arg28[%292, %c0_131] : memref<256x64xf32, #tpu.memory_space<vmem>>, vector<16x64xf32>
    %294 = arith.addf %291, %293 : vector<16x64xf32>
    %295 = arith.truncf %294 : vector<16x64xf32> to vector<16x64xbf16>
    %296 = arith.index_cast %288 : i32 to index
    %c0_132 = arith.constant 0 : index
    %297 = vector.load %arg29[%296, %c0_132] : memref<256x64xbf16, #tpu.memory_space<vmem>>, vector<16x64xbf16>
    tpu.vector_store %arg29[%296, %c0_132], %295 {strides = array<i32>} : memref<256x64xbf16, #tpu.memory_space<vmem>>, vector<16x64xbf16>,
    %c240_i32 = arith.constant 240 : i32
    %298 = arith.addi %132, %c240_i32 : i32
    %299 = tpu.assume_multiple %298, 16 : i32
    %300 = arith.index_cast %299 : i32 to index
    %c0_133 = arith.constant 0 : index
    %301 = vector.load %arg27[%300, %c0_133] : memref<256x64xf32, #tpu.memory_space<vmem>>, vector<16x64xf32>
    %302 = arith.mulf %301, %294 : vector<16x64xf32>
    %303 = arith.index_cast %299 : i32 to index
    %c0_134 = arith.constant 0 : index
    %304 = vector.load %arg28[%303, %c0_134] : memref<256x64xf32, #tpu.memory_space<vmem>>, vector<16x64xf32>
    %305 = arith.addf %302, %304 : vector<16x64xf32>
    %306 = arith.truncf %305 : vector<16x64xf32> to vector<16x64xbf16>
    %307 = arith.index_cast %299 : i32 to index
    %c0_135 = arith.constant 0 : index
    %308 = vector.load %arg29[%307, %c0_135] : memref<256x64xbf16, #tpu.memory_space<vmem>>, vector<16x64xbf16>
    tpu.vector_store %arg29[%307, %c0_135], %306 {strides = array<i32>} : memref<256x64xbf16, #tpu.memory_space<vmem>>, vector<16x64xbf16>,
    %c1_i32_136 = arith.constant 1 : i32
    %c0_i32_137 = arith.constant 0 : i32
    %c1_i32_138 = arith.constant 1 : i32
    %309 = arith.muli %c0_i32_137, %c1_i32_138 : i32
    %c0_i32_139 = arith.constant 0 : i32
    %310 = arith.addi %c0_i32_139, %309 : i32
    %c16_i32_140 = arith.constant 16 : i32
    %311 = arith.muli %310, %c16_i32_140 : i32
    %312 = tpu.assume_multiple %311, 16 : i32
    %c256_i32_141 = arith.constant 256 : i32
    %313 = arith.muli %310, %c256_i32_141 : i32
    %314 = tpu.assume_multiple %313, 256 : i32
    %315 = arith.index_cast %312 : i32 to index
    %c0_142 = arith.constant 0 : index
    %316 = vector.load %arg24[%315, %c0_142] : memref<16x16xf32, #tpu.memory_space<vmem>>, vector<16x16xf32>
    %c0_143 = arith.constant 0 : index
    %c0_144 = arith.constant 0 : index
    %317 = vector.load %arg14[%c0_143, %c0_144] : memref<16x256xf32, #tpu.memory_space<vmem>>, vector<16x256xf32>
    %cst_145 = arith.constant dense<0.000000e+00> : vector<16x256xf32>
    %318 = tpu.matmul %316, %317, %cst_145 {dimension_numbers = #tpu.dot_dimension_numbers<[1], [0], [0], [1], [0, 0, 1, 1], [], []>} : vector<16x16xf32>, vector<16x256xf32>, vector<16x256xf32> -> vector<16x256xf32>
    %c0_146 = arith.constant 0 : index
    %c0_147 = arith.constant 0 : index
    %319 = vector.load %arg15[%c0_146, %c0_147] : memref<16x256xf32, #tpu.memory_space<vmem>>, vector<16x256xf32>
    %320 = arith.mulf %318, %319 : vector<16x256xf32>
    %321 = arith.truncf %320 : vector<16x256xf32> to vector<16x256xbf16>
    %322 = arith.index_cast %314 : i32 to index
    %c0_148 = arith.constant 0 : index
    %323 = vector.load %arg29[%322, %c0_148] : memref<256x64xbf16, #tpu.memory_space<vmem>>, vector<256x64xbf16>
    %cst_149 = arith.constant dense<0.000000e+00> : vector<16x64xf32>
    %324 = tpu.matmul %321, %323, %cst_149 {dimension_numbers = #tpu.dot_dimension_numbers<[1], [0], [0], [1], [0, 0, 1, 1], [], []>} : vector<16x256xbf16>, vector<256x64xbf16>, vector<16x64xf32> -> vector<16x64xf32>
    %325 = arith.index_cast %312 : i32 to index
    %c0_150 = arith.constant 0 : index
    %326 = vector.load %arg21[%325, %c0_150] : memref<16x64xf32, #tpu.memory_space<vmem>>, vector<16x64xf32>
    %c0_151 = arith.constant 0 : index
    %c0_152 = arith.constant 0 : index
    %327 = vector.load %arg16[%c0_151, %c0_152] : memref<1x64xf32, #tpu.memory_space<vmem>>, vector<1x64xf32>
    %328 = vector.broadcast %327 : vector<1x64xf32> to vector<16x64xf32>
    %329 = arith.mulf %326, %328 : vector<16x64xf32>
    %330 = arith.addf %324, %329 : vector<16x64xf32>
    %331 = arith.index_cast %312 : i32 to index
    %c0_153 = arith.constant 0 : index
    %332 = vector.load %arg25[%331, %c0_153] : memref<16x64xbf16, #tpu.memory_space<vmem>>, vector<16x64xbf16>
    %333 = arith.extf %332 : vector<16x64xbf16> to vector<16x64xf32>
    %334 = arith.mulf %330, %333 : vector<16x64xf32>
    %335 = arith.truncf %334 : vector<16x64xf32> to vector<16x64xbf16>
    %336 = arith.index_cast %312 : i32 to index
    %c0_154 = arith.constant 0 : index
    %337 = vector.load %arg26[%336, %c0_154] : memref<16x64xbf16, #tpu.memory_space<vmem>>, vector<16x64xbf16>
    tpu.vector_store %arg26[%336, %c0_154], %335 {strides = array<i32>} : memref<16x64xbf16, #tpu.memory_space<vmem>>, vector<16x64xbf16>,
    %c1_i32_155 = arith.constant 1 : i32
    %c0_156 = arith.constant 0 : index
    %c0_157 = arith.constant 0 : index
    %338 = vector.load %arg26[%c0_156, %c0_157] : memref<16x64xbf16, #tpu.memory_space<vmem>>, vector<16x64xbf16>
    %c0_158 = arith.constant 0 : index
    %c0_159 = arith.constant 0 : index
    %339 = vector.load %arg17[%c0_158, %c0_159] : memref<64x32xbf16, #tpu.memory_space<vmem>>, vector<64x32xbf16>
    %cst_160 = arith.constant dense<0.000000e+00> : vector<16x32xf32>
    %340 = tpu.matmul %338, %339, %cst_160 {dimension_numbers = #tpu.dot_dimension_numbers<[1], [0], [0], [1], [0, 0, 1, 1], [], []>} : vector<16x64xbf16>, vector<64x32xbf16>, vector<16x32xf32> -> vector<16x32xf32>
    %341 = vector.shape_cast %340 : vector<16x32xf32> to vector<1x16x32xf32>
    %c0_161 = arith.constant 0 : index
    %c0_162 = arith.constant 0 : index
    %c0_163 = arith.constant 0 : index
    %342 = vector.load %arg18[%c0_161, %c0_162, %c0_163] : memref<1x16x32xf32, #tpu.memory_space<vmem>>, vector<1x16x32xf32>
    tpu.vector_store %arg18[%c0_161, %c0_162, %c0_163], %341 {strides = array<i32>} : memref<1x16x32xf32, #tpu.memory_space<vmem>>, vector<1x16x32xf32>,
    return
  }
  func.func @transform_0(%arg0: i32) -> (i32, i32, i32) {
    %c0_i32 = arith.constant 0 : i32
    %c0_i32_0 = arith.constant 0 : i32
    %c0_i32_1 = arith.constant 0 : i32
    return %arg0, %c0_i32, %c0_i32_0 : i32, i32, i32
  }
  func.func @transform_1(%arg0: i32) -> (i32, i32) {
    %c0_i32 = arith.constant 0 : i32
    %c0_i32_0 = arith.constant 0 : i32
    %c0_i32_1 = arith.constant 0 : i32
    return %c0_i32, %c0_i32_0 : i32, i32
  }
  func.func @transform_2(%arg0: i32) -> (i32, i32) {
    %c0_i32 = arith.constant 0 : i32
    %c0_i32_0 = arith.constant 0 : i32
    %c0_i32_1 = arith.constant 0 : i32
    return %c0_i32, %c0_i32_0 : i32, i32
  }
  func.func @transform_3(%arg0: i32) -> (i32, i32) {
    %c0_i32 = arith.constant 0 : i32
    %c0_i32_0 = arith.constant 0 : i32
    %c0_i32_1 = arith.constant 0 : i32
    return %c0_i32, %c0_i32_0 : i32, i32
  }
  func.func @transform_4(%arg0: i32) -> (i32, i32) {
    %c0_i32 = arith.constant 0 : i32
    %c0_i32_0 = arith.constant 0 : i32
    %c0_i32_1 = arith.constant 0 : i32
    return %c0_i32, %c0_i32_0 : i32, i32
  }
  func.func @transform_5(%arg0: i32) -> (i32, i32) {
    %c0_i32 = arith.constant 0 : i32
    %c0_i32_0 = arith.constant 0 : i32
    %c0_i32_1 = arith.constant 0 : i32
    return %c0_i32, %c0_i32_0 : i32, i32
  }
  func.func @transform_6(%arg0: i32) -> (i32, i32) {
    %c0_i32 = arith.constant 0 : i32
    %c0_i32_0 = arith.constant 0 : i32
    %c0_i32_1 = arith.constant 0 : i32
    return %c0_i32, %c0_i32_0 : i32, i32
  }
  func.func @transform_7(%arg0: i32) -> (i32, i32) {
    %c0_i32 = arith.constant 0 : i32
    %c0_i32_0 = arith.constant 0 : i32
    %c0_i32_1 = arith.constant 0 : i32
    return %c0_i32, %c0_i32_0 : i32, i32
  }
  func.func @transform_8(%arg0: i32) -> (i32, i32) {
    %c0_i32 = arith.constant 0 : i32
    %c0_i32_0 = arith.constant 0 : i32
    %c0_i32_1 = arith.constant 0 : i32
    return %c0_i32, %c0_i32_0 : i32, i32
  }
  func.func @transform_9(%arg0: i32) -> (i32, i32) {
    %c0_i32 = arith.constant 0 : i32
    %c0_i32_0 = arith.constant 0 : i32
    %c0_i32_1 = arith.constant 0 : i32
    return %c0_i32, %c0_i32_0 : i32, i32
  }
  func.func @transform_10(%arg0: i32) -> (i32, i32) {
    %c0_i32 = arith.constant 0 : i32
    %c0_i32_0 = arith.constant 0 : i32
    %c0_i32_1 = arith.constant 0 : i32
    return %c0_i32, %c0_i32_0 : i32, i32
  }
  func.func @transform_11(%arg0: i32) -> (i32, i32) {
    %c0_i32 = arith.constant 0 : i32
    %c0_i32_0 = arith.constant 0 : i32
    %c0_i32_1 = arith.constant 0 : i32
    return %c0_i32, %c0_i32_0 : i32, i32
  }
  func.func @transform_12(%arg0: i32) -> (i32, i32) {
    %c0_i32 = arith.constant 0 : i32
    %c0_i32_0 = arith.constant 0 : i32
    %c0_i32_1 = arith.constant 0 : i32
    return %c0_i32, %c0_i32_0 : i32, i32
  }
  func.func @transform_13(%arg0: i32) -> (i32, i32) {
    %c0_i32 = arith.constant 0 : i32
    %c0_i32_0 = arith.constant 0 : i32
    %c0_i32_1 = arith.constant 0 : i32
    return %c0_i32, %c0_i32_0 : i32, i32
  }
  func.func @transform_14(%arg0: i32) -> (i32, i32) {
    %c0_i32 = arith.constant 0 : i32
    %c0_i32_0 = arith.constant 0 : i32
    %c0_i32_1 = arith.constant 0 : i32
    return %c0_i32, %c0_i32_0 : i32, i32
  }
  func.func @transform_15(%arg0: i32) -> (i32, i32) {
    %c0_i32 = arith.constant 0 : i32
    %c0_i32_0 = arith.constant 0 : i32
    %c0_i32_1 = arith.constant 0 : i32
    return %c0_i32, %c0_i32_0 : i32, i32
  }
  func.func @transform_16(%arg0: i32) -> (i32, i32) {
    %c0_i32 = arith.constant 0 : i32
    %c0_i32_0 = arith.constant 0 : i32
    %c0_i32_1 = arith.constant 0 : i32
    return %c0_i32, %c0_i32_0 : i32, i32
  }
  func.func @transform_17(%arg0: i32) -> (i32, i32, i32) {
    %c0_i32 = arith.constant 0 : i32
    %c0_i32_0 = arith.constant 0 : i32
    %c0_i32_1 = arith.constant 0 : i32
    return %arg0, %c0_i32, %c0_i32_0 : i32, i32, i32
  }
  func.func @transform_18(%arg0: i32) -> (i32, i32, i32) {
    %c0_i32 = arith.constant 0 : i32
    %c0_i32_0 = arith.constant 0 : i32
    %c0_i32_1 = arith.constant 0 : i32
    return %arg0, %c0_i32, %c0_i32_0 : i32, i32, i32
  }
}

</mosaic_0001>

<bundles_post_ra>
// kernel: tpu_custom_call.1
= control target key start
LH: loop header
LB: loop body
LE: loop exit
PB: predicated region body
PF: predicated region fallthrough
CT: control target
= control target key end

     0   :  { %s5396_s0 = inlined_call_operand.vmem [shape: f32[2,16,32], index: 0, kind: input, shape index: {}]   ;;  %s5397_s1 = inlined_call_operand.vmem [shape: f32[1,32], index: 1, kind: input, shape index: {}]   ;;  %s5398_s2 = inlined_call_operand.vmem [shape: f32[1,32], index: 2, kind: input, shape index: {}]   ;;  %s5399_s3 = inlined_call_operand.vmem [shape: bf16[32,128], index: 3, kind: input, shape index: {}]   ;;  %s5400_s4 = inlined_call_operand.vmem [shape: f32[4,64], index: 4, kind: input, shape index: {}]   ;;  %s5401_s5 = inlined_call_operand.vmem [shape: f32[1,64], index: 5, kind: input, shape index: {}]   ;;  %s5402_s6 = inlined_call_operand.vmem [shape: f32[64,34], index: 6, kind: input, shape index: {}]   ;;  %s5403_s7 = inlined_call_operand.vmem [shape: f32[2,64], index: 7, kind: input, shape index: {}]   ;;  %s5404_s8 = inlined_call_operand.vmem [shape: f32[1,64], index: 8, kind: input, shape index: {}]   ;;  %s5405_s9 = inlined_call_operand.vmem [shape: f32[256,64], index: 9, kind: input, shape index: {}]   ;;  %s5406_s10 = inlined_call_operand.vmem [shape: f32[256,16], index: 10, kind: input, shape index: {}]   ;;  %s5407_s11 = inlined_call_operand.vmem [shape: f32[256,16], index: 11, kind: input, shape index: {}]   ;;  %s5408_s12 = inlined_call_operand.vmem [shape: f32[16,16], index: 12, kind: input, shape index: {}]   ;;  %s5409_s13 = inlined_call_operand.vmem [shape: f32[16,256], index: 13, kind: input, shape index: {}]   ;;  %s5410_s14 = inlined_call_operand.vmem [shape: f32[16,256], index: 14, kind: input, shape index: {}]   ;;  %s5411_s15 = inlined_call_operand.vmem [shape: f32[1,64], index: 15, kind: input, shape index: {}]   ;;  %s5412_s16 = inlined_call_operand.vmem [shape: bf16[64,32], index: 16, kind: input, shape index: {}]   ;;  %s5413_s17 = inlined_call_operand.hbm [shape: f32[2,16,32], index: 17, kind: output, shape index: {0}]   ;;  %s5414_s18 = inlined_call_operand.hbm [shape: f32[2,16,32], index: 18, kind: output, shape index: {1}]  }
   0x1   :  { %5423 = sst [smem:[#allocation23_spill]] %s5396_s0 }
   0x2   :  { %5424 = sst [smem:[#allocation24_spill]] %s5397_s1 }
   0x3   :  { %5425 = sst [smem:[#allocation25_spill]] %s5398_s2 }
   0x4   :  { %5426 = sst [smem:[#allocation26_spill]] %s5399_s3 }
   0x5   :  { %5427 = sst [smem:[#allocation27_spill]] %s5400_s4 }
   0x6   :  { %24 = vsyncpa [#allocation13], 0 }
   0x7   :  { %26 = vsyncpa [#allocation13 + $0x1], 0 }
   0x8   :  { %27 = vsyncpa [#allocation15], 0 }
   0x9   :  { %29 = vsyncpa [#allocation15 + $0x1], 0  ;;  %s4377_s27 = smov 0   ;;  %s4379_s28 = smov 0  }
   0xa   :  { %s4381_s29 = smov 0   ;;  %s4383_s30 = smov 0  }
   0xb LB: > { %5428 = sst [smem:[#allocation18_spill]] %s4263_s28  ;;  %s4398_s0 = sadd.s32 4294967295, %s4271_s30   ;;  %s4271_s30 = sphi %s4383_s30, %s5444_s30   ;;  %s4267_s29 = sphi %s4381_s29, %s5447_s29   ;;  %s4263_s28 = sphi %s4379_s28, %s5446_s28   ;;  %s4259_s27 = sphi %s4377_s27, %s5445_s27  }
   0xc   : > { %5429 = sst [smem:[#allocation19_spill]] %s4267_s29  ;;  %s3360_s19 = sadd.s32 4294967294, %s4271_s30  }
   0xd   : > { %s4402_s1 = sadd.s32 1, %s4271_s30   ;;  %s404_s20 = sadd.s32 1, %s4267_s29 }
   0xe   : > { %5430 = sst [smem:[#allocation20_spill]] %s4402_s1  ;;  %s401_s21 = ssub.s32 %s4271_s30, %s4402_s1 }
   0xf   : > { %p414_p0 = scmp.ne.s32.totalorder %s4267_s29, %s4263_s28  ;;  %p402_p1 = scmp.eq.s32.totalorder %s401_s21, 0 }
  0x10   : > { %p415_p2 = scmp.eq.s32.totalorder %s4398_s0, 1  ;;  %p420_p3 = scmp.ne.s32.totalorder %s4263_s28, %s4259_s27 }
  0x11   : > { %p421_p4 = scmp.eq.s32.totalorder %s3360_s19, 1  ;;  %p3363_p7 = scmp.ge.s32.totalorder %s4271_s30, 1 }
  0x12   : > { %s4413_s22 = scalar_select %p402_p1, %s4267_s29, %s404_s20  }
  0x13   : > { %p4415_p5 = por %p415_p2, %p414_p0  ;;  %p4419_p6 = por %p421_p4, %p420_p3 }
  0x14   : > { %5431 = sst [smem:[#allocation21_spill]] %s4413_s22  ;;  %p521_p8 = scmp.lt.s32.totalorder %s4271_s30, 3 }
  0x15   : > { %s5433_s23 = scalar_select %p4419_p6, 1, 0 }
  0x16   : > { %p522_p9 = pnand %p3363_p7, %p521_p8 }
  0x17   : > { %5434 = sst [smem:[#allocation22_spill]] %s5433_s23  ;;  %p580_p10 = scmp.lt.s32.totalorder (!%p522_p9), %s4398_s0, 1  ;;  %vm588_vm0 = vcmask (!%p522_p9), 261120   ;;  %v4273_v15 = vmov (!%p522_p9), 0.0   ;;  %vm4274_vm1 = vmmov (!%p522_p9), 0   ;;  %vm716_vm2 = vcmask (!%p522_p9), 523264  }
  0x18   : > { %525 = sbr.rel (%p522_p9) target bundleno = 2149 (0x865), region = 88  ;;  %s4427_s24 = sand.u32 (!%p522_p9), 1, %s4263_s28   ;;  %3710 = vmatprep.subr.bf16.mxu1 (!%p522_p9), %v4273_v15  ;;  %3714 = vmatprep.mubr.msk.bf16.mxu1 (!%p522_p9), %vm4274_vm1, %v4273_v15  ;;  %718 = vst.msk [vmem:[#allocation2] sm:$0xff] (!%p522_p9), %vm716_vm2, %v4273_v15  ;;  %v789_v34 = vld [vmem:[%s5402_s6] sm:$0xff] (!%p522_p9)  ;;  %v790_v35 = vld [vmem:[%s5402_s6 + $0x8] sm:$0xff] (!%p522_p9)  ;;  %v791_v36 = vld [vmem:[%s5402_s6 + $0x10] sm:$0xff] (!%p522_p9) }
  0x19   : > { %s5418_s25 = sshll.u32 (!%p522_p9), %s4427_s24, 4  ;;  %s5435_s22 = sld [smem:[#allocation23_spill]] (!%p522_p9)  ;;  %v3962_v37 = vpack.c.bf16 (!%p522_p9), %v790_v35, %v789_v34  ;;  %v792_v38 = vld [vmem:[%s5402_s6 + $0x18] sm:$0xff] (!%p522_p9)  ;;  %v793_v40 = vld [vmem:[%s5402_s6 + $0x20] sm:$0xff] (!%p522_p9)  ;;  %v794_v41 = vld [vmem:[%s5402_s6 + $0x28] sm:$0xff] (!%p522_p9)  ;;  %vm893_vm3 = vcmask (!%p522_p9), 1041408  }
  0x1a   : > { %s4437_s1 = scalar_lea.vmem (!%p522_p9), [#allocation14], %s5418_s25  ;;  %s5436_s3 = sld [smem:[#allocation26_spill]] (!%p522_p9)  ;;  %v3966_v39 = vpack.c.bf16 (!%p522_p9), %v792_v38, %v791_v36  ;;  %v3970_v42 = vpack.c.bf16 (!%p522_p9), %v794_v41, %v793_v40  ;;  %v795_v43 = vld [vmem:[%s5402_s6 + $0x30] sm:$0xff] (!%p522_p9)  ;;  %v796_v44 = vld [vmem:[%s5402_s6 + $0x38] sm:$0xff] (!%p522_p9)  ;;  %v3373_v56 = vld [vmem:[%s5401_s5] ss:$0 sm:$0xff] (!%p522_p9) }
  0x1b   : > { %v3974_v45 = vpack.c.bf16 (!%p522_p9), %v796_v44, %v795_v43  ;;  %s5439_s4 = sld [smem:[#allocation27_spill]] (!%p522_p9)  ;;  %v878_v41 = vld [vmem:[%s5403_s7] sm:$0x3] (!%p522_p9)  ;;  %vm886_vm4 = vcmask (!%p522_p9), 15360   ;;  %vm996_vm5 = vcmask (!%p522_p9), 130048   ;;  %s4275_s25 = smov (!%p522_p9), 126  }
  0x1c   : > { %3737 = vmatprep.subr.msk.mxu0 (!%p522_p9), %vm893_vm3, %v878_v41  ;;  %v1528_v43 = vld [vmem:[%s5406_s10] sm:$0xff] (!%p522_p9)  ;;  %s4276_s20 = smov (!%p522_p9), 110   ;;  %s4277_s21 = smov (!%p522_p9), 64  }
  0x1d   : > { %3738 = vmatpush3.msk.msra.mxu0 (!%p522_p9), %vm893_vm3, %v878_v41  ;;  %v1946_v41 = vld [vmem:[%s5408_s12 + $0x8] sm:$0xff] (!%p522_p9)  ;;  %s5421_s28 = sshll.u32 (!%p522_p9), %s4398_s0, 8 }
  0x1f   : > { %s581_s26 = scalar_select %p580_p10, %s4398_s0, 1 }
  0x20   : > { %v4049_v14 = vld [vmem:[%s5436_s3] sm:$0xff]   ;;  %v4050_v16 = vld [vmem:[%s5436_s3 + $0x8] sm:$0xff]   ;;  %s3206_s3 = sshll.u32 %s4437_s1, 4  ;;  %s5303_s3 = int_to_ptr.vmem [resolvable:$true] %s3206_s3 }
  0x21   : > { %s3528_s19 = sshll.u32 %s581_s26, 4  ;;  %3711 = vmatpush3.bf16.msra.mxu1 %v4049_v14  ;;  %v3374_v54 = vld [vmem:[%s5439_s4] ss:$0 sm:$0xff]  ;;  %v3375_v55 = vld [vmem:[%s5439_s4 + $0x1] ss:$0 sm:$0xff] }
  0x22   : > { %s584_s29 = scalar_lea.vmem %s5435_s22, %s3528_s19  ;;  %3712 = vmatprep.subr.bf16.mxu1 %v4273_v15  ;;  %s5438_s19 = sld [smem:[#allocation25_spill]]  ;;  %v3376_v60 = vld [vmem:[%s5439_s4 + $0x2] ss:$0 sm:$0xff] }
  0x23   : > { %v586_v0 = vld [vmem:[%s584_s29] sm:$0xff]  ;;  %v587_v1 = vld [vmem:[%s584_s29 + $0x8] sm:$0xff]  ;;  %s5437_s29 = sld [smem:[#allocation24_spill]] }
  0x24   : > { %v591_v2 = vsel %vm588_vm0, %v586_v0, 0.0  ;;  %589 = vst.msk [vmem:[%s4437_s1] sm:$0xff] %vm588_vm0, %v586_v0  ;;  %590 = vst.msk [vmem:[%s4437_s1 + $0x8] sm:$0xff] %vm588_vm0, %v587_v1  ;;  %v594_v3 = vsel %vm588_vm0, %v587_v1, 0.0 }
  0x25   : > { %592 = vadd.xlane.f32.xlu0 %v591_v2  ;;  %3713 = vmatpush3.bf16.msra.mxu1 %v4050_v16 }
  0x26   : > { %3963 = vmatprep.subr.bf16.mxu1 %v3962_v37 }
  0x28   : > { %v3369_v29 = vld [vmem:[%s5438_s19] ss:$0 sm:$0xff]  ;;  %s5310_s19 = scalar_lea.hbm %s5414_s18, %s5421_s28 }
  0x29   : > { %595 = vadd.xlane.f32.xlu0 %v594_v3  ;;  %v3368_v25 = vld [vmem:[%s5437_s29] ss:$0 sm:$0xff] }
  0xb2   : > { %v593_v4 = vpop.xlane.xlu0 %592 }
  0xb3   : > { %v598_v5 = vmul.f32 0.03125, %v593_v4 }
  0xb5   : > { %v600_v6 = vsub.f32 %v586_v0, %v598_v5  ;;  %v3377_v5 = vld [vmem:[%s5439_s4 + $0x3] ss:$0 sm:$0xff] }
  0xb6   : > { %v596_v7 = vpop.xlane.xlu0 %595 }
  0xb7   : > { %v599_v8 = vmul.f32 0.03125, %v596_v7  ;;  %v602_v9 = vmul.f32 %v600_v6, %v600_v6 }
  0xb9   : > { %v601_v10 = vsub.f32 %v587_v1, %v599_v8  ;;  %v604_v11 = vsel %vm588_vm0, %v602_v9, 0.0 }
  0xba   : > { %605 = vadd.xlane.f32.xlu1 %v604_v11 }
  0xbb   : > { %v603_v12 = vmul.f32 %v601_v10, %v601_v10 }
  0xbd   : > { %v607_v13 = vsel %vm588_vm0, %v603_v12, 0.0 }
  0xbe   : > { %608 = vadd.xlane.f32.xlu1 %v607_v13 }
 0x147   : > { %v606_v17 = vpop.xlane.xlu1 %605 }
 0x148   : > { %v610_v18 = vmul.f32 0.03125, %v606_v17 }
 0x14a   : > { %v612_v19 = vadd.f32 1e-05, %v610_v18 }
 0x14b   : > { %v609_v20 = vpop.xlane.xlu1 %608 }
 0x14c   : > { %4055 = vrsqrt.f32 %v612_v19  ;;  %v611_v21 = vmul.f32 0.03125, %v609_v20 }
 0x14e   : > { %v613_v22 = vadd.f32 1e-05, %v611_v21 }
 0x150   : > { %4057 = vrsqrt.f32 %v613_v22 }
 0x156   : > { %v4056_v23 = vpop.eup %4055 }
 0x157   : > { %v616_v24 = vmul.f32 %v4056_v23, %v600_v6 }
 0x159   : > { %v625_v28 = vmul.f32 %v3368_v25, %v616_v24 }
 0x15a   : > { %v4058_v26 = vpop.eup %4057 }
 0x15b   : > { %v617_v27 = vmul.f32 %v4058_v26, %v601_v10  ;;  %v634_v31 = vadd.f32 %v3369_v29, %v625_v28 }
 0x15d   : > { %v626_v30 = vmul.f32 %v3368_v25, %v617_v27 }
 0x15f   : > { %v635_v32 = vadd.f32 %v3369_v29, %v626_v30 }
 0x161   : > { %v636_v33 = vpack.c.bf16 %v635_v32, %v634_v31 }
 0x163   : > { %3715 = vmatmul.mubr.msk.bf16.vlgmr.msra.gmra.mrb[0].mxu1 %vm588_vm0, %v636_v33 }
 0x164   : > { %3965 = vmatpush3.bf16.msra.mxu1 %v3962_v37 }
 0x165   : > { %3967 = vmatprep.subr.bf16.mxu1 %v3966_v39 }
 0x168   : > { %3969 = vmatpush3.bf16.msra.mxu1 %v3966_v39 }
 0x169   : > { %3971 = vmatprep.subr.bf16.mxu1 %v3970_v42 }
 0x16c   : > { %3973 = vmatpush3.bf16.msra.mxu1 %v3970_v42 }
 0x16d   : > { %3975 = vmatprep.subr.bf16.mxu1 %v3974_v45 }
 0x170   : > { %3977 = vmatpush3.bf16.msra.mxu1 %v3974_v45 }
 0x236   : > { %v690_v46 = vpop.f32.mrb[0].mxu1 }
 0x237   : > { %v697_v47 = vsub.f32 0.0, %v690_v46  ;;  %719 = vst.msk [vmem:[#allocation2 + $0x8] sm:$0xff] %vm716_vm2, %v690_v46  ;;  %v3716_v48 = vpop.f32.mrb[1].mxu1 }
 0x238   : > { %v693_v49 = vpop.f32.mrb[2].mxu1 }
 0x239   : > { %v699_v50 = vmul.f32 1.442695, %v697_v47  ;;  %v698_v51 = vsub.f32 0.0, %v693_v49  ;;  %720 = vst.msk [vmem:[#allocation2 + $0x10] sm:$0xff] %vm716_vm2, %v693_v49  ;;  %v3717_v52 = vpop.f32.mrb[3].mxu1 }
 0x23b   : > { %4059 = vpow2.f32 %v699_v50  ;;  %v701_v53 = vmul.f32 1.442695, %v698_v51 }
 0x23d   : > { %4061 = vpow2.f32 %v701_v53  ;;  %v4526_v53 = vld [vmem:[%s5406_s10 + $0x8] sm:$0xff] }
 0x23e   : > { %v729_v57 = vld [vmem:[#allocation2 + $0x5] sm:$0xff] }
 0x23f   : > { %v740_v58 = vld [vmem:[#allocation2 + $0x6] sm:$0xff]  ;;  %v736_v59 = vmul.f32 %v3374_v54, %v729_v57 }
 0x240   : > { %v730_v61 = vld [vmem:[#allocation2 + $0xd] sm:$0xff]  ;;  %v747_v2 = vmul.f32 %v3375_v55, %v740_v58 }
 0x241   : > { %v741_v62 = vld [vmem:[#allocation2 + $0xe] sm:$0xff]  ;;  %v737_v0 = vmul.f32 %v3374_v54, %v730_v61  ;;  %v738_v1 = vadd.f32 %v3373_v56, %v736_v59  ;;  %v4568_v59 = vld [vmem:[%s5406_s10 + $0x38] sm:$0xff] }
 0x242   : > { %v751_v63 = vld [vmem:[#allocation2 + $0x7] sm:$0xff]  ;;  %v752_v3 = vld [vmem:[#allocation2 + $0xf] sm:$0xff]  ;;  %v748_v7 = vmul.f32 %v3375_v55, %v741_v62  ;;  %v4540_v55 = vld [vmem:[%s5406_s10 + $0x18] sm:$0xff] }
 0x243   : > { %v762_v4 = vld [vmem:[#allocation2 + $0x8] sm:$0xff]  ;;  %v739_v6 = vadd.f32 %v3373_v56, %v737_v0  ;;  %v749_v8 = vadd.f32 %v747_v2, %v738_v1  ;;  %v758_v9 = vmul.f32 %v3376_v60, %v751_v63  ;;  %v763_v10 = vld [vmem:[#allocation2 + $0x10] sm:$0xff]  ;;  %v759_v12 = vmul.f32 %v3376_v60, %v752_v3  ;;  %v4545_v56 = vld [vmem:[%s5406_s10 + $0x20] sm:$0xff] }
 0x244   : > { %v769_v14 = vmul.f32 %v3377_v5, %v762_v4  ;;  %v770_v19 = vmul.f32 %v3377_v5, %v763_v10  ;;  %v4531_v54 = vld [vmem:[%s5406_s10 + $0x10] sm:$0xff]  ;;  %v4554_v57 = vld [vmem:[%s5406_s10 + $0x28] sm:$0xff]  ;;  %v4573_v60 = vld [vmem:[%s5406_s10 + $0x40] sm:$0xff] }
 0x245   : > { %v4060_v11 = vpop.eup %4059  ;;  %v760_v13 = vadd.f32 %v758_v9, %v749_v8  ;;  %v750_v16 = vadd.f32 %v748_v7, %v739_v6  ;;  %v4559_v58 = vld [vmem:[%s5406_s10 + $0x30] sm:$0xff]  ;;  %v4582_v61 = vld [vmem:[%s5406_s10 + $0x48] sm:$0xff]  ;;  %v4596_v63 = vld [vmem:[%s5406_s10 + $0x58] sm:$0xff] }
 0x246   : > { %v703_v17 = vadd.f32 1.0, %v4060_v11  ;;  %v4587_v62 = vld [vmem:[%s5406_s10 + $0x50] sm:$0xff]  ;;  %v4601_v0 = vld [vmem:[%s5406_s10 + $0x60] sm:$0xff]  ;;  %v4610_v1 = vld [vmem:[%s5406_s10 + $0x68] sm:$0xff] }
 0x247   : > { %v4062_v18 = vpop.eup %4061  ;;  %v771_v20 = vadd.f32 %v769_v14, %v760_v13  ;;  %v761_v21 = vadd.f32 %v759_v12, %v750_v16  ;;  %v4615_v2 = vld [vmem:[%s5406_s10 + $0x70] sm:$0xff]  ;;  %v4624_v3 = vld [vmem:[%s5406_s10 + $0x78] sm:$0xff]  ;;  %v4629_v4 = vld [vmem:[%s5406_s10 + $0x80] sm:$0xff] }
 0x248   : > { %4063 = vrcp.f32 %v703_v17  ;;  %v704_v22 = vadd.f32 1.0, %v4062_v18  ;;  %v4638_v5 = vld [vmem:[%s5406_s10 + $0x88] sm:$0xff]  ;;  %v4643_v6 = vld [vmem:[%s5406_s10 + $0x90] sm:$0xff]  ;;  %v4652_v7 = vld [vmem:[%s5406_s10 + $0x98] sm:$0xff] }
 0x249   : > { %v773_v23 = vsub.f32 0.0, %v771_v20  ;;  %v772_v24 = vadd.f32 %v770_v19, %v761_v21  ;;  %v4657_v8 = vld [vmem:[%s5406_s10 + $0xa0] sm:$0xff]  ;;  %v4666_v9 = vld [vmem:[%s5406_s10 + $0xa8] sm:$0xff]  ;;  %v4671_v10 = vld [vmem:[%s5406_s10 + $0xb0] sm:$0xff] }
 0x24a   : > { %4065 = vrcp.f32 %v704_v22  ;;  %v4680_v11 = vld [vmem:[%s5406_s10 + $0xb8] sm:$0xff]  ;;  %v4685_v12 = vld [vmem:[%s5406_s10 + $0xc0] sm:$0xff]  ;;  %v4694_v13 = vld [vmem:[%s5406_s10 + $0xc8] sm:$0xff] }
 0x24b   : > { %v775_v25 = vmul.f32 1.442695, %v773_v23  ;;  %v774_v26 = vsub.f32 0.0, %v772_v24  ;;  %v4699_v14 = vld [vmem:[%s5406_s10 + $0xd0] sm:$0xff]  ;;  %v4708_v16 = vld [vmem:[%s5406_s10 + $0xd8] sm:$0xff]  ;;  %v4713_v17 = vld [vmem:[%s5406_s10 + $0xe0] sm:$0xff] }
 0x24c   : > { %v4722_v18 = vld [vmem:[%s5406_s10 + $0xe8] sm:$0xff]  ;;  %v4727_v19 = vld [vmem:[%s5406_s10 + $0xf0] sm:$0xff]  ;;  %v3380_v21 = vld [vmem:[%s5404_s8] ss:$0 sm:$0xff] }
 0x24d   : > { %4067 = vpow2.f32 %v775_v25  ;;  %v777_v27 = vmul.f32 1.442695, %v774_v26 }
 0x24f   : > { %4069 = vpow2.f32 %v777_v27 }
 0x252   : > { %v4064_v28 = vpop.eup %4063 }
 0x253   : > { %v709_v30 = vmul.f32 %v4064_v28, %v690_v46 }
 0x254   : > { %v4066_v29 = vpop.eup %4065 }
 0x255   : > { %v710_v31 = vmul.f32 %v4066_v29, %v693_v49 }
 0x257   : > { %v4068_v32 = vpop.eup %4067  ;;  %v711_v33 = vpack.c.bf16 %v710_v31, %v709_v30 }
 0x258   : > { %v779_v34 = vadd.f32 1.0, %v4068_v32 }
 0x259   : > { %v4070_v35 = vpop.eup %4069 }
 0x25a   : > { %4071 = vrcp.f32 %v779_v34  ;;  %v780_v36 = vadd.f32 1.0, %v4070_v35 }
 0x25c   : > { %4073 = vrcp.f32 %v780_v36 }
 0x264   : > { %v4072_v37 = vpop.eup %4071 }
 0x265   : > { %v785_v38 = vmul.f32 %v4072_v37, %v771_v20  ;;  %v4736_v20 = vld [vmem:[%s5406_s10 + $0xf8] sm:$0xff] }
 0x266   : > { %v4074_v39 = vpop.eup %4073 }
 0x267   : > { %787 = vst.msk [vmem:[#allocation3] sm:$0xff] %vm716_vm2, %v785_v38  ;;  %3734 = vmatprep.mubr.msk.f32.mxu1 %vm716_vm2, %v785_v38  ;;  %v786_v40 = vmul.f32 %v4074_v39, %v772_v24 }
 0x269   : > { %788 = vst.msk [vmem:[#allocation3 + $0x8] sm:$0xff] %vm716_vm2, %v786_v40  ;;  %3735 = vmatmul.mubr.msk.f32.vlgmr.msra.gmra.mrb[4].mxu1 %vm716_vm2, %v786_v40  ;;  %v1945_v40 = vld [vmem:[%s5408_s12] sm:$0xff] }
 0x26a   : > { %3798 = vmatprep.mubr.msk.f32.mxu1 %vm996_vm5, %v1528_v43 }
 0x33c   : > { %v3736_v42 = vpop.f32.mrb[4].mxu1 }
 0x33d   : > { %992 = vrot.lane.b32.xlu1 %v3736_v42, %s4275_s25  ;;  %v869_v44 = vpop.f32.mrb[5].mxu1 }
 0x33e   : > { %990 = vrot.lane.b32.xlu0 %v869_v44, %s4275_s25  ;;  %3739 = vmatprep.mubr.msk.f32.mxu0 %vm886_vm4, %v869_v44  ;;  %s3177_s25 = scalar_lea.sflag [#allocation15], %s4427_s24 }
 0x33f   : > { %3740 = vmatmul.mubr.msk.f32.vlgmr.msra.gmra.mrb[0].mxu0 %vm886_vm4, %v3736_v42 }
 0x340   : > { %3746 = vmatprep.mubr.msk.f32.mxu0 %vm996_vm5, %v1528_v43  ;;  %v1010_v43 = vld [vmem:[#allocation3 + $0x8] sm:$0xff] }
 0x341   : > { %999 = vrot.lane.b32.xlu1 %v869_v44, %s4276_s20 }
 0x342   : > { %713 = vrot.lane.b32.xlu0 %v711_v33, %s4277_s21  ;;  %s4278_s21 = smov [#allocation14]  }
 0x343   : > { %s4181_s1 = sshll.u32 %s4278_s21, 4  ;;  %s4182_s1 = int_to_ptr.vmem [resolvable:$false] %s4181_s1 }
 0x344   : > { %s4183_s29 = scalar_lea.vmem %s4182_s1, 512  ;;  %p4184_p0 = scmp.lt.s32.totalorder %s5303_s3, %s4182_s1 }
 0x345   : > { %1001 = vrot.lane.b32.xlu1 %v3736_v42, %s4276_s20  ;;  %s4177_s20 = scalar_lea.vmem %s5303_s3, 256 }
 0x346   : > { %p4178_p11 = scmp.ne.s32.totalorder %s5303_s3, %s4177_s20  ;;  %p4185_p1 = scmp.lt.s32.totalorder %s4183_s29, %s4177_s20 }
 0x348   : > { %p4179_p12 = pnand %p4178_p11, %p4415_p5  ;;  %p4186_p2 = por %p4185_p1, %p4184_p0 }
 0x34a   : > { %p4180_p13 = pneg %p4179_p12 }
 0x34c   : > { %p4187_p3 = pnand %p4186_p2, %p4180_p13 }
 0x3af   : > { %v993_v45 = vpop.permute.xlu1 %992 }
 0x3b0   : > { %998 = vst.msk [vmem:[#allocation5 + $0x8] sm:$0xff] %vm996_vm5, %v993_v45  ;;  %v991_v46 = vpop.permute.xlu0 %990  ;;  %v1009_v45 = vld [vmem:[#allocation3] sm:$0xff] }
 0x3b1   : > { %997 = vst.msk [vmem:[#allocation5] sm:$0xff] %vm996_vm5, %v991_v46 }
 0x3b3   : > { %v1000_v47 = vpop.permute.xlu1 %999 }
 0x3b4   : > { %1005 = vst.msk [vmem:[#allocation6] sm:$0xff] %vm996_vm5, %v1000_v47  ;;  %v714_v48 = vpop.permute.xlu0 %713 }
 0x3b5   : > { %717 = vst.msk [vmem:[#allocation7] sm:$0xff] %vm716_vm2, %v714_v48 }
 0x3b7   : > { %v1002_v49 = vpop.permute.xlu1 %1001  ;;  %v1014_v50 = vld [vmem:[#allocation5 + $0x8] sm:$0xff] }
 0x3b8   : > { %1006 = vst.msk [vmem:[#allocation6 + $0x8] sm:$0xff] %vm996_vm5, %v1002_v49  ;;  %v1013_v51 = vld [vmem:[#allocation5] sm:$0xff]  ;;  %v3986_v49 = vpack.c.bf16 %v1946_v41, %v1945_v40 }
 0x3b9   : > { %v3982_v52 = vpack.c.bf16 %v1014_v50, %v1013_v51  ;;  %v2921_v51 = vld [vmem:[%s5409_s13 + $0x8] sm:$0xff]  ;;  %v1896_v40 = vld [vmem:[%s5407_s11 + $0x78] sm:$0xff] }
 0x3bb   : > { %3983 = vmatprep.subr.bf16.mxu1 %v3982_v52 }
 0x3bc   : > { %3985 = vmatpush3.bf16.msra.mxu1 %v3982_v52  ;;  %v2923_v52 = vld [vmem:[%s5409_s13 + $0x18] sm:$0xff] }
 0x3bf   : > { %3799 = vmatmul.mubr.msk.f32.vlgmr.msra.gmra.mrb[6].mxu1 %vm996_vm5, %v4526_v53 }
 0x3c0   : > { %3801 = vmatprep.mubr.msk.f32.mxu1 %vm996_vm5, %v4531_v54 }
 0x3c3   : > { %3802 = vmatmul.mubr.msk.f32.gmra.mrb[8].mxu1 %vm996_vm5, %v4540_v55 }
 0x3c4   : > { %3804 = vmatprep.mubr.msk.f32.mxu1 %vm996_vm5, %v4545_v56 }
 0x3c7   : > { %3805 = vmatmul.mubr.msk.f32.gmra.mrb[10].mxu1 %vm996_vm5, %v4554_v57 }
 0x3c8   : > { %3807 = vmatprep.mubr.msk.f32.mxu1 %vm996_vm5, %v4559_v58 }
 0x3cb   : > { %3808 = vmatmul.mubr.msk.f32.gmra.mrb[12].mxu1 %vm996_vm5, %v4568_v59 }
 0x3cc   : > { %3810 = vmatprep.mubr.msk.f32.mxu1 %vm996_vm5, %v4573_v60 }
 0x3cf   : > { %3811 = vmatmul.mubr.msk.f32.gmra.mrb[14].mxu1 %vm996_vm5, %v4582_v61 }
 0x3d0   : > { %3813 = vmatprep.mubr.msk.f32.mxu1 %vm996_vm5, %v4587_v62 }
 0x3d3   : > { %3814 = vmatmul.mubr.msk.f32.gmra.mrb[16].mxu1 %vm996_vm5, %v4596_v63 }
 0x3d4   : > { %3816 = vmatprep.mubr.msk.f32.mxu1 %vm996_vm5, %v4601_v0 }
 0x3d7   : > { %3817 = vmatmul.mubr.msk.f32.gmra.mrb[18].mxu1 %vm996_vm5, %v4610_v1 }
 0x3d8   : > { %3819 = vmatprep.mubr.msk.f32.mxu1 %vm996_vm5, %v4615_v2 }
 0x3db   : > { %3820 = vmatmul.mubr.msk.f32.gmra.mrb[20].mxu1 %vm996_vm5, %v4624_v3 }
 0x3dc   : > { %3822 = vmatprep.mubr.msk.f32.mxu1 %vm996_vm5, %v4629_v4 }
 0x3df   : > { %3823 = vmatmul.mubr.msk.f32.gmra.mrb[22].mxu1 %vm996_vm5, %v4638_v5 }
 0x3e0   : > { %3825 = vmatprep.mubr.msk.f32.mxu1 %vm996_vm5, %v4643_v6 }
 0x3e3   : > { %3826 = vmatmul.mubr.msk.f32.gmra.mrb[24].mxu1 %vm996_vm5, %v4652_v7 }
 0x3e4   : > { %3828 = vmatprep.mubr.msk.f32.mxu1 %vm996_vm5, %v4657_v8 }
 0x3e7   : > { %3829 = vmatmul.mubr.msk.f32.gmra.mrb[26].mxu1 %vm996_vm5, %v4666_v9 }
 0x3e8   : > { %3831 = vmatprep.mubr.msk.f32.mxu1 %vm996_vm5, %v4671_v10 }
 0x3eb   : > { %3832 = vmatmul.mubr.msk.f32.gmra.mrb[28].mxu1 %vm996_vm5, %v4680_v11 }
 0x3ec   : > { %3834 = vmatprep.mubr.msk.f32.mxu1 %vm996_vm5, %v4685_v12 }
 0x3ef   : > { %3835 = vmatmul.mubr.msk.f32.gmra.mrb[30].mxu1 %vm996_vm5, %v4694_v13 }
 0x3f0   : > { %3837 = vmatprep.mubr.msk.f32.mxu1 %vm996_vm5, %v4699_v14 }
 0x3f3   : > { %3838 = vmatmul.mubr.msk.f32.gmra.mrb[32].mxu1 %vm996_vm5, %v4708_v16 }
 0x3f4   : > { %3840 = vmatprep.mubr.msk.f32.mxu1 %vm996_vm5, %v4713_v17 }
 0x3f7   : > { %3841 = vmatmul.mubr.msk.f32.gmra.mrb[34].mxu1 %vm996_vm5, %v4722_v18 }
 0x3f8   : > { %3843 = vmatprep.mubr.msk.f32.mxu1 %vm996_vm5, %v4727_v19 }
 0x3fb   : > { %3844 = vmatmul.mubr.msk.f32.gmra.mrb[36].mxu1 %vm996_vm5, %v4736_v20 }
 0x412   : > { %v3741_v22 = vpop.f32.mrb[0].mxu0 }
 0x413   : > { %v969_v23 = vadd.f32 %v3741_v22, %v3380_v21  ;;  %v963_v24 = vpop.f32.mrb[1].mxu0  ;;  %v1890_v22 = vld [vmem:[%s5407_s11 + $0x48] sm:$0xff] }
 0x414   : > { %v964_v25 = vadd.f32 %v3380_v21, %v963_v24 }
 0x415   : > { %v975_v26 = vmin.f32 %v969_v23, 20.0  ;;  %vm973_vm6 = vcmp.gt.f32.partialorder %v969_v23, 20.0 }
 0x416   : > { %v974_v27 = vmin.f32 %v964_v25, 20.0  ;;  %vm972_vm7 = vcmp.gt.f32.partialorder %v964_v25, 20.0 }
 0x417   : > { %v978_v28 = vmul.f32 1.442695, %v975_v26  ;;  %v1891_v26 = vld [vmem:[%s5407_s11 + $0x50] sm:$0xff] }
 0x418   : > { %v976_v29 = vmul.f32 1.442695, %v974_v27 }
 0x419   : > { %4075 = vpow2.f32 %v978_v28  ;;  %v1892_v28 = vld [vmem:[%s5407_s11 + $0x58] sm:$0xff] }
 0x41a   : > { %4077 = vpow2.f32 %v976_v29 }
 0x423   : > { %v4076_v30 = vpop.eup %4075 }
 0x424   : > { %v4078_v31 = vpop.eup %4077  ;;  %v981_v32 = vadd.f32 1.0, %v4076_v30 }
 0x425   : > { %v980_v33 = vadd.f32 1.0, %v4078_v31 }
 0x426   : > { %4079 = vlog2.f32 %v981_v32  ;;  %v1893_v32 = vld [vmem:[%s5407_s11 + $0x60] sm:$0xff] }
 0x427   : > { %4081 = vlog2.f32 %v980_v33 }
 0x430   : > { %v4080_v34 = vpop.eup %4079 }
 0x431   : > { %v4082_v35 = vpop.eup %4081  ;;  %v985_v36 = vmul.f32 0.6931472, %v4080_v34  ;;  %v1894_v34 = vld [vmem:[%s5407_s11 + $0x68] sm:$0xff] }
 0x432   : > { %v983_v37 = vmul.f32 0.6931472, %v4082_v35 }
 0x433   : > { %v987_v38 = vsel %vm973_vm6, %v969_v23, %v985_v36 }
 0x434   : > { %989 = vst.msk [vmem:[#allocation4 + $0x8] sm:$0xff] %vm716_vm2, %v987_v38  ;;  %v986_v39 = vsel %vm972_vm7, %v964_v25, %v983_v37  ;;  %v1895_v38 = vld [vmem:[%s5407_s11 + $0x70] sm:$0xff] }
 0x435   : > { %988 = vst.msk [vmem:[#allocation4] sm:$0xff] %vm716_vm2, %v986_v39 }
 0x43b   : > { %v1008_v42 = vld [vmem:[#allocation4 + $0x8] sm:$0xff] }
 0x43c   : > { %v1007_v44 = vld [vmem:[#allocation4] sm:$0xff]  ;;  %v1012_v46 = vmul.f32 %v1010_v43, %v1008_v42 }
 0x43d   : > { %v3978_v47 = vpack.c.bf16 %v1008_v42, %v1007_v44  ;;  %v1011_v48 = vmul.f32 %v1009_v45, %v1007_v44  ;;  %v1897_v44 = vld [vmem:[%s5407_s11 + $0x80] sm:$0xff] }
 0x43f   : > { %3979 = vmatprep.subr.bf16.mxu0 %v3978_v47  ;;  %v3990_v50 = vpack.c.bf16 %v1012_v46, %v1011_v48  ;;  %v1898_v46 = vld [vmem:[%s5407_s11 + $0x88] sm:$0xff] }
 0x440   : > { %3981 = vmatpush3.bf16.msra.mxu0 %v3978_v47 }
 0x441   : > { %3991 = vmatprep.subr.bf16.mxu1 %v3990_v50  ;;  %3987 = vmatprep.subr.bf16.mxu0 %v3986_v49 }
 0x442   : > { %3993 = vmatpush3.bf16.msra.mxu1 %v3990_v50  ;;  %v1899_v50 = vld [vmem:[%s5407_s11 + $0x90] sm:$0xff] }
 0x443   : > { %3747 = vmatmul.mubr.msk.f32.vlgmr.msra.gmra.mrb[2].mxu0 %vm996_vm5, %v4526_v53 }
 0x444   : > { %3749 = vmatprep.mubr.msk.f32.mxu0 %vm996_vm5, %v4531_v54  ;;  %3989 = vmatpush3.bf16.msra.mxu0 %v3986_v49  ;;  %v3994_v54 = vpack.c.bf16 %v2923_v52, %v2921_v51  ;;  %v1900_v52 = vld [vmem:[%s5407_s11 + $0x98] sm:$0xff] }
 0x446   : > { %3995 = vmatprep.subr.bf16.mxu0 %v3994_v54 }
 0x447   : > { %3750 = vmatmul.mubr.msk.f32.gmra.mrb[4].mxu0 %vm996_vm5, %v4540_v55 }
 0x448   : > { %3752 = vmatprep.mubr.msk.f32.mxu0 %vm996_vm5, %v4545_v56  ;;  %v1881_v56 = vld [vmem:[%s5407_s11] sm:$0xff] }
 0x44b   : > { %3753 = vmatmul.mubr.msk.f32.gmra.mrb[6].mxu0 %vm996_vm5, %v4554_v57  ;;  %v2920_v57 = vld [vmem:[%s5409_s13] sm:$0xff] }
 0x44c   : > { %3755 = vmatprep.mubr.msk.f32.mxu0 %vm996_vm5, %v4559_v58  ;;  %v2922_v58 = vld [vmem:[%s5409_s13 + $0x10] sm:$0xff] }
 0x44f   : > { %3756 = vmatmul.mubr.msk.f32.gmra.mrb[8].mxu0 %vm996_vm5, %v4568_v59 }
 0x450   : > { %3758 = vmatprep.mubr.msk.f32.mxu0 %vm996_vm5, %v4573_v60  ;;  %v1882_v60 = vld [vmem:[%s5407_s11 + $0x8] sm:$0xff] }
 0x453   : > { %3759 = vmatmul.mubr.msk.f32.gmra.mrb[10].mxu0 %vm996_vm5, %v4582_v61 }
 0x454   : > { %3761 = vmatprep.mubr.msk.f32.mxu0 %vm996_vm5, %v4587_v62 }
 0x457   : > { %3762 = vmatmul.mubr.msk.f32.gmra.mrb[12].mxu0 %vm996_vm5, %v4596_v63  ;;  %v3996_v63 = vpack.c.bf16 %v2922_v58, %v2920_v57  ;;  %v1901_v58 = vld [vmem:[%s5407_s11 + $0xa0] sm:$0xff] }
 0x458   : > { %3764 = vmatprep.mubr.msk.f32.mxu0 %vm996_vm5, %v4601_v0 }
 0x45b   : > { %3765 = vmatmul.mubr.msk.f32.gmra.mrb[14].mxu0 %vm996_vm5, %v4610_v1  ;;  %v1883_v1 = vld [vmem:[%s5407_s11 + $0x10] sm:$0xff] }
 0x45c   : > { %3767 = vmatprep.mubr.msk.f32.mxu0 %vm996_vm5, %v4615_v2 }
 0x45f   : > { %3768 = vmatmul.mubr.msk.f32.gmra.mrb[16].mxu0 %vm996_vm5, %v4624_v3  ;;  %v1884_v3 = vld [vmem:[%s5407_s11 + $0x18] sm:$0xff] }
 0x460   : > { %3770 = vmatprep.mubr.msk.f32.mxu0 %vm996_vm5, %v4629_v4 }
 0x463   : > { %3771 = vmatmul.mubr.msk.f32.gmra.mrb[18].mxu0 %vm996_vm5, %v4638_v5 }
 0x464   : > { %3773 = vmatprep.mubr.msk.f32.mxu0 %vm996_vm5, %v4643_v6 }
 0x467   : > { %3774 = vmatmul.mubr.msk.f32.gmra.mrb[20].mxu0 %vm996_vm5, %v4652_v7  ;;  %v1885_v7 = vld [vmem:[%s5407_s11 + $0x20] sm:$0xff] }
 0x468   : > { %3776 = vmatprep.mubr.msk.f32.mxu0 %vm996_vm5, %v4657_v8 }
 0x46b   : > { %3777 = vmatmul.mubr.msk.f32.gmra.mrb[22].mxu0 %vm996_vm5, %v4666_v9  ;;  %v1886_v9 = vld [vmem:[%s5407_s11 + $0x28] sm:$0xff] }
 0x46c   : > { %3779 = vmatprep.mubr.msk.f32.mxu0 %vm996_vm5, %v4671_v10 }
 0x46f   : > { %3780 = vmatmul.mubr.msk.f32.gmra.mrb[24].mxu0 %vm996_vm5, %v4680_v11 }
 0x470   : > { %3782 = vmatprep.mubr.msk.f32.mxu0 %vm996_vm5, %v4685_v12 }
 0x473   : > { %3783 = vmatmul.mubr.msk.f32.gmra.mrb[26].mxu0 %vm996_vm5, %v4694_v13  ;;  %v1887_v13 = vld [vmem:[%s5407_s11 + $0x30] sm:$0xff] }
 0x474   : > { %3785 = vmatprep.mubr.msk.f32.mxu0 %vm996_vm5, %v4699_v14 }
 0x477   : > { %3786 = vmatmul.mubr.msk.f32.gmra.mrb[28].mxu0 %vm996_vm5, %v4708_v16  ;;  %v1888_v16 = vld [vmem:[%s5407_s11 + $0x38] sm:$0xff] }
 0x478   : > { %3788 = vmatprep.mubr.msk.f32.mxu0 %vm996_vm5, %v4713_v17 }
 0x47b   : > { %3789 = vmatmul.mubr.msk.f32.gmra.mrb[30].mxu0 %vm996_vm5, %v4722_v18 }
 0x47c   : > { %3791 = vmatprep.mubr.msk.f32.mxu0 %vm996_vm5, %v4727_v19 }
 0x47f   : > { %3792 = vmatmul.mubr.msk.f32.gmra.mrb[32].mxu0 %vm996_vm5, %v4736_v20  ;;  %v1889_v20 = vld [vmem:[%s5407_s11 + $0x40] sm:$0xff] }
 0x492   : > { %v3800_v59 = vpop.f32.mrb[6].mxu1 }
 0x493   : > { %v1722_v61 = vpop.f32.mrb[7].mxu1  ;;  %v1914_v0 = vmul.f32 %v3800_v59, %v1882_v60  ;;  %v1902_v60 = vld [vmem:[%s5407_s11 + $0xa8] sm:$0xff] }
 0x494   : > { %v1913_v62 = vmul.f32 %v1881_v56, %v1722_v61 }
 0x496   : > { %v3803_v2 = vpop.f32.mrb[8].mxu1  ;;  %3850 = vmatprep.mubr.msk.f32.mxu0 %vm996_vm5, %v1913_v62 }
 0x497   : > { %v1732_v4 = vpop.f32.mrb[9].mxu1  ;;  %3851 = vmatmul.mubr.msk.f32.vlgmr.msra.gmra.mrb[34].mxu0 %vm996_vm5, %v1914_v0  ;;  %v1916_v6 = vmul.f32 %v3803_v2, %v1884_v3  ;;  %v1903_v0 = vld [vmem:[%s5407_s11 + $0xb0] sm:$0xff]  ;;  %v1904_v2 = vld [vmem:[%s5407_s11 + $0xb8] sm:$0xff] }
 0x498   : > { %v1915_v5 = vmul.f32 %v1883_v1, %v1732_v4  ;;  %3997 = vmatpush1.bf16.msra.mxu0 %v3996_v63 }
 0x499   : > { %3950 = vmatprep.subr.bf16.mxu0 %v4273_v15 }
 0x49a   : > { %v3806_v8 = vpop.f32.mrb[10].mxu1  ;;  %3853 = vmatprep.mubr.msk.f32.mxu0 %vm996_vm5, %v1915_v5 }
 0x49b   : > { %v1742_v10 = vpop.f32.mrb[11].mxu1  ;;  %3854 = vmatmul.mubr.msk.f32.gmra.mrb[36].mxu0 %vm996_vm5, %v1916_v6  ;;  %v1918_v12 = vmul.f32 %v3806_v8, %v1886_v9  ;;  %v1905_v6 = vld [vmem:[%s5407_s11 + $0xc0] sm:$0xff]  ;;  %v1906_v8 = vld [vmem:[%s5407_s11 + $0xc8] sm:$0xff] }
 0x49c   : > { %v1917_v11 = vmul.f32 %v1885_v7, %v1742_v10 }
 0x49e   : > { %v3809_v14 = vpop.f32.mrb[12].mxu1  ;;  %3856 = vmatprep.mubr.msk.f32.mxu0 %vm996_vm5, %v1917_v11 }
 0x49f   : > { %v1752_v17 = vpop.f32.mrb[13].mxu1  ;;  %3857 = vmatmul.mubr.msk.f32.gmra.mrb[38].mxu0 %vm996_vm5, %v1918_v12  ;;  %v1920_v19 = vmul.f32 %v3809_v14, %v1888_v16  ;;  %v1907_v12 = vld [vmem:[%s5407_s11 + $0xd0] sm:$0xff]  ;;  %v1908_v14 = vld [vmem:[%s5407_s11 + $0xd8] sm:$0xff] }
 0x4a0   : > { %v1919_v18 = vmul.f32 %v1887_v13, %v1752_v17 }
 0x4a2   : > { %v3812_v21 = vpop.f32.mrb[14].mxu1  ;;  %3859 = vmatprep.mubr.msk.f32.mxu0 %vm996_vm5, %v1919_v18 }
 0x4a3   : > { %v1762_v23 = vpop.f32.mrb[15].mxu1  ;;  %3860 = vmatmul.mubr.msk.f32.gmra.mrb[40].mxu0 %vm996_vm5, %v1920_v19  ;;  %v1922_v25 = vmul.f32 %v3812_v21, %v1890_v22  ;;  %v1909_v19 = vld [vmem:[%s5407_s11 + $0xe0] sm:$0xff]  ;;  %v1910_v21 = vld [vmem:[%s5407_s11 + $0xe8] sm:$0xff] }
 0x4a4   : > { %v1921_v24 = vmul.f32 %v1889_v20, %v1762_v23 }
 0x4a6   : > { %v3815_v27 = vpop.f32.mrb[16].mxu1  ;;  %3862 = vmatprep.mubr.msk.f32.mxu0 %vm996_vm5, %v1921_v24 }
 0x4a7   : > { %v1772_v29 = vpop.f32.mrb[17].mxu1  ;;  %3863 = vmatmul.mubr.msk.f32.gmra.mrb[42].mxu0 %vm996_vm5, %v1922_v25  ;;  %v1924_v31 = vmul.f32 %v3815_v27, %v1892_v28  ;;  %v1911_v25 = vld [vmem:[%s5407_s11 + $0xf0] sm:$0xff]  ;;  %v1912_v27 = vld [vmem:[%s5407_s11 + $0xf8] sm:$0xff] }
 0x4a8   : > { %v1923_v30 = vmul.f32 %v1891_v26, %v1772_v29 }
 0x4aa   : > { %v3818_v33 = vpop.f32.mrb[18].mxu1  ;;  %3865 = vmatprep.mubr.msk.f32.mxu0 %vm996_vm5, %v1923_v30 }
 0x4ab   : > { %v1782_v35 = vpop.f32.mrb[19].mxu1  ;;  %3866 = vmatmul.mubr.msk.f32.gmra.mrb[44].mxu0 %vm996_vm5, %v1924_v31  ;;  %v1926_v37 = vmul.f32 %v3818_v33, %v1894_v34  ;;  %v2918_v31 = vld [vmem:[#allocation6] sm:$0xff]  ;;  %v1368_v34 = vld [vmem:[%s5405_s9] sm:$0xff] }
 0x4ac   : > { %v1925_v36 = vmul.f32 %v1893_v32, %v1782_v35  ;;  %v2919_v32 = vld [vmem:[#allocation6 + $0x8] sm:$0xff]  ;;  %v1369_v33 = vld [vmem:[%s5405_s9 + $0x8] sm:$0xff] }
 0x4ae   : > { %v3821_v39 = vpop.f32.mrb[20].mxu1  ;;  %3868 = vmatprep.mubr.msk.f32.mxu0 %vm996_vm5, %v1925_v36 }
 0x4af   : > { %v1792_v41 = vpop.f32.mrb[21].mxu1  ;;  %3869 = vmatmul.mubr.msk.f32.gmra.mrb[46].mxu0 %vm996_vm5, %v1926_v37  ;;  %v1928_v43 = vmul.f32 %v3821_v39, %v1896_v40  ;;  %v1371_v39 = vld [vmem:[%s5405_s9 + $0x18] sm:$0xff] }
 0x4b0   : > { %v1927_v42 = vmul.f32 %v1895_v38, %v1792_v41  ;;  %v1370_v41 = vld [vmem:[%s5405_s9 + $0x10] sm:$0xff] }
 0x4b2   : > { %v3824_v45 = vpop.f32.mrb[22].mxu1  ;;  %3871 = vmatprep.mubr.msk.f32.mxu0 %vm996_vm5, %v1927_v42 }
 0x4b3   : > { %v1802_v47 = vpop.f32.mrb[23].mxu1  ;;  %3872 = vmatmul.mubr.msk.f32.gmra.mrb[48].mxu0 %vm996_vm5, %v1928_v43  ;;  %v1930_v49 = vmul.f32 %v3824_v45, %v1898_v46 }
 0x4b4   : > { %v1929_v48 = vmul.f32 %v1897_v44, %v1802_v47  ;;  %v1373_v47 = vld [vmem:[%s5405_s9 + $0x28] sm:$0xff] }
 0x4b6   : > { %v3827_v51 = vpop.f32.mrb[24].mxu1  ;;  %3874 = vmatprep.mubr.msk.f32.mxu0 %vm996_vm5, %v1929_v48 }
 0x4b7   : > { %v1812_v54 = vpop.f32.mrb[25].mxu1  ;;  %3875 = vmatmul.mubr.msk.f32.gmra.mrb[50].mxu0 %vm996_vm5, %v1930_v49  ;;  %v1932_v57 = vmul.f32 %v3827_v51, %v1900_v52  ;;  %v1372_v49 = vld [vmem:[%s5405_s9 + $0x20] sm:$0xff] }
 0x4b8   : > { %v1931_v56 = vmul.f32 %v1899_v50, %v1812_v54 }
 0x4ba   : > { %v3830_v59 = vpop.f32.mrb[26].mxu1  ;;  %3877 = vmatprep.mubr.msk.f32.mxu0 %vm996_vm5, %v1931_v56 }
 0x4bb   : > { %v1822_v61 = vpop.f32.mrb[27].mxu1  ;;  %3878 = vmatmul.mubr.msk.f32.gmra.mrb[52].mxu0 %vm996_vm5, %v1932_v57  ;;  %v1934_v63 = vmul.f32 %v3830_v59, %v1902_v60  ;;  %v1375_v57 = vld [vmem:[%s5405_s9 + $0x38] sm:$0xff]  ;;  %v1374_v59 = vld [vmem:[%s5405_s9 + $0x30] sm:$0xff] }
 0x4bc   : > { %v1933_v62 = vmul.f32 %v1901_v58, %v1822_v61 }
 0x4be   : > { %v3833_v1 = vpop.f32.mrb[28].mxu1  ;;  %3880 = vmatprep.mubr.msk.f32.mxu0 %vm996_vm5, %v1933_v62 }
 0x4bf   : > { %v1832_v3 = vpop.f32.mrb[29].mxu1  ;;  %3881 = vmatmul.mubr.msk.f32.gmra.mrb[54].mxu0 %vm996_vm5, %v1934_v63  ;;  %v1936_v5 = vmul.f32 %v3833_v1, %v1904_v2  ;;  %v1377_v1 = vld [vmem:[%s5405_s9 + $0x48] sm:$0xff] }
 0x4c0   : > { %v1935_v4 = vmul.f32 %v1903_v0, %v1832_v3 }
 0x4c2   : > { %v3836_v7 = vpop.f32.mrb[30].mxu1  ;;  %3883 = vmatprep.mubr.msk.f32.mxu0 %vm996_vm5, %v1935_v4  ;;  %v1376_v4 = vld [vmem:[%s5405_s9 + $0x40] sm:$0xff] }
 0x4c3   : > { %v1842_v9 = vpop.f32.mrb[31].mxu1  ;;  %3884 = vmatmul.mubr.msk.f32.gmra.mrb[56].mxu0 %vm996_vm5, %v1936_v5  ;;  %v1938_v11 = vmul.f32 %v3836_v7, %v1906_v8 }
 0x4c4   : > { %v1937_v10 = vmul.f32 %v1905_v6, %v1842_v9 }
 0x4c6   : > { %v3839_v13 = vpop.f32.mrb[32].mxu1  ;;  %3886 = vmatprep.mubr.msk.f32.mxu0 %vm996_vm5, %v1937_v10 }
 0x4c7   : > { %v1852_v16 = vpop.f32.mrb[33].mxu1  ;;  %3887 = vmatmul.mubr.msk.f32.gmra.mrb[58].mxu0 %vm996_vm5, %v1938_v11  ;;  %v1940_v18 = vmul.f32 %v3839_v13, %v1908_v14  ;;  %v1379_v11 = vld [vmem:[%s5405_s9 + $0x58] sm:$0xff]  ;;  %v1378_v14 = vld [vmem:[%s5405_s9 + $0x50] sm:$0xff] }
 0x4c8   : > { %v1939_v17 = vmul.f32 %v1907_v12, %v1852_v16 }
 0x4ca   : > { %v3842_v20 = vpop.f32.mrb[34].mxu1  ;;  %3889 = vmatprep.mubr.msk.f32.mxu0 %vm996_vm5, %v1939_v17 }
 0x4cb   : > { %v1862_v22 = vpop.f32.mrb[35].mxu1  ;;  %3890 = vmatmul.mubr.msk.f32.gmra.mrb[60].mxu0 %vm996_vm5, %v1940_v18  ;;  %v1942_v24 = vmul.f32 %v3842_v20, %v1910_v21 }
 0x4cc   : > { %v1941_v23 = vmul.f32 %v1909_v19, %v1862_v22  ;;  %v1381_v22 = vld [vmem:[%s5405_s9 + $0x68] sm:$0xff] }
 0x4ce   : > { %v3845_v26 = vpop.f32.mrb[36].mxu1  ;;  %3892 = vmatprep.mubr.msk.f32.mxu0 %vm996_vm5, %v1941_v23 }
 0x4cf   : > { %v1872_v28 = vpop.f32.mrb[37].mxu1  ;;  %3893 = vmatmul.mubr.msk.f32.gmra.mrb[62].mxu0 %vm996_vm5, %v1942_v24  ;;  %v1944_v30 = vmul.f32 %v3845_v26, %v1912_v27 }
 0x4d0   : > { %v1943_v29 = vmul.f32 %v1911_v25, %v1872_v28  ;;  %v1380_v25 = vld [vmem:[%s5405_s9 + $0x60] sm:$0xff] }
 0x4d2   : > { %3895 = vmatprep.mubr.msk.f32.mxu0 %vm996_vm5, %v1943_v29 }
 0x4d3   : > { %3896 = vmatmul.mubr.msk.f32.gmra.mrb[64].mxu0 %vm996_vm5, %v1944_v30 }
 0x4d4   : > { %2994 = vmatprep.mubr.f32.mxu0 %v4273_v15 }
 0x4d7   : > { %3512 = vmatmul.mubr.msk.f32.vlgmr.msra.gmra.mrb[66].mxu0 %vm996_vm5, %v2918_v31 }
 0x4d8   : > { %3000 = vmatprep.mubr.f32.mxu0 %v4273_v15 }
 0x4db   : > { %3513 = vmatmul.mubr.msk.f32.gmra.mrb[68].mxu0 %vm996_vm5, %v2919_v32  ;;  %v1383_v32 = vld [vmem:[%s5405_s9 + $0x78] sm:$0xff] }
 0x4dc   : > { %3958 = vmatprep.mubr.msk.bf16.mxu0 %vm4274_vm1, %v4273_v15 }
 0x516   : > { %v3748_v35 = vpop.f32.mrb[2].mxu0 }
 0x517   : > { %v1401_v36 = vmul.f32 %v3748_v35, %v1369_v33  ;;  %v1209_v37 = vpop.f32.mrb[3].mxu0  ;;  %v1382_v35 = vld [vmem:[%s5405_s9 + $0x70] sm:$0xff] }
 0x518   : > { %v1400_v38 = vmul.f32 %v1368_v34, %v1209_v37 }
 0x519   : > { %v1434_v40 = vmul.f32 1.442695, %v1401_v36 }
 0x51a   : > { %v1432_v42 = vmul.f32 1.442695, %v1400_v38  ;;  %v3751_v43 = vpop.f32.mrb[4].mxu0 }
 0x51b   : > { %4083 = vpow2.f32 %v1434_v40  ;;  %v1403_v44 = vmul.f32 %v3751_v43, %v1371_v39  ;;  %v1219_v45 = vpop.f32.mrb[5].mxu0 }
 0x51c   : > { %4085 = vpow2.f32 %v1432_v42  ;;  %v1402_v46 = vmul.f32 %v1370_v41, %v1219_v45  ;;  %v1385_v42 = vld [vmem:[%s5405_s9 + $0x88] sm:$0xff]  ;;  %v1384_v45 = vld [vmem:[%s5405_s9 + $0x80] sm:$0xff] }
 0x51d   : > { %v1438_v48 = vmul.f32 1.442695, %v1403_v44 }
 0x51e   : > { %v1436_v50 = vmul.f32 1.442695, %v1402_v46  ;;  %v3754_v51 = vpop.f32.mrb[6].mxu0 }
 0x51f   : > { %4087 = vpow2.f32 %v1438_v48  ;;  %v1405_v52 = vmul.f32 %v3754_v51, %v1373_v47  ;;  %v1229_v54 = vpop.f32.mrb[7].mxu0 }
 0x520   : > { %4089 = vpow2.f32 %v1436_v50  ;;  %v1404_v56 = vmul.f32 %v1372_v49, %v1229_v54 }
 0x521   : > { %v1442_v58 = vmul.f32 1.442695, %v1405_v52  ;;  %v1387_v52 = vld [vmem:[%s5405_s9 + $0x98] sm:$0xff] }
 0x522   : > { %v1440_v60 = vmul.f32 1.442695, %v1404_v56  ;;  %v3757_v61 = vpop.f32.mrb[8].mxu0 }
 0x523   : > { %4091 = vpow2.f32 %v1442_v58  ;;  %v1407_v62 = vmul.f32 %v3757_v61, %v1375_v57  ;;  %v1239_v63 = vpop.f32.mrb[9].mxu0  ;;  %v1386_v57 = vld [vmem:[%s5405_s9 + $0x90] sm:$0xff] }
 0x524   : > { %4093 = vpow2.f32 %v1440_v60  ;;  %v1406_v0 = vmul.f32 %v1374_v59, %v1239_v63 }
 0x525   : > { %v4084_v2 = vpop.eup %4083  ;;  %v1446_v3 = vmul.f32 1.442695, %v1407_v62 }
 0x526   : > { %v4086_v5 = vpop.eup %4085  ;;  %1497 = vst.msk [vmem:[#allocation9 + $0x8] sm:$0xff] %vm716_vm2, %v4084_v2  ;;  %v1444_v6 = vmul.f32 1.442695, %v1406_v0  ;;  %v3760_v7 = vpop.f32.mrb[10].mxu0  ;;  %v1389_v0 = vld [vmem:[%s5405_s9 + $0xa8] sm:$0xff] }
 0x527   : > { %1496 = vst.msk [vmem:[#allocation9] sm:$0xff] %vm716_vm2, %v4086_v5  ;;  %4095 = vpow2.f32 %v1446_v3  ;;  %v1409_v8 = vmul.f32 %v3760_v7, %v1377_v1  ;;  %v1249_v9 = vpop.f32.mrb[11].mxu0  ;;  %v1388_v3 = vld [vmem:[%s5405_s9 + $0xa0] sm:$0xff] }
 0x528   : > { %4097 = vpow2.f32 %v1444_v6  ;;  %v1408_v10 = vmul.f32 %v1376_v4, %v1249_v9 }
 0x529   : > { %v4088_v12 = vpop.eup %4087  ;;  %v1450_v13 = vmul.f32 1.442695, %v1409_v8 }
 0x52a   : > { %v4090_v16 = vpop.eup %4089  ;;  %1499 = vst.msk [vmem:[#allocation9 + $0x18] sm:$0xff] %vm716_vm2, %v4088_v12  ;;  %v1448_v17 = vmul.f32 1.442695, %v1408_v10  ;;  %v3763_v18 = vpop.f32.mrb[12].mxu0  ;;  %v1391_v10 = vld [vmem:[%s5405_s9 + $0xb8] sm:$0xff] }
 0x52b   : > { %1498 = vst.msk [vmem:[#allocation9 + $0x10] sm:$0xff] %vm716_vm2, %v4090_v16  ;;  %4099 = vpow2.f32 %v1450_v13  ;;  %v1411_v19 = vmul.f32 %v3763_v18, %v1379_v11  ;;  %v1259_v20 = vpop.f32.mrb[13].mxu0  ;;  %v1390_v13 = vld [vmem:[%s5405_s9 + $0xb0] sm:$0xff] }
 0x52c   : > { %4101 = vpow2.f32 %v1448_v17  ;;  %v1410_v21 = vmul.f32 %v1378_v14, %v1259_v20 }
 0x52d   : > { %v4092_v23 = vpop.eup %4091  ;;  %v1454_v24 = vmul.f32 1.442695, %v1411_v19 }
 0x52e   : > { %v4094_v26 = vpop.eup %4093  ;;  %1501 = vst.msk [vmem:[#allocation9 + $0x28] sm:$0xff] %vm716_vm2, %v4092_v23  ;;  %v1452_v27 = vmul.f32 1.442695, %v1410_v21  ;;  %v3766_v28 = vpop.f32.mrb[14].mxu0  ;;  %v1393_v21 = vld [vmem:[%s5405_s9 + $0xc8] sm:$0xff] }
 0x52f   : > { %1500 = vst.msk [vmem:[#allocation9 + $0x20] sm:$0xff] %vm716_vm2, %v4094_v26  ;;  %4103 = vpow2.f32 %v1454_v24  ;;  %v1413_v29 = vmul.f32 %v3766_v28, %v1381_v22  ;;  %v1269_v30 = vpop.f32.mrb[15].mxu0  ;;  %v1392_v24 = vld [vmem:[%s5405_s9 + $0xc0] sm:$0xff] }
 0x530   : > { %4105 = vpow2.f32 %v1452_v27  ;;  %v1412_v31 = vmul.f32 %v1380_v25, %v1269_v30 }
 0x531   : > { %v4096_v33 = vpop.eup %4095  ;;  %v1458_v34 = vmul.f32 1.442695, %v1413_v29 }
 0x532   : > { %v4098_v36 = vpop.eup %4097  ;;  %1503 = vst.msk [vmem:[#allocation9 + $0x38] sm:$0xff] %vm716_vm2, %v4096_v33  ;;  %v1456_v37 = vmul.f32 1.442695, %v1412_v31  ;;  %v3769_v38 = vpop.f32.mrb[16].mxu0  ;;  %v1395_v31 = vld [vmem:[%s5405_s9 + $0xd8] sm:$0xff] }
 0x533   : > { %1502 = vst.msk [vmem:[#allocation9 + $0x30] sm:$0xff] %vm716_vm2, %v4098_v36  ;;  %4107 = vpow2.f32 %v1458_v34  ;;  %v1415_v39 = vmul.f32 %v3769_v38, %v1383_v32  ;;  %v1279_v40 = vpop.f32.mrb[17].mxu0  ;;  %v1394_v34 = vld [vmem:[%s5405_s9 + $0xd0] sm:$0xff] }
 0x534   : > { %4109 = vpow2.f32 %v1456_v37  ;;  %v1414_v41 = vmul.f32 %v1382_v35, %v1279_v40 }
 0x535   : > { %v4100_v43 = vpop.eup %4099  ;;  %v1462_v44 = vmul.f32 1.442695, %v1415_v39 }
 0x536   : > { %v4102_v46 = vpop.eup %4101  ;;  %1505 = vst.msk [vmem:[#allocation9 + $0x48] sm:$0xff] %vm716_vm2, %v4100_v43  ;;  %v1460_v47 = vmul.f32 1.442695, %v1414_v41  ;;  %v3772_v48 = vpop.f32.mrb[18].mxu0  ;;  %v1397_v41 = vld [vmem:[%s5405_s9 + $0xe8] sm:$0xff] }
 0x537   : > { %1504 = vst.msk [vmem:[#allocation9 + $0x40] sm:$0xff] %vm716_vm2, %v4102_v46  ;;  %4111 = vpow2.f32 %v1462_v44  ;;  %v1417_v49 = vmul.f32 %v3772_v48, %v1385_v42  ;;  %v1289_v50 = vpop.f32.mrb[19].mxu0  ;;  %v1396_v44 = vld [vmem:[%s5405_s9 + $0xe0] sm:$0xff] }
 0x538   : > { %4113 = vpow2.f32 %v1460_v47  ;;  %v1416_v51 = vmul.f32 %v1384_v45, %v1289_v50 }
 0x539   : > { %v4104_v54 = vpop.eup %4103  ;;  %v1466_v56 = vmul.f32 1.442695, %v1417_v49 }
 0x53a   : > { %v4106_v58 = vpop.eup %4105  ;;  %1507 = vst.msk [vmem:[#allocation9 + $0x58] sm:$0xff] %vm716_vm2, %v4104_v54  ;;  %v1464_v59 = vmul.f32 1.442695, %v1416_v51  ;;  %v3775_v60 = vpop.f32.mrb[20].mxu0  ;;  %v1399_v51 = vld [vmem:[%s5405_s9 + $0xf8] sm:$0xff] }
 0x53b   : > { %1506 = vst.msk [vmem:[#allocation9 + $0x50] sm:$0xff] %vm716_vm2, %v4106_v58  ;;  %4115 = vpow2.f32 %v1466_v56  ;;  %v1419_v61 = vmul.f32 %v3775_v60, %v1387_v52  ;;  %v1299_v62 = vpop.f32.mrb[21].mxu0  ;;  %v1398_v56 = vld [vmem:[%s5405_s9 + $0xf0] sm:$0xff] }
 0x53c   : > { %4117 = vpow2.f32 %v1464_v59  ;;  %v1418_v63 = vmul.f32 %v1386_v57, %v1299_v62 }
 0x53d   : > { %v4108_v1 = vpop.eup %4107  ;;  %v1470_v2 = vmul.f32 1.442695, %v1419_v61 }
 0x53e   : > { %v4110_v4 = vpop.eup %4109  ;;  %1509 = vst.msk [vmem:[#allocation9 + $0x68] sm:$0xff] %vm716_vm2, %v4108_v1  ;;  %v1468_v5 = vmul.f32 1.442695, %v1418_v63  ;;  %v3778_v6 = vpop.f32.mrb[22].mxu0 }
 0x53f   : > { %1508 = vst.msk [vmem:[#allocation9 + $0x60] sm:$0xff] %vm716_vm2, %v4110_v4  ;;  %4119 = vpow2.f32 %v1470_v2  ;;  %v1421_v7 = vmul.f32 %v3778_v6, %v1389_v0  ;;  %v1309_v8 = vpop.f32.mrb[23].mxu0 }
 0x540   : > { %4121 = vpow2.f32 %v1468_v5  ;;  %v1420_v9 = vmul.f32 %v1388_v3, %v1309_v8 }
 0x541   : > { %v4112_v11 = vpop.eup %4111  ;;  %v1474_v12 = vmul.f32 1.442695, %v1421_v7 }
 0x542   : > { %v4114_v14 = vpop.eup %4113  ;;  %1511 = vst.msk [vmem:[#allocation9 + $0x78] sm:$0xff] %vm716_vm2, %v4112_v11  ;;  %v1472_v16 = vmul.f32 1.442695, %v1420_v9  ;;  %v3781_v17 = vpop.f32.mrb[24].mxu0  ;;  %v4147_v11 = vld [vmem:[%s5406_s10] sm:$0xff] }
 0x543   : > { %1510 = vst.msk [vmem:[#allocation9 + $0x70] sm:$0xff] %vm716_vm2, %v4114_v14  ;;  %4123 = vpow2.f32 %v1474_v12  ;;  %v1423_v18 = vmul.f32 %v3781_v17, %v1391_v10  ;;  %v1319_v19 = vpop.f32.mrb[25].mxu0  ;;  %v4148_v17 = vld [vmem:[%s5406_s10 + $0x10] sm:$0xff] }
 0x544   : > { %4125 = vpow2.f32 %v1472_v16  ;;  %v1422_v20 = vmul.f32 %v1390_v13, %v1319_v19 }
 0x545   : > { %v4116_v22 = vpop.eup %4115  ;;  %v1478_v23 = vmul.f32 1.442695, %v1423_v18 }
 0x546   : > { %v4118_v25 = vpop.eup %4117  ;;  %1513 = vst.msk [vmem:[#allocation9 + $0x88] sm:$0xff] %vm716_vm2, %v4116_v22  ;;  %v1476_v26 = vmul.f32 1.442695, %v1422_v20  ;;  %v3784_v27 = vpop.f32.mrb[26].mxu0 }
 0x547   : > { %1512 = vst.msk [vmem:[#allocation9 + $0x80] sm:$0xff] %vm716_vm2, %v4118_v25  ;;  %4127 = vpow2.f32 %v1478_v23  ;;  %v1425_v28 = vmul.f32 %v3784_v27, %v1393_v21  ;;  %v1329_v29 = vpop.f32.mrb[27].mxu0  ;;  %v4150_v23 = vld [vmem:[%s5406_s10 + $0x28] sm:$0xff] }
 0x548   : > { %4129 = vpow2.f32 %v1476_v26  ;;  %v1424_v30 = vmul.f32 %v1392_v24, %v1329_v29  ;;  %v4151_v26 = vld [vmem:[%s5406_s10 + $0x30] sm:$0xff] }
 0x549   : > { %v4120_v32 = vpop.eup %4119  ;;  %v1482_v33 = vmul.f32 1.442695, %v1425_v28  ;;  %v4152_v28 = vld [vmem:[%s5406_s10 + $0x38] sm:$0xff] }
 0x54a   : > { %v4122_v35 = vpop.eup %4121  ;;  %1515 = vst.msk [vmem:[#allocation9 + $0x98] sm:$0xff] %vm716_vm2, %v4120_v32  ;;  %v1480_v36 = vmul.f32 1.442695, %v1424_v30  ;;  %v3787_v37 = vpop.f32.mrb[28].mxu0  ;;  %v4153_v32 = vld [vmem:[%s5406_s10 + $0x40] sm:$0xff] }
 0x54b   : > { %1514 = vst.msk [vmem:[#allocation9 + $0x90] sm:$0xff] %vm716_vm2, %v4122_v35  ;;  %4131 = vpow2.f32 %v1482_v33  ;;  %v1427_v38 = vmul.f32 %v3787_v37, %v1395_v31  ;;  %v1339_v39 = vpop.f32.mrb[29].mxu0 }
 0x54c   : > { %4133 = vpow2.f32 %v1480_v36  ;;  %v1426_v40 = vmul.f32 %v1394_v34, %v1339_v39  ;;  %v4154_v34 = vld [vmem:[%s5406_s10 + $0x48] sm:$0xff] }
 0x54d   : > { %v4124_v42 = vpop.eup %4123  ;;  %v1486_v43 = vmul.f32 1.442695, %v1427_v38  ;;  %v4155_v38 = vld [vmem:[%s5406_s10 + $0x50] sm:$0xff] }
 0x54e   : > { %v4126_v45 = vpop.eup %4125  ;;  %1517 = vst.msk [vmem:[#allocation9 + $0xa8] sm:$0xff] %vm716_vm2, %v4124_v42  ;;  %v1484_v46 = vmul.f32 1.442695, %v1426_v40  ;;  %v3790_v47 = vpop.f32.mrb[30].mxu0  ;;  %v4156_v40 = vld [vmem:[%s5406_s10 + $0x58] sm:$0xff] }
 0x54f   : > { %1516 = vst.msk [vmem:[#allocation9 + $0xa0] sm:$0xff] %vm716_vm2, %v4126_v45  ;;  %4135 = vpow2.f32 %v1486_v43  ;;  %v1429_v48 = vmul.f32 %v3790_v47, %v1397_v41  ;;  %v1349_v49 = vpop.f32.mrb[31].mxu0 }
 0x550   : > { %4137 = vpow2.f32 %v1484_v46  ;;  %v1428_v50 = vmul.f32 %v1396_v44, %v1349_v49  ;;  %v4157_v44 = vld [vmem:[%s5406_s10 + $0x60] sm:$0xff]  ;;  %v4158_v46 = vld [vmem:[%s5406_s10 + $0x68] sm:$0xff] }
 0x551   : > { %v4128_v52 = vpop.eup %4127  ;;  %v1490_v54 = vmul.f32 1.442695, %v1429_v48 }
 0x552   : > { %v4130_v57 = vpop.eup %4129  ;;  %1519 = vst.msk [vmem:[#allocation9 + $0xb8] sm:$0xff] %vm716_vm2, %v4128_v52  ;;  %v1488_v58 = vmul.f32 1.442695, %v1428_v50  ;;  %v3793_v59 = vpop.f32.mrb[32].mxu0  ;;  %v4159_v50 = vld [vmem:[%s5406_s10 + $0x70] sm:$0xff]  ;;  %v4160_v52 = vld [vmem:[%s5406_s10 + $0x78] sm:$0xff] }
 0x553   : > { %1518 = vst.msk [vmem:[#allocation9 + $0xb0] sm:$0xff] %vm716_vm2, %v4130_v57  ;;  %4139 = vpow2.f32 %v1490_v54  ;;  %v1431_v60 = vmul.f32 %v3793_v59, %v1399_v51  ;;  %v1359_v61 = vpop.f32.mrb[33].mxu0 }
 0x554   : > { %4141 = vpow2.f32 %v1488_v58  ;;  %v1430_v62 = vmul.f32 %v1398_v56, %v1359_v61  ;;  %v4161_v58 = vld [vmem:[%s5406_s10 + $0x80] sm:$0xff] }
 0x555   : > { %v4132_v63 = vpop.eup %4131  ;;  %v1494_v0 = vmul.f32 1.442695, %v1431_v60  ;;  %v4162_v60 = vld [vmem:[%s5406_s10 + $0x88] sm:$0xff] }
 0x556   : > { %v4134_v1 = vpop.eup %4133  ;;  %1521 = vst.msk [vmem:[#allocation9 + $0xc8] sm:$0xff] %vm716_vm2, %v4132_v63  ;;  %v1492_v2 = vmul.f32 1.442695, %v1430_v62 }
 0x557   : > { %1520 = vst.msk [vmem:[#allocation9 + $0xc0] sm:$0xff] %vm716_vm2, %v4134_v1  ;;  %4143 = vpow2.f32 %v1494_v0  ;;  %v4163_v0 = vld [vmem:[%s5406_s10 + $0x90] sm:$0xff] }
 0x558   : > { %4145 = vpow2.f32 %v1492_v2  ;;  %v4164_v2 = vld [vmem:[%s5406_s10 + $0x98] sm:$0xff] }
 0x559   : > { %v4136_v3 = vpop.eup %4135 }
 0x55a   : > { %v4138_v4 = vpop.eup %4137  ;;  %1523 = vst.msk [vmem:[#allocation9 + $0xd8] sm:$0xff] %vm716_vm2, %v4136_v3 }
 0x55b   : > { %1522 = vst.msk [vmem:[#allocation9 + $0xd0] sm:$0xff] %vm716_vm2, %v4138_v4 }
 0x55d   : > { %v4140_v5 = vpop.eup %4139 }
 0x55e   : > { %v4142_v6 = vpop.eup %4141  ;;  %1525 = vst.msk [vmem:[#allocation9 + $0xe8] sm:$0xff] %vm716_vm2, %v4140_v5 }
 0x55f   : > { %1524 = vst.msk [vmem:[#allocation9 + $0xe0] sm:$0xff] %vm716_vm2, %v4142_v6  ;;  %v4165_v6 = vld [vmem:[%s5406_s10 + $0xa0] sm:$0xff] }
 0x561   : > { %v4144_v7 = vpop.eup %4143 }
 0x562   : > { %v4146_v8 = vpop.eup %4145  ;;  %1527 = vst.msk [vmem:[#allocation9 + $0xf8] sm:$0xff] %vm716_vm2, %v4144_v7 }
 0x563   : > { %1526 = vst.msk [vmem:[#allocation9 + $0xf0] sm:$0xff] %vm716_vm2, %v4146_v8  ;;  %v4166_v8 = vld [vmem:[%s5406_s10 + $0xa8] sm:$0xff] }
 0x56a   : > { %v3852_v9 = vpop.f32.mrb[34].mxu0 }
 0x56b   : > { %v2109_v10 = vpop.f32.mrb[35].mxu0  ;;  %v2269_v13 = vmul.f32 %v3852_v9, %v4526_v53  ;;  %v4149_v53 = vld [vmem:[%s5406_s10 + $0x20] sm:$0xff] }
 0x56c   : > { %v2268_v12 = vmul.f32 %v4147_v11, %v2109_v10 }
 0x56e   : > { %v3855_v14 = vpop.f32.mrb[36].mxu0  ;;  %3902 = vmatprep.mubr.msk.f32.mxu1 %vm996_vm5, %v2268_v12  ;;  %v4167_v12 = vld [vmem:[%s5406_s10 + $0xb0] sm:$0xff] }
 0x56f   : > { %v2119_v16 = vpop.f32.mrb[37].mxu0  ;;  %3903 = vmatmul.mubr.msk.f32.vlgmr.msra.gmra.mrb[38].mxu1 %vm996_vm5, %v2269_v13  ;;  %v2271_v19 = vmul.f32 %v3855_v14, %v4540_v55  ;;  %v4168_v14 = vld [vmem:[%s5406_s10 + $0xb8] sm:$0xff] }
 0x570   : > { %v2270_v18 = vmul.f32 %v4148_v17, %v2119_v16 }
 0x572   : > { %v3858_v20 = vpop.f32.mrb[38].mxu0  ;;  %3905 = vmatprep.mubr.msk.f32.mxu1 %vm996_vm5, %v2270_v18 }
 0x573   : > { %v2129_v21 = vpop.f32.mrb[39].mxu0  ;;  %3906 = vmatmul.mubr.msk.f32.gmra.mrb[40].mxu1 %vm996_vm5, %v2271_v19  ;;  %v2273_v24 = vmul.f32 %v4150_v23, %v3858_v20  ;;  %v4169_v19 = vld [vmem:[%s5406_s10 + $0xc0] sm:$0xff] }
 0x574   : > { %v2272_v22 = vmul.f32 %v4149_v53, %v2129_v21  ;;  %v4170_v21 = vld [vmem:[%s5406_s10 + $0xc8] sm:$0xff] }
 0x576   : > { %v3861_v25 = vpop.f32.mrb[40].mxu0  ;;  %3908 = vmatprep.mubr.msk.f32.mxu1 %vm996_vm5, %v2272_v22 }
 0x577   : > { %v2139_v55 = vpop.f32.mrb[41].mxu0  ;;  %3909 = vmatmul.mubr.msk.f32.gmra.mrb[42].mxu1 %vm996_vm5, %v2273_v24  ;;  %v2275_v29 = vmul.f32 %v4152_v28, %v3861_v25  ;;  %v4171_v24 = vld [vmem:[%s5406_s10 + $0xd0] sm:$0xff] }
 0x578   : > { %v2274_v27 = vmul.f32 %v4151_v26, %v2139_v55  ;;  %v4172_v55 = vld [vmem:[%s5406_s10 + $0xd8] sm:$0xff] }
 0x57a   : > { %v3864_v30 = vpop.f32.mrb[42].mxu0  ;;  %3911 = vmatprep.mubr.msk.f32.mxu1 %vm996_vm5, %v2274_v27 }
 0x57b   : > { %v2149_v31 = vpop.f32.mrb[43].mxu0  ;;  %3912 = vmatmul.mubr.msk.f32.gmra.mrb[44].mxu1 %vm996_vm5, %v2275_v29  ;;  %v2277_v35 = vmul.f32 %v4154_v34, %v3864_v30  ;;  %v4173_v29 = vld [vmem:[%s5406_s10 + $0xe0] sm:$0xff] }
 0x57c   : > { %v2276_v33 = vmul.f32 %v4153_v32, %v2149_v31  ;;  %v4174_v31 = vld [vmem:[%s5406_s10 + $0xe8] sm:$0xff] }
 0x57e   : > { %v3867_v36 = vpop.f32.mrb[44].mxu0  ;;  %3914 = vmatprep.mubr.msk.f32.mxu1 %vm996_vm5, %v2276_v33 }
 0x57f   : > { %v2159_v37 = vpop.f32.mrb[45].mxu0  ;;  %3915 = vmatmul.mubr.msk.f32.gmra.mrb[46].mxu1 %vm996_vm5, %v2277_v35  ;;  %v2279_v41 = vmul.f32 %v4156_v40, %v3867_v36  ;;  %v4175_v35 = vld [vmem:[%s5406_s10 + $0xf0] sm:$0xff] }
 0x580   : > { %v2278_v39 = vmul.f32 %v4155_v38, %v2159_v37  ;;  %v4176_v37 = vld [vmem:[%s5406_s10 + $0xf8] sm:$0xff] }
 0x582   : > { %v3870_v42 = vpop.f32.mrb[46].mxu0  ;;  %3917 = vmatprep.mubr.msk.f32.mxu1 %vm996_vm5, %v2278_v39 }
 0x583   : > { %v2169_v43 = vpop.f32.mrb[47].mxu0  ;;  %3918 = vmatmul.mubr.msk.f32.gmra.mrb[48].mxu1 %vm996_vm5, %v2279_v41  ;;  %v2281_v47 = vmul.f32 %v4158_v46, %v3870_v42  ;;  %v3007_v41 = vld [vmem:[%s5410_s14] sm:$0xff]  ;;  %v3009_v42 = vld [vmem:[%s5410_s14 + $0x10] sm:$0xff] }
 0x584   : > { %v2280_v45 = vmul.f32 %v4157_v44, %v2169_v43  ;;  %v3008_v43 = vld [vmem:[%s5410_s14 + $0x8] sm:$0xff]  ;;  %v3010_v44 = vld [vmem:[%s5410_s14 + $0x18] sm:$0xff] }
 0x586   : > { %v3873_v48 = vpop.f32.mrb[48].mxu0  ;;  %3920 = vmatprep.mubr.msk.f32.mxu1 %vm996_vm5, %v2280_v45 }
 0x587   : > { %v2179_v49 = vpop.f32.mrb[49].mxu0  ;;  %3921 = vmatmul.mubr.msk.f32.gmra.mrb[50].mxu1 %vm996_vm5, %v2281_v47  ;;  %v2283_v54 = vmul.f32 %v4160_v52, %v3873_v48 }
 0x588   : > { %v2282_v51 = vmul.f32 %v4159_v50, %v2179_v49 }
 0x58a   : > { %v3876_v56 = vpop.f32.mrb[50].mxu0  ;;  %3923 = vmatprep.mubr.msk.f32.mxu1 %vm996_vm5, %v2282_v51 }
 0x58b   : > { %v2189_v57 = vpop.f32.mrb[51].mxu0  ;;  %3924 = vmatmul.mubr.msk.f32.gmra.mrb[52].mxu1 %vm996_vm5, %v2283_v54  ;;  %v2285_v61 = vmul.f32 %v4162_v60, %v3876_v56 }
 0x58c   : > { %v2284_v59 = vmul.f32 %v4161_v58, %v2189_v57  ;;  %v2654_v57 = vld [vmem:[#allocation9 + $0x8] sm:$0xff] }
 0x58e   : > { %v3879_v62 = vpop.f32.mrb[52].mxu0  ;;  %3926 = vmatprep.mubr.msk.f32.mxu1 %vm996_vm5, %v2284_v59  ;;  %v2653_v59 = vld [vmem:[#allocation9] sm:$0xff] }
 0x58f   : > { %v2199_v63 = vpop.f32.mrb[53].mxu0  ;;  %3927 = vmatmul.mubr.msk.f32.gmra.mrb[54].mxu1 %vm996_vm5, %v2285_v61  ;;  %v2287_v3 = vmul.f32 %v4164_v2, %v3879_v62  ;;  %v2656_v61 = vmul.f32 0.0, %v2654_v57 }
 0x590   : > { %v2286_v1 = vmul.f32 %v4163_v0, %v2199_v63  ;;  %v2655_v63 = vmul.f32 0.0, %v2653_v59 }
 0x592   : > { %v3882_v4 = vpop.f32.mrb[54].mxu0  ;;  %3929 = vmatprep.mubr.msk.f32.mxu1 %vm996_vm5, %v2286_v1 }
 0x593   : > { %v2209_v5 = vpop.f32.mrb[55].mxu0  ;;  %3930 = vmatmul.mubr.msk.f32.gmra.mrb[56].mxu1 %vm996_vm5, %v2287_v3  ;;  %v2289_v9 = vmul.f32 %v4166_v8, %v3882_v4 }
 0x594   : > { %v2288_v7 = vmul.f32 %v4165_v6, %v2209_v5  ;;  %v2666_v5 = vld [vmem:[#allocation9 + $0x18] sm:$0xff] }
 0x596   : > { %v3885_v10 = vpop.f32.mrb[56].mxu0  ;;  %3932 = vmatprep.mubr.msk.f32.mxu1 %vm996_vm5, %v2288_v7  ;;  %v2665_v7 = vld [vmem:[#allocation9 + $0x10] sm:$0xff] }
 0x597   : > { %v2219_v11 = vpop.f32.mrb[57].mxu0  ;;  %3933 = vmatmul.mubr.msk.f32.gmra.mrb[58].mxu1 %vm996_vm5, %v2289_v9  ;;  %v2291_v16 = vmul.f32 %v4168_v14, %v3885_v10 }
 0x598   : > { %v2290_v13 = vmul.f32 %v4167_v12, %v2219_v11 }
 0x59a   : > { %v3888_v17 = vpop.f32.mrb[58].mxu0  ;;  %3935 = vmatprep.mubr.msk.f32.mxu1 %vm996_vm5, %v2290_v13 }
 0x59b   : > { %v2229_v18 = vpop.f32.mrb[59].mxu0  ;;  %3936 = vmatmul.mubr.msk.f32.gmra.mrb[60].mxu1 %vm996_vm5, %v2291_v16  ;;  %v2293_v53 = vmul.f32 %v4170_v21, %v3888_v17  ;;  %v2683_v17 = vld [vmem:[#allocation9 + $0x28] sm:$0xff] }
 0x59c   : > { %v2292_v20 = vmul.f32 %v4169_v19, %v2229_v18  ;;  %v2682_v19 = vld [vmem:[#allocation9 + $0x20] sm:$0xff] }
 0x59e   : > { %v3891_v22 = vpop.f32.mrb[60].mxu0  ;;  %3938 = vmatprep.mubr.msk.f32.mxu1 %vm996_vm5, %v2292_v20 }
 0x59f   : > { %v2239_v23 = vpop.f32.mrb[61].mxu0  ;;  %3939 = vmatmul.mubr.msk.f32.gmra.mrb[62].mxu1 %vm996_vm5, %v2293_v53  ;;  %v2295_v26 = vmul.f32 %v4172_v55, %v3891_v22 }
 0x5a0   : > { %v2294_v25 = vmul.f32 %v4171_v24, %v2239_v23 }
 0x5a2   : > { %v3894_v27 = vpop.f32.mrb[62].mxu0  ;;  %3941 = vmatprep.mubr.msk.f32.mxu1 %vm996_vm5, %v2294_v25 }
 0x5a3   : > { %v2249_v28 = vpop.f32.mrb[63].mxu0  ;;  %3942 = vmatmul.mubr.msk.f32.gmra.mrb[64].mxu1 %vm996_vm5, %v2295_v26  ;;  %v2297_v32 = vmul.f32 %v4174_v31, %v3894_v27  ;;  %v2700_v26 = vld [vmem:[#allocation9 + $0x38] sm:$0xff] }
 0x5a4   : > { %v2296_v30 = vmul.f32 %v4173_v29, %v2249_v28  ;;  %v2699_v28 = vld [vmem:[#allocation9 + $0x30] sm:$0xff] }
 0x5a6   : > { %v3897_v33 = vpop.f32.mrb[64].mxu0  ;;  %3944 = vmatprep.mubr.msk.f32.mxu1 %vm996_vm5, %v2296_v30 }
 0x5a7   : > { %v2259_v34 = vpop.f32.mrb[65].mxu0  ;;  %3945 = vmatmul.mubr.msk.f32.gmra.mrb[66].mxu1 %vm996_vm5, %v2297_v32  ;;  %v2299_v38 = vmul.f32 %v4176_v37, %v3897_v33  ;;  %v2717_v37 = vld [vmem:[#allocation9 + $0x48] sm:$0xff] }
 0x5a8   : > { %v2298_v36 = vmul.f32 %v4175_v35, %v2259_v34 }
 0x5aa   : > { %3947 = vmatprep.mubr.msk.f32.mxu1 %vm996_vm5, %v2298_v36  ;;  %v2996_v39 = vpop.f32.mrb[66].mxu0 }
 0x5ab   : > { %3948 = vmatmul.mubr.msk.f32.gmra.mrb[68].mxu1 %vm996_vm5, %v2299_v38  ;;  %v2998_v40 = vpop.f32.mrb[67].mxu0  ;;  %v5224_v46 = vmul.f32 %v3007_v41, %v2996_v39  ;;  %v2716_v39 = vld [vmem:[#allocation9 + $0x40] sm:$0xff] }
 0x5ac   : > { %v3012_v49 = vmul.f32 %v3008_v43, %v2998_v40 }
 0x5ae   : > { %v3002_v45 = vpop.f32.mrb[68].mxu0 }
 0x5af   : > { %v5226_v47 = vmul.f32 %v3009_v42, %v3002_v45  ;;  %v3004_v48 = vpop.f32.mrb[69].mxu0 }
 0x5b0   : > { %v3014_v50 = vmul.f32 %v3010_v44, %v3004_v48 }
 0x5b1   : > { %v3015_v51 = vpack.c.bf16 %v5226_v47, %v5224_v46  ;;  %v4054_v46 = vld [vmem:[%s5412_s16 + $0x18] sm:$0xff]  }
 0x5b2   : > { %v3016_v52 = vpack.c.bf16 %v3014_v50, %v3012_v49  ;;  %v2734_v50 = vld [vmem:[#allocation9 + $0x58] sm:$0xff]  ;;  %v3033_v47 = vld [vmem:[#allocation3] sm:$0xff] }
 0x5b4   : > { %3076 = vmatprep.mubr.bf16.mxu1 %v3016_v52 }
 0x642   : > { %v3904_v54 = vpop.f32.mrb[38].mxu1 }
 0x643   : > { %2622 = vst.msk [vmem:[#allocation10 + $0x8] sm:$0xff] %vm716_vm2, %v3904_v54  ;;  %v2462_v56 = vpop.f32.mrb[39].mxu1  ;;  %v2733_v54 = vld [vmem:[#allocation9 + $0x50] sm:$0xff] }
 0x644   : > { %2621 = vst.msk [vmem:[#allocation10] sm:$0xff] %vm716_vm2, %v2462_v56 }
 0x646   : > { %v3907_v58 = vpop.f32.mrb[40].mxu1 }
 0x647   : > { %2624 = vst.msk [vmem:[#allocation10 + $0x18] sm:$0xff] %vm716_vm2, %v3907_v58  ;;  %v2472_v60 = vpop.f32.mrb[41].mxu1 }
 0x648   : > { %2623 = vst.msk [vmem:[#allocation10 + $0x10] sm:$0xff] %vm716_vm2, %v2472_v60 }
 0x64a   : > { %v2658_v62 = vld [vmem:[#allocation10 + $0x8] sm:$0xff]  ;;  %v3910_v0 = vpop.f32.mrb[42].mxu1 }
 0x64b   : > { %v2660_v1 = vadd.f32 %v2658_v62, %v2656_v61  ;;  %v2657_v2 = vld [vmem:[#allocation10] sm:$0xff]  ;;  %2626 = vst.msk [vmem:[#allocation10 + $0x28] sm:$0xff] %vm716_vm2, %v3910_v0  ;;  %v2482_v3 = vpop.f32.mrb[43].mxu1  ;;  %v2751_v0 = vld [vmem:[#allocation9 + $0x68] sm:$0xff] }
 0x64c   : > { %v2659_v4 = vadd.f32 %v2657_v2, %v2655_v63  ;;  %2625 = vst.msk [vmem:[#allocation10 + $0x20] sm:$0xff] %vm716_vm2, %v2482_v3  ;;  %v2750_v2 = vld [vmem:[#allocation9 + $0x60] sm:$0xff] }
 0x64d   : > { %v2668_v6 = vmul.f32 %v2666_v5, %v2660_v1 }
 0x64e   : > { %v2661_v8 = vpack.c.bf16 %v2660_v1, %v2659_v4  ;;  %v2671_v9 = vld [vmem:[#allocation10 + $0x18] sm:$0xff]  ;;  %v2667_v10 = vmul.f32 %v2665_v7, %v2659_v4  ;;  %v3913_v11 = vpop.f32.mrb[44].mxu1 }
 0x64f   : > { %v2673_v12 = vadd.f32 %v2671_v9, %v2668_v6  ;;  %v2670_v13 = vld [vmem:[#allocation10 + $0x10] sm:$0xff]  ;;  %2628 = vst.msk [vmem:[#allocation10 + $0x38] sm:$0xff] %vm716_vm2, %v3913_v11  ;;  %v2492_v14 = vpop.f32.mrb[45].mxu1  ;;  %v2768_v11 = vld [vmem:[#allocation9 + $0x78] sm:$0xff] }
 0x650   : > { %2662 = vst.msk [vmem:[#allocation11] sm:$0xff] %vm716_vm2, %v2661_v8  ;;  %v2672_v16 = vadd.f32 %v2670_v13, %v2667_v10  ;;  %2627 = vst.msk [vmem:[#allocation10 + $0x30] sm:$0xff] %vm716_vm2, %v2492_v14  ;;  %v2767_v13 = vld [vmem:[#allocation9 + $0x70] sm:$0xff] }
 0x651   : > { %v2685_v18 = vmul.f32 %v2683_v17, %v2673_v12 }
 0x652   : > { %v2674_v20 = vpack.c.bf16 %v2673_v12, %v2672_v16  ;;  %v2688_v21 = vld [vmem:[#allocation10 + $0x28] sm:$0xff]  ;;  %v2684_v53 = vmul.f32 %v2682_v19, %v2672_v16  ;;  %v3916_v22 = vpop.f32.mrb[46].mxu1 }
 0x653   : > { %v2690_v23 = vadd.f32 %v2688_v21, %v2685_v18  ;;  %v2687_v24 = vld [vmem:[#allocation10 + $0x20] sm:$0xff]  ;;  %2630 = vst.msk [vmem:[#allocation10 + $0x48] sm:$0xff] %vm716_vm2, %v3916_v22  ;;  %v2502_v25 = vpop.f32.mrb[47].mxu1  ;;  %v2785_v22 = vld [vmem:[#allocation9 + $0x88] sm:$0xff] }
 0x654   : > { %2679 = vst.msk [vmem:[#allocation11 + $0x8] sm:$0xff] %vm716_vm2, %v2674_v20  ;;  %v2689_v55 = vadd.f32 %v2687_v24, %v2684_v53  ;;  %2629 = vst.msk [vmem:[#allocation10 + $0x40] sm:$0xff] %vm716_vm2, %v2502_v25  ;;  %v2784_v24 = vld [vmem:[#allocation9 + $0x80] sm:$0xff] }
 0x655   : > { %v2702_v27 = vmul.f32 %v2700_v26, %v2690_v23 }
 0x656   : > { %v2691_v29 = vpack.c.bf16 %v2690_v23, %v2689_v55  ;;  %v2705_v30 = vld [vmem:[#allocation10 + $0x38] sm:$0xff]  ;;  %v2701_v31 = vmul.f32 %v2699_v28, %v2689_v55  ;;  %v3919_v32 = vpop.f32.mrb[48].mxu1 }
 0x657   : > { %v2707_v33 = vadd.f32 %v2705_v30, %v2702_v27  ;;  %v2704_v34 = vld [vmem:[#allocation10 + $0x30] sm:$0xff]  ;;  %2632 = vst.msk [vmem:[#allocation10 + $0x58] sm:$0xff] %vm716_vm2, %v3919_v32  ;;  %v2512_v35 = vpop.f32.mrb[49].mxu1  ;;  %v2802_v32 = vld [vmem:[#allocation9 + $0x98] sm:$0xff] }
 0x658   : > { %2696 = vst.msk [vmem:[#allocation11 + $0x10] sm:$0xff] %vm716_vm2, %v2691_v29  ;;  %v2706_v36 = vadd.f32 %v2704_v34, %v2701_v31  ;;  %2631 = vst.msk [vmem:[#allocation10 + $0x50] sm:$0xff] %vm716_vm2, %v2512_v35  ;;  %v2801_v34 = vld [vmem:[#allocation9 + $0x90] sm:$0xff] }
 0x659   : > { %v2719_v38 = vmul.f32 %v2717_v37, %v2707_v33 }
 0x65a   : > { %v2708_v40 = vpack.c.bf16 %v2707_v33, %v2706_v36  ;;  %v2722_v41 = vld [vmem:[#allocation10 + $0x48] sm:$0xff]  ;;  %v2718_v42 = vmul.f32 %v2716_v39, %v2706_v36  ;;  %v3922_v43 = vpop.f32.mrb[50].mxu1 }
 0x65b   : > { %v2724_v44 = vadd.f32 %v2722_v41, %v2719_v38  ;;  %v2721_v45 = vld [vmem:[#allocation10 + $0x40] sm:$0xff]  ;;  %2634 = vst.msk [vmem:[#allocation10 + $0x68] sm:$0xff] %vm716_vm2, %v3922_v43  ;;  %v2522_v48 = vpop.f32.mrb[51].mxu1  ;;  %v2819_v43 = vld [vmem:[#allocation9 + $0xa8] sm:$0xff] }
 0x65c   : > { %2713 = vst.msk [vmem:[#allocation11 + $0x18] sm:$0xff] %vm716_vm2, %v2708_v40  ;;  %v2723_v49 = vadd.f32 %v2721_v45, %v2718_v42  ;;  %2633 = vst.msk [vmem:[#allocation10 + $0x60] sm:$0xff] %vm716_vm2, %v2522_v48  ;;  %v2818_v45 = vld [vmem:[#allocation9 + $0xa0] sm:$0xff] }
 0x65d   : > { %v2736_v52 = vmul.f32 %v2734_v50, %v2724_v44 }
 0x65e   : > { %v2725_v56 = vpack.c.bf16 %v2724_v44, %v2723_v49  ;;  %v2739_v57 = vld [vmem:[#allocation10 + $0x58] sm:$0xff]  ;;  %v2735_v58 = vmul.f32 %v2733_v54, %v2723_v49  ;;  %v3925_v59 = vpop.f32.mrb[52].mxu1 }
 0x65f   : > { %v2741_v60 = vadd.f32 %v2739_v57, %v2736_v52  ;;  %v2738_v61 = vld [vmem:[#allocation10 + $0x50] sm:$0xff]  ;;  %2636 = vst.msk [vmem:[#allocation10 + $0x78] sm:$0xff] %vm716_vm2, %v3925_v59  ;;  %v2532_v62 = vpop.f32.mrb[53].mxu1  ;;  %v2836_v59 = vld [vmem:[#allocation9 + $0xb8] sm:$0xff] }
 0x660   : > { %2730 = vst.msk [vmem:[#allocation11 + $0x20] sm:$0xff] %vm716_vm2, %v2725_v56  ;;  %v2740_v63 = vadd.f32 %v2738_v61, %v2735_v58  ;;  %2635 = vst.msk [vmem:[#allocation10 + $0x70] sm:$0xff] %vm716_vm2, %v2532_v62  ;;  %v2835_v61 = vld [vmem:[#allocation9 + $0xb0] sm:$0xff] }
 0x661   : > { %v2753_v1 = vmul.f32 %v2751_v0, %v2741_v60 }
 0x662   : > { %v2742_v3 = vpack.c.bf16 %v2741_v60, %v2740_v63  ;;  %v2756_v4 = vld [vmem:[#allocation10 + $0x68] sm:$0xff]  ;;  %v2752_v5 = vmul.f32 %v2750_v2, %v2740_v63  ;;  %v3928_v6 = vpop.f32.mrb[54].mxu1 }
 0x663   : > { %v2758_v7 = vadd.f32 %v2756_v4, %v2753_v1  ;;  %v2755_v8 = vld [vmem:[#allocation10 + $0x60] sm:$0xff]  ;;  %2638 = vst.msk [vmem:[#allocation10 + $0x88] sm:$0xff] %vm716_vm2, %v3928_v6  ;;  %v2542_v9 = vpop.f32.mrb[55].mxu1 }
 0x664   : > { %2747 = vst.msk [vmem:[#allocation11 + $0x28] sm:$0xff] %vm716_vm2, %v2742_v3  ;;  %v2757_v10 = vadd.f32 %v2755_v8, %v2752_v5  ;;  %2637 = vst.msk [vmem:[#allocation10 + $0x80] sm:$0xff] %vm716_vm2, %v2542_v9  ;;  %v3017_v8 = vld [vmem:[#allocation11] sm:$0xff] }
 0x665   : > { %v2770_v12 = vmul.f32 %v2768_v11, %v2758_v7 }
 0x666   : > { %v2759_v14 = vpack.c.bf16 %v2758_v7, %v2757_v10  ;;  %v2773_v16 = vld [vmem:[#allocation10 + $0x78] sm:$0xff]  ;;  %v2769_v17 = vmul.f32 %v2767_v13, %v2757_v10  ;;  %v3931_v18 = vpop.f32.mrb[56].mxu1  ;;  %v2853_v7 = vld [vmem:[#allocation9 + $0xc8] sm:$0xff]  ;;  %v2852_v10 = vld [vmem:[#allocation9 + $0xc0] sm:$0xff] }
 0x667   : > { %v2775_v19 = vadd.f32 %v2773_v16, %v2770_v12  ;;  %v2772_v20 = vld [vmem:[#allocation10 + $0x70] sm:$0xff]  ;;  %2640 = vst.msk [vmem:[#allocation10 + $0x98] sm:$0xff] %vm716_vm2, %v3931_v18  ;;  %v2552_v21 = vpop.f32.mrb[57].mxu1 }
 0x668   : > { %2764 = vst.msk [vmem:[#allocation11 + $0x30] sm:$0xff] %vm716_vm2, %v2759_v14  ;;  %v2774_v53 = vadd.f32 %v2772_v20, %v2769_v17  ;;  %2639 = vst.msk [vmem:[#allocation10 + $0x90] sm:$0xff] %vm716_vm2, %v2552_v21  ;;  %v2870_v21 = vld [vmem:[#allocation9 + $0xd8] sm:$0xff] }
 0x669   : > { %v2787_v23 = vmul.f32 %v2785_v22, %v2775_v19 }
 0x66a   : > { %v2776_v25 = vpack.c.bf16 %v2775_v19, %v2774_v53  ;;  %v2790_v55 = vld [vmem:[#allocation10 + $0x88] sm:$0xff]  ;;  %v2786_v26 = vmul.f32 %v2784_v24, %v2774_v53  ;;  %v3934_v27 = vpop.f32.mrb[58].mxu1 }
 0x66b   : > { %v2792_v28 = vadd.f32 %v2790_v55, %v2787_v23  ;;  %v2789_v29 = vld [vmem:[#allocation10 + $0x80] sm:$0xff]  ;;  %2642 = vst.msk [vmem:[#allocation10 + $0xa8] sm:$0xff] %vm716_vm2, %v3934_v27  ;;  %v2562_v30 = vpop.f32.mrb[59].mxu1  ;;  %v3018_v53 = vld [vmem:[#allocation11 + $0x8] sm:$0xff]  ;;  %v2869_v23 = vld [vmem:[#allocation9 + $0xd0] sm:$0xff] }
 0x66c   : > { %2781 = vst.msk [vmem:[#allocation11 + $0x38] sm:$0xff] %vm716_vm2, %v2776_v25  ;;  %v2791_v31 = vadd.f32 %v2789_v29, %v2786_v26  ;;  %2641 = vst.msk [vmem:[#allocation10 + $0xa0] sm:$0xff] %vm716_vm2, %v2562_v30 }
 0x66d   : > { %v2804_v33 = vmul.f32 %v2802_v32, %v2792_v28  ;;  %v2887_v32 = vld [vmem:[#allocation9 + $0xe8] sm:$0xff] }
 0x66e   : > { %v2793_v35 = vpack.c.bf16 %v2792_v28, %v2791_v31  ;;  %v2807_v36 = vld [vmem:[#allocation10 + $0x98] sm:$0xff]  ;;  %v2803_v37 = vmul.f32 %v2801_v34, %v2791_v31  ;;  %v3937_v38 = vpop.f32.mrb[60].mxu1 }
 0x66f   : > { %v2809_v39 = vadd.f32 %v2807_v36, %v2804_v33  ;;  %v2806_v40 = vld [vmem:[#allocation10 + $0x90] sm:$0xff]  ;;  %2644 = vst.msk [vmem:[#allocation10 + $0xb8] sm:$0xff] %vm716_vm2, %v3937_v38  ;;  %v2572_v41 = vpop.f32.mrb[61].mxu1 }
 0x670   : > { %2798 = vst.msk [vmem:[#allocation11 + $0x40] sm:$0xff] %vm716_vm2, %v2793_v35  ;;  %v2808_v42 = vadd.f32 %v2806_v40, %v2803_v37  ;;  %2643 = vst.msk [vmem:[#allocation10 + $0xb0] sm:$0xff] %vm716_vm2, %v2572_v41  ;;  %v3019_v33 = vld [vmem:[#allocation11 + $0x10] sm:$0xff]  ;;  %v2886_v35 = vld [vmem:[#allocation9 + $0xe0] sm:$0xff] }
 0x671   : > { %v2821_v44 = vmul.f32 %v2819_v43, %v2809_v39  ;;  %v2904_v43 = vld [vmem:[#allocation9 + $0xf8] sm:$0xff] }
 0x672   : > { %v2810_v48 = vpack.c.bf16 %v2809_v39, %v2808_v42  ;;  %v2824_v49 = vld [vmem:[#allocation10 + $0xa8] sm:$0xff]  ;;  %v2820_v50 = vmul.f32 %v2818_v45, %v2808_v42  ;;  %v3940_v52 = vpop.f32.mrb[62].mxu1 }
 0x673   : > { %v2826_v54 = vadd.f32 %v2824_v49, %v2821_v44  ;;  %v2823_v56 = vld [vmem:[#allocation10 + $0xa0] sm:$0xff]  ;;  %2646 = vst.msk [vmem:[#allocation10 + $0xc8] sm:$0xff] %vm716_vm2, %v3940_v52  ;;  %v2582_v57 = vpop.f32.mrb[63].mxu1  ;;  %v3020_v44 = vld [vmem:[#allocation11 + $0x18] sm:$0xff] }
 0x674   : > { %2815 = vst.msk [vmem:[#allocation11 + $0x48] sm:$0xff] %vm716_vm2, %v2810_v48  ;;  %v2825_v58 = vadd.f32 %v2823_v56, %v2820_v50  ;;  %2645 = vst.msk [vmem:[#allocation10 + $0xc0] sm:$0xff] %vm716_vm2, %v2582_v57  ;;  %v2903_v48 = vld [vmem:[#allocation9 + $0xf0] sm:$0xff] }
 0x675   : > { %v2838_v60 = vmul.f32 %v2836_v59, %v2826_v54  ;;  %v3021_v59 = vld [vmem:[#allocation11 + $0x20] sm:$0xff] }
 0x676   : > { %v2827_v62 = vpack.c.bf16 %v2826_v54, %v2825_v58  ;;  %v2841_v63 = vld [vmem:[#allocation10 + $0xb8] sm:$0xff]  ;;  %v2837_v0 = vmul.f32 %v2835_v61, %v2825_v58  ;;  %v3943_v1 = vpop.f32.mrb[64].mxu1 }
 0x677   : > { %v2843_v2 = vadd.f32 %v2841_v63, %v2838_v60  ;;  %v2840_v3 = vld [vmem:[#allocation10 + $0xb0] sm:$0xff]  ;;  %2648 = vst.msk [vmem:[#allocation10 + $0xd8] sm:$0xff] %vm716_vm2, %v3943_v1  ;;  %v2592_v4 = vpop.f32.mrb[65].mxu1  ;;  %v3025_v5 = vld [vmem:[#allocation11 + $0x40] sm:$0xff] }
 0x678   : > { %2832 = vst.msk [vmem:[#allocation11 + $0x50] sm:$0xff] %vm716_vm2, %v2827_v62  ;;  %v2842_v6 = vadd.f32 %v2840_v3, %v2837_v0  ;;  %2647 = vst.msk [vmem:[#allocation10 + $0xd0] sm:$0xff] %vm716_vm2, %v2592_v4  ;;  %3683 = vmatprep.subr.bf16.mxu1 %v3025_v5  ;;  %v3022_v62 = vld [vmem:[#allocation11 + $0x28] sm:$0xff]  ;;  %v3023_v0 = vld [vmem:[#allocation11 + $0x30] sm:$0xff] }
 0x679   : > { %v2855_v9 = vmul.f32 %v2853_v7, %v2843_v2  ;;  %3684 = vmatpush3.bf16.msra.mxu1 %v3017_v8  ;;  %v4051_v3 = vld [vmem:[%s5412_s16] sm:$0xff]   ;;  %v4052_v4 = vld [vmem:[%s5412_s16 + $0x8] sm:$0xff]   ;;  %v4053_v5 = vld [vmem:[%s5412_s16 + $0x10] sm:$0xff]  }
 0x67a   : > { %v2844_v11 = vpack.c.bf16 %v2843_v2, %v2842_v6  ;;  %v2858_v12 = vld [vmem:[#allocation10 + $0xc8] sm:$0xff]  ;;  %v2854_v13 = vmul.f32 %v2852_v10, %v2842_v6  ;;  %v3946_v14 = vpop.f32.mrb[66].mxu1  ;;  %v3024_v2 = vld [vmem:[#allocation11 + $0x38] sm:$0xff]  ;;  %3951 = vmatpush3.bf16.msra.mxu0 %v4051_v3 }
 0x67b   : > { %v2860_v16 = vadd.f32 %v2858_v12, %v2855_v9  ;;  %v2857_v17 = vld [vmem:[#allocation10 + $0xc0] sm:$0xff]  ;;  %2650 = vst.msk [vmem:[#allocation10 + $0xe8] sm:$0xff] %vm716_vm2, %v3946_v14  ;;  %v2602_v18 = vpop.f32.mrb[67].mxu1  ;;  %v3026_v19 = vld [vmem:[#allocation11 + $0x48] sm:$0xff]  ;;  %3952 = vmatprep.subr.bf16.mxu0 %v4273_v15  ;;  %v3034_v8 = vld [vmem:[#allocation3 + $0x8] sm:$0xff] }
 0x67c   : > { %2849 = vst.msk [vmem:[#allocation11 + $0x58] sm:$0xff] %vm716_vm2, %v2844_v11  ;;  %v2859_v20 = vadd.f32 %v2857_v17, %v2854_v13  ;;  %2649 = vst.msk [vmem:[#allocation10 + $0xe0] sm:$0xff] %vm716_vm2, %v2602_v18  ;;  %3685 = vmatprep.subr.bf16.mxu1 %v3026_v19  ;;  %v3085_v12 = vld [vmem:[#allocation7] sm:$0xff] }
 0x67d   : > { %v2872_v22 = vmul.f32 %v2870_v21, %v2860_v16  ;;  %3686 = vmatpush3.bf16.msra.mxu1 %v3018_v53  ;;  %v3086_v17 = vunpack.c.l.bf16 %v3085_v12  ;;  %v3087_v19 = vunpack.c.h.bf16 %v3085_v12 }
 0x67e   : > { %v2861_v24 = vpack.c.bf16 %v2860_v16, %v2859_v20  ;;  %v2875_v25 = vld [vmem:[#allocation10 + $0xd8] sm:$0xff]  ;;  %v2871_v55 = vmul.f32 %v2869_v23, %v2859_v20  ;;  %v3949_v26 = vpop.f32.mrb[68].mxu1  ;;  %3953 = vmatpush3.bf16.msra.mxu0 %v4052_v4 }
 0x67f   : > { %v2877_v27 = vadd.f32 %v2875_v25, %v2872_v22  ;;  %v2874_v28 = vld [vmem:[#allocation10 + $0xd0] sm:$0xff]  ;;  %2652 = vst.msk [vmem:[#allocation10 + $0xf8] sm:$0xff] %vm716_vm2, %v3949_v26  ;;  %v2612_v29 = vpop.f32.mrb[69].mxu1  ;;  %3954 = vmatprep.subr.bf16.mxu0 %v4273_v15 }
 0x680   : > { %v3027_v30 = vld [vmem:[#allocation11 + $0x50] sm:$0xff]  ;;  %2866 = vst.msk [vmem:[#allocation11 + $0x60] sm:$0xff] %vm716_vm2, %v2861_v24  ;;  %v2876_v31 = vadd.f32 %v2874_v28, %v2871_v55  ;;  %2651 = vst.msk [vmem:[#allocation10 + $0xf0] sm:$0xff] %vm716_vm2, %v2612_v29 }
 0x681   : > { %3687 = vmatprep.subr.bf16.mxu1 %v3027_v30  ;;  %v2889_v34 = vmul.f32 %v2887_v32, %v2877_v27 }
 0x682   : > { %3688 = vmatpush3.bf16.msra.mxu1 %v3019_v33  ;;  %v2878_v36 = vpack.c.bf16 %v2877_v27, %v2876_v31  ;;  %v2892_v37 = vld [vmem:[#allocation10 + $0xe8] sm:$0xff]  ;;  %v2888_v38 = vmul.f32 %v2886_v35, %v2876_v31  ;;  %3955 = vmatpush3.bf16.msra.mxu0 %v4053_v5 }
 0x683   : > { %v2894_v39 = vadd.f32 %v2892_v37, %v2889_v34  ;;  %v2891_v40 = vld [vmem:[#allocation10 + $0xe0] sm:$0xff]  ;;  %v3028_v41 = vld [vmem:[#allocation11 + $0x58] sm:$0xff]  ;;  %3956 = vmatprep.subr.bf16.mxu0 %v4273_v15 }
 0x684   : > { %2883 = vst.msk [vmem:[#allocation11 + $0x68] sm:$0xff] %vm716_vm2, %v2878_v36  ;;  %v2893_v42 = vadd.f32 %v2891_v40, %v2888_v38  ;;  %3689 = vmatprep.subr.bf16.mxu1 %v3028_v41 }
 0x685   : > { %v2906_v45 = vmul.f32 %v2904_v43, %v2894_v39 }
 0x686   : > { %3690 = vmatpush3.bf16.msra.mxu1 %v3020_v44  ;;  %v2895_v49 = vpack.c.bf16 %v2894_v39, %v2893_v42  ;;  %v2909_v50 = vld [vmem:[#allocation10 + $0xf8] sm:$0xff]  ;;  %v2905_v52 = vmul.f32 %v2903_v48, %v2893_v42  ;;  %3957 = vmatpush3.bf16.msra.mxu0 %v4054_v46 }
 0x687   : > { %v2911_v54 = vadd.f32 %v2909_v50, %v2906_v45  ;;  %v2908_v56 = vld [vmem:[#allocation10 + $0xf0] sm:$0xff]  ;;  %v3029_v57 = vld [vmem:[#allocation11 + $0x60] sm:$0xff] }
 0x688   : > { %2900 = vst.msk [vmem:[#allocation11 + $0x70] sm:$0xff] %vm716_vm2, %v2895_v49  ;;  %v2910_v58 = vadd.f32 %v2908_v56, %v2905_v52  ;;  %3691 = vmatprep.subr.bf16.mxu1 %v3029_v57 }
 0x68a   : > { %3692 = vmatpush3.bf16.msra.mxu1 %v3021_v59  ;;  %v2912_v60 = vpack.c.bf16 %v2911_v54, %v2910_v58 }
 0x68b   : > { %v3030_v61 = vld [vmem:[#allocation11 + $0x68] sm:$0xff] }
 0x68c   : > { %2917 = vst.msk [vmem:[#allocation11 + $0x78] sm:$0xff] %vm716_vm2, %v2912_v60  ;;  %3693 = vmatprep.subr.bf16.mxu1 %v3030_v61 }
 0x68e   : > { %3694 = vmatpush3.bf16.msra.mxu1 %v3022_v62 }
 0x68f   : > { %v3031_v63 = vld [vmem:[#allocation11 + $0x70] sm:$0xff] }
 0x690   : > { %3695 = vmatprep.subr.bf16.mxu1 %v3031_v63 }
 0x692   : > { %3696 = vmatpush3.bf16.msra.mxu1 %v3023_v0 }
 0x693   : > { %v3032_v1 = vld [vmem:[#allocation11 + $0x78] sm:$0xff] }
 0x694   : > { %3697 = vmatprep.subr.bf16.mxu1 %v3032_v1 }
 0x696   : > { %3698 = vmatpush3.bf16.msra.mxu1 %v3024_v2 }
 0x699   : > { %3077 = vmatmul.mubr.bf16.vlgmr.msra.gmra.mrb[72].mxu1 %v3015_v51  ;;  %v3514_v51 = vld [vmem:[%s5411_s15] ss:$0 sm:$0xff] }
 0x69a   : > { %v3042_v9 = vmul.f32 %v3514_v51, %v3033_v47  ;;  %v3043_v15 = vmul.f32 %v3514_v51, %v3034_v8 }
 0x76c   : > { %v3699_v6 = vpop.f32.mrb[72].mxu1 }
 0x76d   : > { %v3700_v7 = vpop.f32.mrb[73].mxu1 }
 0x76e   : > { %v3701_v10 = vadd.f32 %v3700_v7, %v3699_v6  ;;  %v3702_v11 = vpop.f32.mrb[74].mxu1 }
 0x76f   : > { %v3703_v13 = vpop.f32.mrb[75].mxu1 }
 0x770   : > { %v3079_v14 = vadd.f32 %v3701_v10, %v3042_v9  ;;  %v3704_v16 = vadd.f32 %v3703_v13, %v3702_v11 }
 0x772   : > { %v3082_v18 = vadd.f32 %v3704_v16, %v3043_v15  ;;  %v3088_v20 = vmul.f32 %v3086_v17, %v3079_v14 }
 0x774   : > { %v3089_v21 = vmul.f32 %v3087_v19, %v3082_v18 }
 0x776   : > { %v3090_v53 = vpack.c.bf16 %v3089_v21, %v3088_v20 }
 0x778   : > { %3091 = vst.msk [vmem:[#allocation8] sm:$0xff] %vm716_vm2, %v3090_v53 }
 0x77f   : > { %v3092_v22 = vld [vmem:[#allocation8] sm:$0xff] }
 0x780   : > { %3959 = vmatmul.mubr.msk.bf16.vlgmr.msra.gmra.mrb[72].mxu0 %vm716_vm2, %v3092_v22 }
 0x781   : > { %4190 = shalt.err (!%p4187_p3)
}
 0x782   : > { %s4191_s22 = scalar_lea.hbm %s5310_s19, 256  ;;  %s4195_s21 = scalar_lea.hbm %s5414_s18, 512 }
 0x783   : > { %p4192_p4 = scmp.ne.s32.totalorder %s5310_s19, %s4191_s22  ;;  %p4196_p9 = scmp.lt.u32.totalorder %s5310_s19, %s5414_s18 }
 0x784   : > { %p4197_p10 = scmp.lt.u32.totalorder %s4195_s21, %s4191_s22  ;;  %p4199_p12 = scmp.lt.u32.totalorder %s4191_s22, %s5310_s19 }
 0x785   : > { %p4193_p7 = pnand %p4192_p4, %p4415_p5 }
 0x786   : > { %p4198_p11 = por %p4197_p10, %p4196_p9 }
 0x787   : > { %p4194_p8 = pneg %p4193_p7 }
 0x788   : > { %p4200_p13 = por %p4199_p12, %p4198_p11 }
 0x78a   : > { %p4201_p0 = pnand %p4200_p13, %p4194_p8 }
 0x78c   : > { %4204 = shalt.err (!%p4201_p0)
}
 0x78d   : > { %s5422_s20 = smov 128   ;;  %s4280_s29 = smov 8  }
 0x78e   : > { %3999 = dma.vmem_to_hbm [thread:$0]  (%p4415_p5), %s5303_s3, 256, %s5310_s19, %s3177_s25, %s5422_s20, %s5422_s20, %s4280_s29  }
 0x78f   : > { %s5440_s28 = sshll.u32 %s4427_s24, 4  ;;  %s5441_s26 = sshll.u32 %s4398_s0, 8 }
 0x790   : > { %s572_s22 = scalar_lea.vmem [#allocation12], %s5440_s28  ;;  %s5349_s4 = scalar_lea.hbm %s5413_s17, %s5441_s26 }
 0x791   : > { %s3190_s23 = sshll.u32 %s572_s22, 4  ;;  %s3172_s3 = scalar_lea.sflag [#allocation13], %s4427_s24  ;;  %s5341_s23 = int_to_ptr.vmem [resolvable:$true] %s3190_s23 }
 0x792   : > { %s4205_s19 = scalar_lea.vmem %s5341_s23, 256  ;;  %s4281_s25 = smov [#allocation12]  }
 0x793   : > { %p4206_p1 = scmp.ne.s32.totalorder %s5341_s23, %s4205_s19  ;;  %s4209_s28 = sshll.u32 %s4281_s25, 4  ;;  %s4210_s28 = int_to_ptr.vmem [resolvable:$false] %s4209_s28 }
 0x794   : > { %s4211_s20 = scalar_lea.vmem %s4210_s28, 512  ;;  %p4212_p4 = scmp.lt.s32.totalorder %s5341_s23, %s4210_s28 }
 0x795   : > { %p4207_p2 = pnand %p4206_p1, %p4415_p5  ;;  %p4213_p7 = scmp.lt.s32.totalorder %s4211_s20, %s4205_s19 }
 0x797   : > { %p4208_p3 = pneg %p4207_p2  ;;  %p4214_p8 = por %p4213_p7, %p4212_p4 }
 0x799   : > { %p4215_p9 = pnand %p4214_p8, %p4208_p3 }
 0x853   : > { %v3162_v23 = vpop.f32.mrb[72].mxu0 }
 0x854   : > { %3169 = vst.msk [vmem:[%s572_s22] sm:$0xff] %vm588_vm0, %v3162_v23  ;;  %v3960_v24 = vpop.f32.mrb[73].mxu0 }
 0x855   : > { %v3165_v25 = vpop.f32.mrb[74].mxu0 }
 0x856   : > { %3170 = vst.msk [vmem:[%s572_s22 + $0x8] sm:$0xff] %vm588_vm0, %v3165_v25  ;;  %v3961_v55 = vpop.f32.mrb[75].mxu0 }
 0x857   : > { %4218 = shalt.err (!%p4215_p9)
}
 0x858   : > { %s4219_s0 = scalar_lea.hbm %s5349_s4, 256  ;;  %s4223_s21 = scalar_lea.hbm %s5413_s17, 512 }
 0x859   : > { %p4220_p10 = scmp.ne.s32.totalorder %s5349_s4, %s4219_s0  ;;  %p4224_p13 = scmp.lt.u32.totalorder %s5349_s4, %s5413_s17 }
 0x85a   : > { %p4225_p0 = scmp.lt.u32.totalorder %s4223_s21, %s4219_s0  ;;  %p4227_p2 = scmp.lt.u32.totalorder %s4219_s0, %s5349_s4 }
 0x85b   : > { %p4221_p11 = pnand %p4220_p10, %p4415_p5 }
 0x85c   : > { %p4226_p1 = por %p4225_p0, %p4224_p13 }
 0x85d   : > { %p4222_p12 = pneg %p4221_p11 }
 0x85e   : > { %p4228_p3 = por %p4227_p2, %p4226_p1 }
 0x860   : > { %p4229_p4 = pnand %p4228_p3, %p4222_p12 }
 0x862   : > { %4232 = shalt.err (!%p4229_p4)
}
 0x863   : > { %s5442_s20 = smov 128  }
 0x864   : > { %3998 = dma.vmem_to_hbm [thread:$0]  (%p4415_p5), %s5341_s23, 256, %s5349_s4, %s3172_s3, %s5442_s20, %s5442_s20, %s4280_s29  }
 0x865 PF: > { %p4009_p7 = scmp.ge.s32.totalorder %s4271_s30, 2  ;;  %s3221_s28 = sand.u32 1, %s4259_s27  }
 0x866   : > { %s3222_s0 = scalar_lea.sflag [#allocation13], %s3221_s28 }
 0x867   : > { %p4003_p8 = pnand %p4009_p7, %p4419_p6 }
 0x869   : > { %4250 = dma.done.wait (!%p4003_p8), %s3222_s0, 256  }
 0x86a   : > { %4252 = vsyncadd (!%p4003_p8), %s3222_s0, 4294967040  ;;  %s3231_s2 = scalar_lea.sflag [#allocation15], %s3221_s28 }
 0x86b   : > { %4254 = dma.done.wait (!%p4003_p8), %s3231_s2, 256  }
 0x86c   : > { %4256 = vsyncadd (!%p4003_p8), %s3231_s2, 4294967040  ;;  %s5444_s30 = sld [smem:[#allocation20_spill]]  ;;  %s5445_s27 = sld [smem:[#allocation18_spill]] }
 0x86d   : > { %s5446_s28 = sld [smem:[#allocation19_spill]]  ;;  %s5447_s29 = sld [smem:[#allocation21_spill]] }
 0x872   : > { %p32_p5 = scmp.ge.s32.totalorder %s5444_s30, 4  }
 0x874   :  { %34 = sbr.rel (!%p32_p5) target bundleno = 11 (0xb), region = 185 }
 0x87b   :  { %3236 = vsyncpa [#allocation13], 1 }
 0x87c   :  { %3238 = vsyncpa [#allocation13 + $0x1], 1 }
 0x87d   :  { %3239 = vsyncpa [#allocation15], 1 }
 0x87e   :  { %3241 = vsyncpa [#allocation15 + $0x1], 1 }

</bundles_post_ra>
